<compile_context>
chip_gen: v7x
topology: tpu7x:2x2x1
jax: 0.10.0
libtpu: 0.0.40
codegen_flags: <defaults>
</compile_context>

<pallas_src>
import functools
import numpy as np

import jax
import jax.numpy as jnp
from jax import lax
from jax.experimental import pallas as pl
from jax.experimental.pallas import tpu as pltpu


def _lpc_kernel(order, win_size, f_ref, w_ref, o_ref):
    """LPC for one block of frames, lane-major (frames along the lane axis).

    f_ref: (W_pad, BR) float32 -- samples on sublanes, frames on lanes.
    w_ref: (W_pad, 1)  float32 -- window column, zero on padded sample rows.
    o_ref: (order+1, BR) float32 -- LPC coefficients, lane-dense store.
    """
    f = f_ref[...]
    win = w_ref[...]

    # Per-frame mean removal (padded sample rows are zero, so the sum over the
    # padded axis equals the sum over the true win_size samples) + windowing.
    # The window is zero on padded rows, so they stay exactly zero afterwards.
    mean = jnp.sum(f, axis=0, keepdims=True) * (1.0 / win_size)      # (1, BR)
    f = (f - mean) * win

    # Silent / degenerate frames -> [1, 0, ..., 0] (matches lpc_frame: the
    # check is applied after mean removal and windowing).
    bad = jnp.max(jnp.abs(f), axis=0, keepdims=True) <= 1e-4         # (1, BR)

    # Autocorrelation lags r[0..order].  The sublane axis carries >= `order`
    # trailing zero rows, so a cyclic roll wraps only zeros and
    # sum(f * roll(f, k)) equals the truncated lag-k autocorrelation.
    rs = []
    for k in range(order + 1):
        fk = f if k == 0 else pltpu.roll(f, shift=k, axis=0)
        rs.append(jnp.sum(f * fk, axis=0, keepdims=True))            # (1, BR)

    # Levinson-Durbin recursion, fully vectorized across frames (lane axis).
    # TODO(synk): pysptk raises (-> zeros, feat[0]=1) when SPTK levdur reports
    # hard failure; we approximate that path by flagging frames whose
    # prediction error becomes non-positive (|k|>=1 only triggers a warning in
    # pysptk, so those coefficients are kept, matching the reference).
    a = [jnp.ones_like(rs[0])] + [jnp.zeros_like(rs[0]) for _ in range(order)]
    E = rs[0]
    for i in range(1, order + 1):
        bad = jnp.logical_or(bad, E <= 0.0)
        acc = rs[i]
        for j in range(1, i):
            acc = acc + a[j] * rs[i - j]
        e_safe = jnp.where(E > 0.0, E, 1.0)
        k_i = -acc * pl.reciprocal(e_safe, approx=False)              # EUP slot
        new_a = list(a)
        new_a[i] = k_i
        for j in range(1, i):
            new_a[j] = a[j] + k_i * a[i - j]
        a = new_a
        E = E * (1.0 - k_i * k_i)

    coef = jnp.concatenate(a, axis=0)                                 # (order+1, BR)
    row0 = lax.broadcasted_iota(jnp.int32, coef.shape, 0) == 0
    degen = jnp.where(row0, 1.0, 0.0)
    o_ref[...] = jnp.where(bad, degen, coef)


def lpc_layer_forward(signals, *, win_size, hop_size, order, block_rows=256):
    """JAX/Pallas equivalent of LPCLayer.forward (preemphasis=0, win_fn='hamm')."""
    assert block_rows % 128 == 0, "block_rows must be a multiple of 128"
    signals = jnp.asarray(signals, dtype=jnp.float32)
    B, L = signals.shape
    n_frames = (L - win_size) // hop_size + 1
    R = B * n_frames

    # ---- framing (gather glue, plain JAX), directly into lane-major layout --
    samp = jnp.arange(win_size)[:, None]                     # (W, 1)
    start = hop_size * jnp.arange(n_frames)[None, :]         # (1, n_frames)
    idx = samp + start                                        # (W, n_frames)
    frames_t = signals[:, idx]                                # (B, W, n_frames)
    frames_t = jnp.transpose(frames_t, (1, 0, 2)).reshape(win_size, R)  # (W, R)

    # Pad: sample axis to a multiple of 128 with >= `order` zero rows (for the
    # roll-based autocorrelation); frame axis to a multiple of block_rows.
    W_pad = ((win_size + order + 127) // 128) * 128
    R_pad = ((R + block_rows - 1) // block_rows) * block_rows
    frames_t = jnp.pad(frames_t, ((0, W_pad - win_size), (0, R_pad - R)))

    # Symmetric Hamming window ('hamm'), zero-padded to W_pad, as a column.
    # Kept as a tiny (W_pad, 1) input stream; its per-step DMA is <1% of the
    # frame-block traffic at block_rows>=256.
    # TODO(synk): assumes misc.get_window('hamm', n) is the symmetric Hamming
    # window (denominator n-1); a periodic variant would differ slightly.
    n = np.arange(win_size)
    window = 0.54 - 0.46 * np.cos(2.0 * np.pi * n / max(win_size - 1, 1))
    window = np.pad(window, (0, W_pad - win_size)).astype(np.float32)[:, None]
    window = jnp.asarray(window)                              # (W_pad, 1)

    out = pl.pallas_call(
        functools.partial(_lpc_kernel, order, win_size),
        out_shape=jax.ShapeDtypeStruct((order + 1, R_pad), jnp.float32),
        grid=(R_pad // block_rows,),
        in_specs=[
            pl.BlockSpec((W_pad, block_rows), lambda i: (0, i)),
            pl.BlockSpec((W_pad, 1), lambda i: (0, 0)),
        ],
        out_specs=pl.BlockSpec((order + 1, block_rows), lambda i: (0, i)),
        compiler_params=pltpu.CompilerParams(
            dimension_semantics=("parallel",)),
    )(frames_t, window)

    # columns are ordered r = b * n_frames + j
    out = out[:, :R].reshape(order + 1, B, n_frames)
    return jnp.transpose(out, (1, 0, 2))                      # (B, order+1, n_frames)


def _lpc_reference(signals, win_size, hop_size, order):
    """Pure numpy reference (same math as the torch module's lpc_frame path)."""
    signals = np.asarray(signals, dtype=np.float64)
    B, L = signals.shape
    n_frames = (L - win_size) // hop_size + 1
    nn = np.arange(win_size)
    window = 0.54 - 0.46 * np.cos(2.0 * np.pi * nn / max(win_size - 1, 1))
    out = np.zeros((B, order + 1, n_frames), dtype=np.float32)
    for b in range(B):
        for j in range(n_frames):
            fr = signals[b, j * hop_size: j * hop_size + win_size].copy()
            fr = fr - fr.mean()
            fr = fr * window
            feat = np.zeros(order + 1, dtype=np.float64)
            if np.abs(fr).max() > 1e-4:
                r = np.array([np.dot(fr, fr) if k == 0 else np.dot(fr[:-k], fr[k:])
                              for k in range(order + 1)])
                a = np.zeros(order + 1); a[0] = 1.0
                E = r[0]
                ok = True
                for i in range(1, order + 1):
                    if E <= 0.0:
                        ok = False
                        break
                    acc = r[i] + sum(a[jj] * r[i - jj] for jj in range(1, i))
                    k = -acc / E
                    new_a = a.copy(); new_a[i] = k
                    for jj in range(1, i):
                        new_a[jj] = a[jj] + k * a[i - jj]
                    a = new_a
                    E = E * (1.0 - k * k)
                if ok:
                    feat = a
            feat[0] = 1.0
            out[b, :, j] = feat.astype(np.float32)
    return out


if __name__ == "__main__":
    # LPCLayer(win_size=64, hop_size=32, order=8, win_fn='hamm') on small inputs
    win_size, hop_size, order = 64, 32, 8
    B, L = 2, 256

    key = jax.random.PRNGKey(0)
    signals = jax.random.normal(key, (B, L), dtype=jnp.float32)

    out = lpc_layer_forward(
        signals, win_size=win_size, hop_size=hop_size, order=order)
    out = jax.block_until_ready(out)

    n_frames = (L - win_size) // hop_size + 1
    assert out.shape == (B, order + 1, n_frames), out.shape
    assert out.dtype == jnp.float32
    assert bool(jnp.all(jnp.isfinite(out)))
    # feat[0] is forced to 1 in the reference implementation
    assert bool(jnp.allclose(out[:, 0, :], 1.0))

    ref = _lpc_reference(np.asarray(signals), win_size, hop_size, order)
    np.testing.assert_allclose(np.asarray(out), ref, rtol=2e-3, atol=2e-3)

    print("KERNEL_OK")
</pallas_src>

<mosaic_0001>
module attributes {stable_mosaic.version = 11 : i64} {
  func.func @_lpc_kernel(%arg0: i32, %arg1: memref<128x256xf32, #tpu.memory_space<vmem>>, %arg2: memref<128x1xf32, #tpu.memory_space<vmem>>, %arg3: memref<9x256xf32, #tpu.memory_space<vmem>>) attributes {dimension_semantics = [#tpu.dimension_semantics<parallel>], iteration_bounds = array<i64: 1>, scalar_prefetch = 0 : i64, scratch_operands = 0 : i64, tpu.core_type = #tpu.core_type<tc>, window_params = [{transform_indices = @transform_0, window_bounds = array<i64: 128, 256>}, {pipeline_mode = #tpu.pipeline_mode<synchronous>, transform_indices = @transform_1, window_bounds = array<i64: 128, 1>}, {transform_indices = @transform_2, window_bounds = array<i64: 9, 256>}]} {
    %c0 = arith.constant 0 : index
    %c0_0 = arith.constant 0 : index
    %0 = vector.load %arg1[%c0, %c0_0] : memref<128x256xf32, #tpu.memory_space<vmem>>, vector<128x256xf32>
    %c0_1 = arith.constant 0 : index
    %c0_2 = arith.constant 0 : index
    %1 = vector.load %arg2[%c0_1, %c0_2] : memref<128x1xf32, #tpu.memory_space<vmem>>, vector<128x1xf32>
    %cst = arith.constant dense<0.000000e+00> : vector<256xf32>
    %2 = vector.multi_reduction <add>, %0, %cst [0] : vector<128x256xf32> to vector<256xf32>
    %3 = vector.shape_cast %2 : vector<256xf32> to vector<1x256xf32>
    %cst_3 = arith.constant 1.562500e-02 : f32
    %4 = vector.broadcast %cst_3 : f32 to vector<1x256xf32>
    %5 = arith.mulf %3, %4 : vector<1x256xf32>
    %6 = vector.broadcast %5 : vector<1x256xf32> to vector<128x256xf32>
    %7 = arith.subf %0, %6 : vector<128x256xf32>
    %8 = vector.broadcast %1 : vector<128x1xf32> to vector<128x256xf32>
    %9 = arith.mulf %7, %8 : vector<128x256xf32>
    %10 = math.absf %9 : vector<128x256xf32>
    %cst_4 = arith.constant dense<0xFF800000> : vector<256xf32>
    %11 = vector.multi_reduction <maximumf>, %10, %cst_4 [0] : vector<128x256xf32> to vector<256xf32>
    %12 = vector.shape_cast %11 : vector<256xf32> to vector<1x256xf32>
    %cst_5 = arith.constant 9.99999974E-5 : f32
    %13 = vector.broadcast %cst_5 : f32 to vector<1x256xf32>
    %14 = arith.cmpf ole, %12, %13 : vector<1x256xf32>
    %15 = arith.mulf %9, %9 : vector<128x256xf32>
    %cst_6 = arith.constant dense<0.000000e+00> : vector<256xf32>
    %16 = vector.multi_reduction <add>, %15, %cst_6 [0] : vector<128x256xf32> to vector<256xf32>
    %17 = vector.shape_cast %16 : vector<256xf32> to vector<1x256xf32>
    %c1_i32 = arith.constant 1 : i32
    %18 = tpu.dynamic_rotate %9 by %c1_i32 dim 0 : vector<128x256xf32>, i32 -> vector<128x256xf32>
    %19 = arith.mulf %9, %18 : vector<128x256xf32>
    %cst_7 = arith.constant dense<0.000000e+00> : vector<256xf32>
    %20 = vector.multi_reduction <add>, %19, %cst_7 [0] : vector<128x256xf32> to vector<256xf32>
    %21 = vector.shape_cast %20 : vector<256xf32> to vector<1x256xf32>
    %c2_i32 = arith.constant 2 : i32
    %22 = tpu.dynamic_rotate %9 by %c2_i32 dim 0 : vector<128x256xf32>, i32 -> vector<128x256xf32>
    %23 = arith.mulf %9, %22 : vector<128x256xf32>
    %cst_8 = arith.constant dense<0.000000e+00> : vector<256xf32>
    %24 = vector.multi_reduction <add>, %23, %cst_8 [0] : vector<128x256xf32> to vector<256xf32>
    %25 = vector.shape_cast %24 : vector<256xf32> to vector<1x256xf32>
    %c3_i32 = arith.constant 3 : i32
    %26 = tpu.dynamic_rotate %9 by %c3_i32 dim 0 : vector<128x256xf32>, i32 -> vector<128x256xf32>
    %27 = arith.mulf %9, %26 : vector<128x256xf32>
    %cst_9 = arith.constant dense<0.000000e+00> : vector<256xf32>
    %28 = vector.multi_reduction <add>, %27, %cst_9 [0] : vector<128x256xf32> to vector<256xf32>
    %29 = vector.shape_cast %28 : vector<256xf32> to vector<1x256xf32>
    %c4_i32 = arith.constant 4 : i32
    %30 = tpu.dynamic_rotate %9 by %c4_i32 dim 0 : vector<128x256xf32>, i32 -> vector<128x256xf32>
    %31 = arith.mulf %9, %30 : vector<128x256xf32>
    %cst_10 = arith.constant dense<0.000000e+00> : vector<256xf32>
    %32 = vector.multi_reduction <add>, %31, %cst_10 [0] : vector<128x256xf32> to vector<256xf32>
    %33 = vector.shape_cast %32 : vector<256xf32> to vector<1x256xf32>
    %c5_i32 = arith.constant 5 : i32
    %34 = tpu.dynamic_rotate %9 by %c5_i32 dim 0 : vector<128x256xf32>, i32 -> vector<128x256xf32>
    %35 = arith.mulf %9, %34 : vector<128x256xf32>
    %cst_11 = arith.constant dense<0.000000e+00> : vector<256xf32>
    %36 = vector.multi_reduction <add>, %35, %cst_11 [0] : vector<128x256xf32> to vector<256xf32>
    %37 = vector.shape_cast %36 : vector<256xf32> to vector<1x256xf32>
    %c6_i32 = arith.constant 6 : i32
    %38 = tpu.dynamic_rotate %9 by %c6_i32 dim 0 : vector<128x256xf32>, i32 -> vector<128x256xf32>
    %39 = arith.mulf %9, %38 : vector<128x256xf32>
    %cst_12 = arith.constant dense<0.000000e+00> : vector<256xf32>
    %40 = vector.multi_reduction <add>, %39, %cst_12 [0] : vector<128x256xf32> to vector<256xf32>
    %41 = vector.shape_cast %40 : vector<256xf32> to vector<1x256xf32>
    %c7_i32 = arith.constant 7 : i32
    %42 = tpu.dynamic_rotate %9 by %c7_i32 dim 0 : vector<128x256xf32>, i32 -> vector<128x256xf32>
    %43 = arith.mulf %9, %42 : vector<128x256xf32>
    %cst_13 = arith.constant dense<0.000000e+00> : vector<256xf32>
    %44 = vector.multi_reduction <add>, %43, %cst_13 [0] : vector<128x256xf32> to vector<256xf32>
    %45 = vector.shape_cast %44 : vector<256xf32> to vector<1x256xf32>
    %c8_i32 = arith.constant 8 : i32
    %46 = tpu.dynamic_rotate %9 by %c8_i32 dim 0 : vector<128x256xf32>, i32 -> vector<128x256xf32>
    %47 = arith.mulf %9, %46 : vector<128x256xf32>
    %cst_14 = arith.constant dense<0.000000e+00> : vector<256xf32>
    %48 = vector.multi_reduction <add>, %47, %cst_14 [0] : vector<128x256xf32> to vector<256xf32>
    %49 = vector.shape_cast %48 : vector<256xf32> to vector<1x256xf32>
    %cst_15 = arith.constant 1.000000e+00 : f32
    %50 = vector.broadcast %cst_15 : f32 to vector<1x256xf32>
    %cst_16 = arith.constant 0.000000e+00 : f32
    %51 = vector.broadcast %cst_16 : f32 to vector<1x256xf32>
    %52 = arith.cmpf ole, %17, %51 : vector<1x256xf32>
    %53 = arith.ori %14, %52 : vector<1x256xi1>
    %cst_17 = arith.constant 0.000000e+00 : f32
    %54 = vector.broadcast %cst_17 : f32 to vector<1x256xf32>
    %55 = arith.cmpf ogt, %17, %54 : vector<1x256xf32>
    %cst_18 = arith.constant 1.000000e+00 : f32
    %56 = vector.broadcast %cst_18 : f32 to vector<1x256xf32>
    %57 = arith.select %55, %17, %56 : vector<1x256xi1>, vector<1x256xf32>
    %cst_19 = arith.constant 0.000000e+00 : f32
    %58 = vector.broadcast %cst_19 : f32 to vector<1x256xf32>
    %59 = arith.subf %58, %21 : vector<1x256xf32>
    %60 = tpu.reciprocal %57 : vector<1x256xf32> -> vector<1x256xf32>
    %61 = arith.mulf %59, %60 : vector<1x256xf32>
    %62 = arith.mulf %61, %61 : vector<1x256xf32>
    %cst_20 = arith.constant 1.000000e+00 : f32
    %63 = vector.broadcast %cst_20 : f32 to vector<1x256xf32>
    %64 = arith.subf %63, %62 : vector<1x256xf32>
    %65 = arith.mulf %17, %64 : vector<1x256xf32>
    %cst_21 = arith.constant 0.000000e+00 : f32
    %66 = vector.broadcast %cst_21 : f32 to vector<1x256xf32>
    %67 = arith.cmpf ole, %65, %66 : vector<1x256xf32>
    %68 = arith.ori %53, %67 : vector<1x256xi1>
    %69 = arith.mulf %61, %21 : vector<1x256xf32>
    %70 = arith.addf %25, %69 : vector<1x256xf32>
    %cst_22 = arith.constant 0.000000e+00 : f32
    %71 = vector.broadcast %cst_22 : f32 to vector<1x256xf32>
    %72 = arith.cmpf ogt, %65, %71 : vector<1x256xf32>
    %cst_23 = arith.constant 1.000000e+00 : f32
    %73 = vector.broadcast %cst_23 : f32 to vector<1x256xf32>
    %74 = arith.select %72, %65, %73 : vector<1x256xi1>, vector<1x256xf32>
    %cst_24 = arith.constant 0.000000e+00 : f32
    %75 = vector.broadcast %cst_24 : f32 to vector<1x256xf32>
    %76 = arith.subf %75, %70 : vector<1x256xf32>
    %77 = tpu.reciprocal %74 : vector<1x256xf32> -> vector<1x256xf32>
    %78 = arith.mulf %76, %77 : vector<1x256xf32>
    %79 = arith.mulf %78, %61 : vector<1x256xf32>
    %80 = arith.addf %61, %79 : vector<1x256xf32>
    %81 = arith.mulf %78, %78 : vector<1x256xf32>
    %cst_25 = arith.constant 1.000000e+00 : f32
    %82 = vector.broadcast %cst_25 : f32 to vector<1x256xf32>
    %83 = arith.subf %82, %81 : vector<1x256xf32>
    %84 = arith.mulf %65, %83 : vector<1x256xf32>
    %cst_26 = arith.constant 0.000000e+00 : f32
    %85 = vector.broadcast %cst_26 : f32 to vector<1x256xf32>
    %86 = arith.cmpf ole, %84, %85 : vector<1x256xf32>
    %87 = arith.ori %68, %86 : vector<1x256xi1>
    %88 = arith.mulf %80, %25 : vector<1x256xf32>
    %89 = arith.addf %29, %88 : vector<1x256xf32>
    %90 = arith.mulf %78, %21 : vector<1x256xf32>
    %91 = arith.addf %89, %90 : vector<1x256xf32>
    %cst_27 = arith.constant 0.000000e+00 : f32
    %92 = vector.broadcast %cst_27 : f32 to vector<1x256xf32>
    %93 = arith.cmpf ogt, %84, %92 : vector<1x256xf32>
    %cst_28 = arith.constant 1.000000e+00 : f32
    %94 = vector.broadcast %cst_28 : f32 to vector<1x256xf32>
    %95 = arith.select %93, %84, %94 : vector<1x256xi1>, vector<1x256xf32>
    %cst_29 = arith.constant 0.000000e+00 : f32
    %96 = vector.broadcast %cst_29 : f32 to vector<1x256xf32>
    %97 = arith.subf %96, %91 : vector<1x256xf32>
    %98 = tpu.reciprocal %95 : vector<1x256xf32> -> vector<1x256xf32>
    %99 = arith.mulf %97, %98 : vector<1x256xf32>
    %100 = arith.mulf %99, %78 : vector<1x256xf32>
    %101 = arith.addf %80, %100 : vector<1x256xf32>
    %102 = arith.mulf %99, %80 : vector<1x256xf32>
    %103 = arith.addf %78, %102 : vector<1x256xf32>
    %104 = arith.mulf %99, %99 : vector<1x256xf32>
    %cst_30 = arith.constant 1.000000e+00 : f32
    %105 = vector.broadcast %cst_30 : f32 to vector<1x256xf32>
    %106 = arith.subf %105, %104 : vector<1x256xf32>
    %107 = arith.mulf %84, %106 : vector<1x256xf32>
    %cst_31 = arith.constant 0.000000e+00 : f32
    %108 = vector.broadcast %cst_31 : f32 to vector<1x256xf32>
    %109 = arith.cmpf ole, %107, %108 : vector<1x256xf32>
    %110 = arith.ori %87, %109 : vector<1x256xi1>
    %111 = arith.mulf %101, %29 : vector<1x256xf32>
    %112 = arith.addf %33, %111 : vector<1x256xf32>
    %113 = arith.mulf %103, %25 : vector<1x256xf32>
    %114 = arith.addf %112, %113 : vector<1x256xf32>
    %115 = arith.mulf %99, %21 : vector<1x256xf32>
    %116 = arith.addf %114, %115 : vector<1x256xf32>
    %cst_32 = arith.constant 0.000000e+00 : f32
    %117 = vector.broadcast %cst_32 : f32 to vector<1x256xf32>
    %118 = arith.cmpf ogt, %107, %117 : vector<1x256xf32>
    %cst_33 = arith.constant 1.000000e+00 : f32
    %119 = vector.broadcast %cst_33 : f32 to vector<1x256xf32>
    %120 = arith.select %118, %107, %119 : vector<1x256xi1>, vector<1x256xf32>
    %cst_34 = arith.constant 0.000000e+00 : f32
    %121 = vector.broadcast %cst_34 : f32 to vector<1x256xf32>
    %122 = arith.subf %121, %116 : vector<1x256xf32>
    %123 = tpu.reciprocal %120 : vector<1x256xf32> -> vector<1x256xf32>
    %124 = arith.mulf %122, %123 : vector<1x256xf32>
    %125 = arith.mulf %124, %99 : vector<1x256xf32>
    %126 = arith.addf %101, %125 : vector<1x256xf32>
    %127 = arith.mulf %124, %103 : vector<1x256xf32>
    %128 = arith.addf %103, %127 : vector<1x256xf32>
    %129 = arith.mulf %124, %101 : vector<1x256xf32>
    %130 = arith.addf %99, %129 : vector<1x256xf32>
    %131 = arith.mulf %124, %124 : vector<1x256xf32>
    %cst_35 = arith.constant 1.000000e+00 : f32
    %132 = vector.broadcast %cst_35 : f32 to vector<1x256xf32>
    %133 = arith.subf %132, %131 : vector<1x256xf32>
    %134 = arith.mulf %107, %133 : vector<1x256xf32>
    %cst_36 = arith.constant 0.000000e+00 : f32
    %135 = vector.broadcast %cst_36 : f32 to vector<1x256xf32>
    %136 = arith.cmpf ole, %134, %135 : vector<1x256xf32>
    %137 = arith.ori %110, %136 : vector<1x256xi1>
    %138 = arith.mulf %126, %33 : vector<1x256xf32>
    %139 = arith.addf %37, %138 : vector<1x256xf32>
    %140 = arith.mulf %128, %29 : vector<1x256xf32>
    %141 = arith.addf %139, %140 : vector<1x256xf32>
    %142 = arith.mulf %130, %25 : vector<1x256xf32>
    %143 = arith.addf %141, %142 : vector<1x256xf32>
    %144 = arith.mulf %124, %21 : vector<1x256xf32>
    %145 = arith.addf %143, %144 : vector<1x256xf32>
    %cst_37 = arith.constant 0.000000e+00 : f32
    %146 = vector.broadcast %cst_37 : f32 to vector<1x256xf32>
    %147 = arith.cmpf ogt, %134, %146 : vector<1x256xf32>
    %cst_38 = arith.constant 1.000000e+00 : f32
    %148 = vector.broadcast %cst_38 : f32 to vector<1x256xf32>
    %149 = arith.select %147, %134, %148 : vector<1x256xi1>, vector<1x256xf32>
    %cst_39 = arith.constant 0.000000e+00 : f32
    %150 = vector.broadcast %cst_39 : f32 to vector<1x256xf32>
    %151 = arith.subf %150, %145 : vector<1x256xf32>
    %152 = tpu.reciprocal %149 : vector<1x256xf32> -> vector<1x256xf32>
    %153 = arith.mulf %151, %152 : vector<1x256xf32>
    %154 = arith.mulf %153, %124 : vector<1x256xf32>
    %155 = arith.addf %126, %154 : vector<1x256xf32>
    %156 = arith.mulf %153, %130 : vector<1x256xf32>
    %157 = arith.addf %128, %156 : vector<1x256xf32>
    %158 = arith.mulf %153, %128 : vector<1x256xf32>
    %159 = arith.addf %130, %158 : vector<1x256xf32>
    %160 = arith.mulf %153, %126 : vector<1x256xf32>
    %161 = arith.addf %124, %160 : vector<1x256xf32>
    %162 = arith.mulf %153, %153 : vector<1x256xf32>
    %cst_40 = arith.constant 1.000000e+00 : f32
    %163 = vector.broadcast %cst_40 : f32 to vector<1x256xf32>
    %164 = arith.subf %163, %162 : vector<1x256xf32>
    %165 = arith.mulf %134, %164 : vector<1x256xf32>
    %cst_41 = arith.constant 0.000000e+00 : f32
    %166 = vector.broadcast %cst_41 : f32 to vector<1x256xf32>
    %167 = arith.cmpf ole, %165, %166 : vector<1x256xf32>
    %168 = arith.ori %137, %167 : vector<1x256xi1>
    %169 = arith.mulf %155, %37 : vector<1x256xf32>
    %170 = arith.addf %41, %169 : vector<1x256xf32>
    %171 = arith.mulf %157, %33 : vector<1x256xf32>
    %172 = arith.addf %170, %171 : vector<1x256xf32>
    %173 = arith.mulf %159, %29 : vector<1x256xf32>
    %174 = arith.addf %172, %173 : vector<1x256xf32>
    %175 = arith.mulf %161, %25 : vector<1x256xf32>
    %176 = arith.addf %174, %175 : vector<1x256xf32>
    %177 = arith.mulf %153, %21 : vector<1x256xf32>
    %178 = arith.addf %176, %177 : vector<1x256xf32>
    %cst_42 = arith.constant 0.000000e+00 : f32
    %179 = vector.broadcast %cst_42 : f32 to vector<1x256xf32>
    %180 = arith.cmpf ogt, %165, %179 : vector<1x256xf32>
    %cst_43 = arith.constant 1.000000e+00 : f32
    %181 = vector.broadcast %cst_43 : f32 to vector<1x256xf32>
    %182 = arith.select %180, %165, %181 : vector<1x256xi1>, vector<1x256xf32>
    %cst_44 = arith.constant 0.000000e+00 : f32
    %183 = vector.broadcast %cst_44 : f32 to vector<1x256xf32>
    %184 = arith.subf %183, %178 : vector<1x256xf32>
    %185 = tpu.reciprocal %182 : vector<1x256xf32> -> vector<1x256xf32>
    %186 = arith.mulf %184, %185 : vector<1x256xf32>
    %187 = arith.mulf %186, %153 : vector<1x256xf32>
    %188 = arith.addf %155, %187 : vector<1x256xf32>
    %189 = arith.mulf %186, %161 : vector<1x256xf32>
    %190 = arith.addf %157, %189 : vector<1x256xf32>
    %191 = arith.mulf %186, %159 : vector<1x256xf32>
    %192 = arith.addf %159, %191 : vector<1x256xf32>
    %193 = arith.mulf %186, %157 : vector<1x256xf32>
    %194 = arith.addf %161, %193 : vector<1x256xf32>
    %195 = arith.mulf %186, %155 : vector<1x256xf32>
    %196 = arith.addf %153, %195 : vector<1x256xf32>
    %197 = arith.mulf %186, %186 : vector<1x256xf32>
    %cst_45 = arith.constant 1.000000e+00 : f32
    %198 = vector.broadcast %cst_45 : f32 to vector<1x256xf32>
    %199 = arith.subf %198, %197 : vector<1x256xf32>
    %200 = arith.mulf %165, %199 : vector<1x256xf32>
    %cst_46 = arith.constant 0.000000e+00 : f32
    %201 = vector.broadcast %cst_46 : f32 to vector<1x256xf32>
    %202 = arith.cmpf ole, %200, %201 : vector<1x256xf32>
    %203 = arith.ori %168, %202 : vector<1x256xi1>
    %204 = arith.mulf %188, %41 : vector<1x256xf32>
    %205 = arith.addf %45, %204 : vector<1x256xf32>
    %206 = arith.mulf %190, %37 : vector<1x256xf32>
    %207 = arith.addf %205, %206 : vector<1x256xf32>
    %208 = arith.mulf %192, %33 : vector<1x256xf32>
    %209 = arith.addf %207, %208 : vector<1x256xf32>
    %210 = arith.mulf %194, %29 : vector<1x256xf32>
    %211 = arith.addf %209, %210 : vector<1x256xf32>
    %212 = arith.mulf %196, %25 : vector<1x256xf32>
    %213 = arith.addf %211, %212 : vector<1x256xf32>
    %214 = arith.mulf %186, %21 : vector<1x256xf32>
    %215 = arith.addf %213, %214 : vector<1x256xf32>
    %cst_47 = arith.constant 0.000000e+00 : f32
    %216 = vector.broadcast %cst_47 : f32 to vector<1x256xf32>
    %217 = arith.cmpf ogt, %200, %216 : vector<1x256xf32>
    %cst_48 = arith.constant 1.000000e+00 : f32
    %218 = vector.broadcast %cst_48 : f32 to vector<1x256xf32>
    %219 = arith.select %217, %200, %218 : vector<1x256xi1>, vector<1x256xf32>
    %cst_49 = arith.constant 0.000000e+00 : f32
    %220 = vector.broadcast %cst_49 : f32 to vector<1x256xf32>
    %221 = arith.subf %220, %215 : vector<1x256xf32>
    %222 = tpu.reciprocal %219 : vector<1x256xf32> -> vector<1x256xf32>
    %223 = arith.mulf %221, %222 : vector<1x256xf32>
    %224 = arith.mulf %223, %186 : vector<1x256xf32>
    %225 = arith.addf %188, %224 : vector<1x256xf32>
    %226 = arith.mulf %223, %196 : vector<1x256xf32>
    %227 = arith.addf %190, %226 : vector<1x256xf32>
    %228 = arith.mulf %223, %194 : vector<1x256xf32>
    %229 = arith.addf %192, %228 : vector<1x256xf32>
    %230 = arith.mulf %223, %192 : vector<1x256xf32>
    %231 = arith.addf %194, %230 : vector<1x256xf32>
    %232 = arith.mulf %223, %190 : vector<1x256xf32>
    %233 = arith.addf %196, %232 : vector<1x256xf32>
    %234 = arith.mulf %223, %188 : vector<1x256xf32>
    %235 = arith.addf %186, %234 : vector<1x256xf32>
    %236 = arith.mulf %223, %223 : vector<1x256xf32>
    %cst_50 = arith.constant 1.000000e+00 : f32
    %237 = vector.broadcast %cst_50 : f32 to vector<1x256xf32>
    %238 = arith.subf %237, %236 : vector<1x256xf32>
    %239 = arith.mulf %200, %238 : vector<1x256xf32>
    %cst_51 = arith.constant 0.000000e+00 : f32
    %240 = vector.broadcast %cst_51 : f32 to vector<1x256xf32>
    %241 = arith.cmpf ole, %239, %240 : vector<1x256xf32>
    %242 = arith.ori %203, %241 : vector<1x256xi1>
    %243 = arith.mulf %225, %45 : vector<1x256xf32>
    %244 = arith.addf %49, %243 : vector<1x256xf32>
    %245 = arith.mulf %227, %41 : vector<1x256xf32>
    %246 = arith.addf %244, %245 : vector<1x256xf32>
    %247 = arith.mulf %229, %37 : vector<1x256xf32>
    %248 = arith.addf %246, %247 : vector<1x256xf32>
    %249 = arith.mulf %231, %33 : vector<1x256xf32>
    %250 = arith.addf %248, %249 : vector<1x256xf32>
    %251 = arith.mulf %233, %29 : vector<1x256xf32>
    %252 = arith.addf %250, %251 : vector<1x256xf32>
    %253 = arith.mulf %235, %25 : vector<1x256xf32>
    %254 = arith.addf %252, %253 : vector<1x256xf32>
    %255 = arith.mulf %223, %21 : vector<1x256xf32>
    %256 = arith.addf %254, %255 : vector<1x256xf32>
    %cst_52 = arith.constant 0.000000e+00 : f32
    %257 = vector.broadcast %cst_52 : f32 to vector<1x256xf32>
    %258 = arith.cmpf ogt, %239, %257 : vector<1x256xf32>
    %cst_53 = arith.constant 1.000000e+00 : f32
    %259 = vector.broadcast %cst_53 : f32 to vector<1x256xf32>
    %260 = arith.select %258, %239, %259 : vector<1x256xi1>, vector<1x256xf32>
    %cst_54 = arith.constant 0.000000e+00 : f32
    %261 = vector.broadcast %cst_54 : f32 to vector<1x256xf32>
    %262 = arith.subf %261, %256 : vector<1x256xf32>
    %263 = tpu.reciprocal %260 : vector<1x256xf32> -> vector<1x256xf32>
    %264 = arith.mulf %262, %263 : vector<1x256xf32>
    %265 = arith.mulf %264, %223 : vector<1x256xf32>
    %266 = arith.addf %225, %265 : vector<1x256xf32>
    %267 = arith.mulf %264, %235 : vector<1x256xf32>
    %268 = arith.addf %227, %267 : vector<1x256xf32>
    %269 = arith.mulf %264, %233 : vector<1x256xf32>
    %270 = arith.addf %229, %269 : vector<1x256xf32>
    %271 = arith.mulf %264, %231 : vector<1x256xf32>
    %272 = arith.addf %231, %271 : vector<1x256xf32>
    %273 = arith.mulf %264, %229 : vector<1x256xf32>
    %274 = arith.addf %233, %273 : vector<1x256xf32>
    %275 = arith.mulf %264, %227 : vector<1x256xf32>
    %276 = arith.addf %235, %275 : vector<1x256xf32>
    %277 = arith.mulf %264, %225 : vector<1x256xf32>
    %278 = arith.addf %223, %277 : vector<1x256xf32>
    %279 = tpu.concatenate %50, %266, %268, %270, %272, %274, %276, %278, %264 in 0 : vector<1x256xf32>, vector<1x256xf32>, vector<1x256xf32>, vector<1x256xf32>, vector<1x256xf32>, vector<1x256xf32>, vector<1x256xf32>, vector<1x256xf32>, vector<1x256xf32> -> vector<9x256xf32>
    %280 = tpu.iota {dimensions = array<i32: 0>} : vector<9x256xi32>
    %c0_i32 = arith.constant 0 : i32
    %281 = vector.broadcast %c0_i32 : i32 to vector<9x256xi32>
    %282 = arith.cmpi eq, %280, %281 : vector<9x256xi32>
    %cst_55 = arith.constant 1.000000e+00 : f32
    %cst_56 = arith.constant 0.000000e+00 : f32
    %283 = vector.broadcast %cst_55 : f32 to vector<9x256xf32>
    %284 = vector.broadcast %cst_56 : f32 to vector<9x256xf32>
    %285 = arith.select %282, %283, %284 : vector<9x256xi1>, vector<9x256xf32>
    %286 = vector.shape_cast %242 : vector<1x256xi1> to vector<1x256xi1>
    %287 = vector.broadcast %286 : vector<1x256xi1> to vector<9x256xi1>
    %288 = arith.select %287, %285, %279 : vector<9x256xi1>, vector<9x256xf32>
    %c0_57 = arith.constant 0 : index
    %c0_58 = arith.constant 0 : index
    %289 = vector.load %arg3[%c0_57, %c0_58] : memref<9x256xf32, #tpu.memory_space<vmem>>, vector<9x256xf32>
    tpu.vector_store %arg3[%c0_57, %c0_58], %288 {strides = array<i32>} : memref<9x256xf32, #tpu.memory_space<vmem>>, vector<9x256xf32>,
    return
  }
  func.func @transform_0(%arg0: i32) -> (i32, i32) {
    %c0_i32 = arith.constant 0 : i32
    %c0_i32_0 = arith.constant 0 : i32
    return %c0_i32, %arg0 : i32, i32
  }
  func.func @transform_1(%arg0: i32) -> (i32, i32) {
    %c0_i32 = arith.constant 0 : i32
    %c0_i32_0 = arith.constant 0 : i32
    %c0_i32_1 = arith.constant 0 : i32
    return %c0_i32, %c0_i32_0 : i32, i32
  }
  func.func @transform_2(%arg0: i32) -> (i32, i32) {
    %c0_i32 = arith.constant 0 : i32
    %c0_i32_0 = arith.constant 0 : i32
    return %c0_i32, %arg0 : i32, i32
  }
}

</mosaic_0001>

<bundles_post_ra>
// kernel: tpu_custom_call.1
= control target key start
LH: loop header
LB: loop body
LE: loop exit
PB: predicated region body
PF: predicated region fallthrough
CT: control target
= control target key end

     0   :  { %7 = vsyncpa [#allocation3], 0  ;;  %s4552_s0 = inlined_call_operand.hbm [shape: f32[128,256], index: 0, kind: input, shape index: {}]   ;;  %s4553_s1 = inlined_call_operand.vmem [shape: f32[128,1], index: 1, kind: input, shape index: {}]   ;;  %s4554_s2 = inlined_call_operand.hbm [shape: f32[9,256], index: 2, kind: output, shape index: {}]  }
   0x1   :  { %8 = vsyncpa [#allocation4], 0  ;;  %s2000_s9 = smov [#allocation2]   ;;  %s1934_s13 = scalar_lea.hbm %s4552_s0, 4096 }
   0x2   :  { %s14_s10 = sshll.u32 %s2000_s9, 4  ;;  %p1935_p0 = scmp.ne.s32.totalorder %s4552_s0, %s1934_s13  ;;  %s15_s10 = int_to_ptr.vmem [resolvable:$true] %s14_s10 }
   0x3   :  { %p1938_p1 = scmp.lt.u32.totalorder %s1934_s13, %s4552_s0 }
   0x5   :  { %p1940_p2 = pnand %p1938_p1, %p1935_p0 }
   0x7   :  { %1943 = shalt.err (!%p1940_p2)
}
   0x8   :  { %s1944_s18 = scalar_lea.vmem %s15_s10, 4096  ;;  %p1949_p4 = scmp.lt.s32.totalorder %s15_s10, %s15_s10 }
   0x9   :  { %p1945_p3 = scmp.ne.s32.totalorder %s15_s10, %s1944_s18  ;;  %p1950_p5 = scmp.lt.s32.totalorder %s1944_s18, %s1944_s18 }
   0xb   :  { %p1951_p6 = por %p1950_p5, %p1949_p4 }
   0xd   :  { %p1952_p7 = pnand %p1951_p6, %p1945_p3 }
   0xf   :  { %1955 = shalt.err (!%p1952_p7)
}
  0x10   :  { %s2001_s19 = smov 256   ;;  %s2002_s20 = smov 16  }
  0x11   :  { %20 = dma.hbm_to_vmem [thread:$0]  %s4552_s0, 4096, %s15_s10, [#allocation3], %s2001_s19, %s2001_s19, %s2002_s20  }
  0x12   :  { %1978 = dma.done.wait [#allocation3], 4096  }
  0x13   :  { %1979 = vsyncadd [#allocation3], 4294963200  ;;  %v4555_v0 = vmov 0   ;;  %v60_v1 = vld [vmem:[%s4553_s1 + $0x10] sm:$0xff]  ;;  %v58_v2 = vld [vmem:[%s4553_s1] sm:$0xff] }
  0x14   :  { %1901 = vset.pattern.permute.xlu1 %v4555_v0  ;;  %1900 = vset.pattern.permute.xlu0 %v4555_v0  ;;  %v61_v3 = vld [vmem:[%s4553_s1 + $0x18] sm:$0xff]  ;;  %v59_v4 = vld [vmem:[%s4553_s1 + $0x8] sm:$0xff]  ;;  %v62_v6 = vld [vmem:[%s4553_s1 + $0x20] sm:$0xff] }
  0x15   :  { %162 = vperm.xlu1 %1901, %v60_v1   ;;  %152 = vperm.xlu0 %1900, %v58_v2   ;;  %v63_v5 = vld [vmem:[%s4553_s1 + $0x28] sm:$0xff]  ;;  %v64_v7 = vld [vmem:[%s4553_s1 + $0x30] sm:$0xff]  ;;  %v73_v8 = vld [vmem:[%s4553_s1 + $0x78] sm:$0xff] }
  0x16   :  { %v66_v9 = vld [vmem:[%s4553_s1 + $0x40] sm:$0xff]  ;;  %v65_v10 = vld [vmem:[%s4553_s1 + $0x38] sm:$0xff]  ;;  %v68_v11 = vld [vmem:[%s4553_s1 + $0x50] sm:$0xff] }
  0x17   :  { %v67_v12 = vld [vmem:[%s4553_s1 + $0x48] sm:$0xff]  ;;  %v70_v13 = vld [vmem:[%s4553_s1 + $0x60] sm:$0xff]  ;;  %v69_v14 = vld [vmem:[%s4553_s1 + $0x58] sm:$0xff] }
  0x18   :  { %v72_v15 = vld [vmem:[%s4553_s1 + $0x70] sm:$0xff]  ;;  %v71_v16 = vld [vmem:[%s4553_s1 + $0x68] sm:$0xff]  ;;  %v2086_v17 = vld [vmem:[#allocation2] sm:$0xff]  ;;  %s2005_s1 = smov [#allocation5]  }
  0x19   :  { %167 = vperm.xlu1 %1901, %v61_v3   ;;  %157 = vperm.xlu0 %1900, %v59_v4   ;;  %v2088_v18 = vld [vmem:[#allocation2 + $0x10] sm:$0xff]  ;;  %v2090_v19 = vld [vmem:[#allocation2 + $0x8] sm:$0xff]  ;;  %v2092_v20 = vld [vmem:[#allocation2 + $0x18] sm:$0xff]  ;;  %s1882_s28 = sshll.u32 %s2005_s1, 4  ;;  %s1883_s28 = int_to_ptr.vmem [resolvable:$true] %s1882_s28 }
  0x1a   :  { %v74_v21 = vadd.f32 %v2088_v18, %v2086_v17  ;;  %v2096_v22 = vld [vmem:[#allocation2 + $0x20] sm:$0xff]  ;;  %v95_v23 = vadd.f32 %v2092_v20, %v2090_v19  ;;  %v2100_v24 = vld [vmem:[#allocation2 + $0x28] sm:$0xff]  ;;  %v2103_v26 = vld [vmem:[#allocation2 + $0x30] sm:$0xff]  ;;  %s1956_s0 = scalar_lea.vmem %s1883_s28, 512  ;;  %p1961_p9 = scmp.lt.s32.totalorder %s1883_s28, %s1883_s28 }
  0x1b   :  { %v2106_v28 = vld [vmem:[#allocation2 + $0x38] sm:$0xff]  ;;  %v2109_v30 = vld [vmem:[#allocation2 + $0x40] sm:$0xff]  ;;  %v2112_v32 = vld [vmem:[#allocation2 + $0x48] sm:$0xff]  ;;  %p1957_p8 = scmp.ne.s32.totalorder %s1883_s28, %s1956_s0  ;;  %p1962_p10 = scmp.lt.s32.totalorder %s1956_s0, %s1956_s0 }
  0x1c   :  { %v75_v25 = vadd.f32 %v74_v21, %v2096_v22  ;;  %v96_v27 = vadd.f32 %v95_v23, %v2100_v24  ;;  %v2115_v34 = vld [vmem:[#allocation2 + $0x50] sm:$0xff]  ;;  %v2118_v36 = vld [vmem:[#allocation2 + $0x58] sm:$0xff]  ;;  %v2121_v38 = vld [vmem:[#allocation2 + $0x60] sm:$0xff] }
  0x1d   :  { %177 = vperm.xlu1 %1901, %v63_v5   ;;  %172 = vperm.xlu0 %1900, %v62_v6   ;;  %v2124_v40 = vld [vmem:[#allocation2 + $0x68] sm:$0xff]  ;;  %v2127_v42 = vld [vmem:[#allocation2 + $0x70] sm:$0xff]  ;;  %v2130_v44 = vld [vmem:[#allocation2 + $0x78] sm:$0xff]  ;;  %p1963_p11 = por %p1962_p10, %p1961_p9 }
  0x1e   :  { %v76_v29 = vadd.f32 %v75_v25, %v2103_v26  ;;  %v97_v31 = vadd.f32 %v96_v27, %v2106_v28  ;;  %v2133_v46 = vld [vmem:[#allocation2 + $0x80] sm:$0xff]  ;;  %v2136_v48 = vld [vmem:[#allocation2 + $0x88] sm:$0xff]  ;;  %v2139_v50 = vld [vmem:[#allocation2 + $0x90] sm:$0xff] }
  0x1f   :  { %v2142_v52 = vld [vmem:[#allocation2 + $0x98] sm:$0xff]  ;;  %v2145_v54 = vld [vmem:[#allocation2 + $0xa0] sm:$0xff]  ;;  %v2148_v56 = vld [vmem:[#allocation2 + $0xa8] sm:$0xff]  ;;  %p1964_p12 = pnand %p1963_p11, %p1957_p8 }
  0x20   :  { %v77_v33 = vadd.f32 %v76_v29, %v2109_v30  ;;  %v98_v35 = vadd.f32 %v97_v31, %v2112_v32  ;;  %v2151_v58 = vld [vmem:[#allocation2 + $0xb0] sm:$0xff]  ;;  %v2154_v60 = vld [vmem:[#allocation2 + $0xb8] sm:$0xff]  ;;  %v2157_v62 = vld [vmem:[#allocation2 + $0xc0] sm:$0xff] }
  0x21   :  { %182 = vperm.xlu1 %1901, %v64_v7   ;;  %227 = vperm.xlu0 %1900, %v73_v8   ;;  %v2160_v1 = vld [vmem:[#allocation2 + $0xc8] sm:$0xff]  ;;  %v2163_v3 = vld [vmem:[#allocation2 + $0xd0] sm:$0xff]  ;;  %v2166_v5 = vld [vmem:[#allocation2 + $0xd8] sm:$0xff] }
  0x22   :  { %v78_v37 = vadd.f32 %v77_v33, %v2115_v34  ;;  %v99_v39 = vadd.f32 %v98_v35, %v2118_v36  ;;  %v2169_v7 = vld [vmem:[#allocation2 + $0xe0] sm:$0xff] }
  0x24   :  { %v79_v41 = vadd.f32 %v78_v37, %v2121_v38  ;;  %v100_v43 = vadd.f32 %v99_v39, %v2124_v40 }
  0x25   :  { %192 = vperm.xlu1 %1901, %v66_v9   ;;  %187 = vperm.xlu0 %1900, %v65_v10   ;;  %v2172_v9 = vld [vmem:[#allocation2 + $0xe8] sm:$0xff] }
  0x26   :  { %v80_v45 = vadd.f32 %v79_v41, %v2127_v42  ;;  %v101_v47 = vadd.f32 %v100_v43, %v2130_v44 }
  0x28   :  { %v81_v49 = vadd.f32 %v80_v45, %v2133_v46  ;;  %v102_v51 = vadd.f32 %v101_v47, %v2136_v48 }
  0x29   :  { %202 = vperm.xlu1 %1901, %v68_v11   ;;  %197 = vperm.xlu0 %1900, %v67_v12   ;;  %v2175_v11 = vld [vmem:[#allocation2 + $0xf0] sm:$0xff] }
  0x2a   :  { %v82_v53 = vadd.f32 %v81_v49, %v2139_v50  ;;  %v103_v55 = vadd.f32 %v102_v51, %v2142_v52 }
  0x2c   :  { %v83_v57 = vadd.f32 %v82_v53, %v2145_v54  ;;  %v104_v59 = vadd.f32 %v103_v55, %v2148_v56 }
  0x2d   :  { %212 = vperm.xlu1 %1901, %v70_v13   ;;  %207 = vperm.xlu0 %1900, %v69_v14   ;;  %v2178_v13 = vld [vmem:[#allocation2 + $0xf8] sm:$0xff] }
  0x2e   :  { %v84_v61 = vadd.f32 %v83_v57, %v2151_v58  ;;  %v105_v63 = vadd.f32 %v104_v59, %v2154_v60 }
  0x30   :  { %v85_v2 = vadd.f32 %v84_v61, %v2157_v62  ;;  %v106_v4 = vadd.f32 %v105_v63, %v2160_v1  ;;  %v444_v63 = vlaneseq }
  0x31   :  { %222 = vperm.xlu1 %1901, %v72_v15   ;;  %217 = vperm.xlu0 %1900, %v71_v16  }
  0x32   :  { %v86_v6 = vadd.f32 %v85_v2, %v2163_v3  ;;  %v107_v8 = vadd.f32 %v106_v4, %v2166_v5 }
  0x34   :  { %v87_v10 = vadd.f32 %v86_v6, %v2169_v7  ;;  %v108_v12 = vadd.f32 %v107_v8, %v2172_v9 }
  0x36   :  { %v88_v14 = vadd.f32 %v87_v10, %v2175_v11  ;;  %v109_v15 = vadd.f32 %v108_v12, %v2178_v13  ;;  %v2208_v12 = vshrl.u32 %v444_v63, 7 }
  0x38   :  { %v89_v16 = vrot.slane %v88_v14, 4  ;;  %v110_v21 = vrot.slane %v109_v15, 4  ;;  %4675 = vst [vmem:[#allocation11_spill] sm:$0xff] %v2208_v12  ;;  %vm446_vm0 = vcmp.lt.s32.totalorder %v2208_v12, 1  ;;  %vm585_vm1 = vcmp.lt.s32.totalorder %v2208_v12, 2 }
  0x39   :  { %vm724_vm2 = vcmp.lt.s32.totalorder %v2208_v12, 3  ;;  %vm863_vm3 = vcmp.lt.s32.totalorder %v2208_v12, 4  ;;  %vm1002_vm4 = vcmp.lt.s32.totalorder %v2208_v12, 5  ;;  %vm1141_vm5 = vcmp.lt.s32.totalorder %v2208_v12, 6 }
  0x3a   :  { %v90_v23 = vadd.f32 %v89_v16, %v88_v14  ;;  %v111_v25 = vadd.f32 %v110_v21, %v109_v15 }
  0x3c   :  { %v91_v27 = vrot.slane %v90_v23, 2  ;;  %v112_v29 = vrot.slane %v111_v25, 2 }
  0x3e   :  { %v92_v31 = vadd.f32 %v91_v27, %v90_v23  ;;  %v113_v33 = vadd.f32 %v112_v29, %v111_v25 }
  0x40   :  { %v93_v35 = vrot.slane %v92_v31, 1  ;;  %v114_v37 = vrot.slane %v113_v33, 1 }
  0x42   :  { %v94_v39 = vadd.f32 %v93_v35, %v92_v31  ;;  %v115_v43 = vadd.f32 %v114_v37, %v113_v33 }
  0x44   :  { %v2182_v45 = vmul.f32 0.015625, %v94_v39  ;;  %v2186_v51 = vmul.f32 0.015625, %v115_v43 }
  0x46   :  { %v120_v49 = vsub.f32 %v2088_v18, %v2182_v45  ;;  %v118_v55 = vsub.f32 %v2086_v17, %v2182_v45  ;;  %v121_v57 = vsub.f32 %v2092_v20, %v2186_v51  ;;  %v119_v61 = vsub.f32 %v2090_v19, %v2186_v51 }
  0x47   :  { %v122_v18 = vsub.f32 %v2096_v22, %v2182_v45  ;;  %v123_v20 = vsub.f32 %v2100_v24, %v2186_v51  ;;  %v124_v19 = vsub.f32 %v2103_v26, %v2182_v45  ;;  %v125_v14 = vsub.f32 %v2106_v28, %v2186_v51 }
  0x48   :  { %v128_v22 = vsub.f32 %v2115_v34, %v2182_v45  ;;  %v129_v24 = vsub.f32 %v2118_v36, %v2186_v51  ;;  %v126_v16 = vsub.f32 %v2109_v30, %v2182_v45  ;;  %v127_v21 = vsub.f32 %v2112_v32, %v2186_v51 }
  0x49   :  { %v130_v34 = vsub.f32 %v2121_v38, %v2182_v45  ;;  %v131_v25 = vsub.f32 %v2124_v40, %v2186_v51  ;;  %v148_v36 = vsub.f32 %v2175_v11, %v2182_v45  ;;  %v149_v30 = vsub.f32 %v2178_v13, %v2186_v51 }
  0x4a   :  { %v134_v32 = vsub.f32 %v2133_v46, %v2182_v45  ;;  %v135_v38 = vsub.f32 %v2136_v48, %v2186_v51  ;;  %v132_v40 = vsub.f32 %v2127_v42, %v2182_v45  ;;  %v133_v46 = vsub.f32 %v2130_v44, %v2186_v51 }
  0x4b   :  { %v138_v35 = vsub.f32 %v2145_v54, %v2182_v45  ;;  %v139_v39 = vsub.f32 %v2148_v56, %v2186_v51  ;;  %v136_v48 = vsub.f32 %v2139_v50, %v2182_v45  ;;  %v137_v42 = vsub.f32 %v2142_v52, %v2186_v51 }
  0x4c   :  { %v143_v44 = vsub.f32 %v2160_v1, %v2186_v51  ;;  %v140_v50 = vsub.f32 %v2151_v58, %v2182_v45  ;;  %v141_v52 = vsub.f32 %v2154_v60, %v2186_v51  ;;  %v144_v58 = vsub.f32 %v2163_v3, %v2182_v45 }
  0x94   :  { %v153_v41 = vpop.permute.xlu0 %152  ;;  %v163_v47 = vpop.permute.xlu1 %162 }
  0x95   :  { %v2196_v2 = vmul.f32 %v153_v41, %v118_v55  ;;  %v2206_v8 = vmul.f32 %v153_v41, %v119_v61  ;;  %v2226_v23 = vmul.f32 %v163_v47, %v122_v18  ;;  %v2248_v33 = vmul.f32 %v163_v47, %v123_v20 }
  0x96   :  { %v142_v47 = vsub.f32 %v2157_v62, %v2182_v45  ;;  %v146_v55 = vsub.f32 %v2169_v7, %v2182_v45 }
  0x97   :  { %4673 = vst [vmem:[#allocation9_spill] sm:$0xff] %v2196_v2  ;;  %v338_v15 = vmul.f32 %v2196_v2, %v2196_v2  ;;  %4676 = vst [vmem:[#allocation12_spill] sm:$0xff] %v2226_v23  ;;  %v339_v29 = vmul.f32 %v2206_v8, %v2206_v8  ;;  %v342_v11 = vmul.f32 %v2226_v23, %v2226_v23 }
  0x98   :  { %v158_v53 = vpop.permute.xlu0 %157  ;;  %v168_v4 = vpop.permute.xlu1 %167  ;;  %4678 = vst [vmem:[#allocation14_spill] sm:$0xff] %v2248_v33  ;;  %v343_v54 = vmul.f32 %v2248_v33, %v2248_v33  ;;  %1982 = vmaxabs.init.f32.vacc0 %v2196_v2, %v2226_v23  ;;  %1991 = vmaxabs.init.f32.vacc1 %v2206_v8, %v2248_v33 }
  0x99   :  { %v2192_v59 = vmul.f32 %v158_v53, %v120_v49  ;;  %v2198_v6 = vmul.f32 %v158_v53, %v121_v57  ;;  %v2240_v31 = vmul.f32 %v168_v4, %v124_v19  ;;  %v2260_v43 = vmul.f32 %v168_v4, %v125_v14 }
  0x9a   :  { %v147_v57 = vsub.f32 %v2172_v9, %v2186_v51  ;;  %v145_v19 = vsub.f32 %v2166_v5, %v2186_v51  ;;  %v413_v5 = vrot.slane %v2206_v8, 7 }
  0x9b   :  { %4672 = vst [vmem:[#allocation8_spill] sm:$0xff] %v2192_v59  ;;  %4674 = vst [vmem:[#allocation10_spill] sm:$0xff] %v2198_v6  ;;  %v340_v17 = vmul.f32 %v2192_v59, %v2192_v59  ;;  %v341_v26 = vmul.f32 %v2198_v6, %v2198_v6  ;;  %v344_v53 = vmul.f32 %v2240_v31, %v2240_v31 }
  0x9c   :  { %v173_v10 = vpop.permute.xlu0 %172  ;;  %v178_v28 = vpop.permute.xlu1 %177  ;;  %4677 = vst [vmem:[#allocation13_spill] sm:$0xff] %v2240_v31  ;;  %4679 = vst [vmem:[#allocation15_spill] sm:$0xff] %v2260_v43  ;;  %v345_v20 = vmul.f32 %v2260_v43, %v2260_v43  ;;  %1983 = vmaxabs.f32.vacc0 %v2192_v59, %v2240_v31  ;;  %1992 = vmaxabs.f32.vacc1 %v2198_v6, %v2260_v43 }
  0x9d   :  { %v370_v27 = vadd.f32 %v340_v17, %v338_v15  ;;  %v391_v37 = vadd.f32 %v341_v26, %v339_v29  ;;  %v2268_v49 = vmul.f32 %v173_v10, %v126_v16  ;;  %v2280_v4 = vmul.f32 %v178_v28, %v128_v22 }
  0x9e   :  { %v2282_v18 = vmul.f32 %v173_v10, %v127_v21  ;;  %v2292_v15 = vmul.f32 %v178_v28, %v129_v24  ;;  %v412_v21 = vrot.slane %v2196_v2, 7 }
  0x9f   :  { %v371_v41 = vadd.f32 %v370_v27, %v342_v11  ;;  %4680 = vst [vmem:[#allocation16_spill] sm:$0xff] %v2268_v49  ;;  %v392_v61 = vadd.f32 %v391_v37, %v343_v54  ;;  %4681 = vst [vmem:[#allocation17_spill] sm:$0xff] %v2280_v4  ;;  %v346_v14 = vmul.f32 %v2268_v49, %v2268_v49 }
  0xa0   :  { %v228_v13 = vpop.permute.xlu0 %227  ;;  %v183_v56 = vpop.permute.xlu1 %182  ;;  %4682 = vst [vmem:[#allocation18_spill] sm:$0xff] %v2282_v18  ;;  %4683 = vst [vmem:[#allocation19_spill] sm:$0xff] %v2292_v15  ;;  %v347_v26 = vmul.f32 %v2282_v18, %v2282_v18  ;;  %v348_v24 = vmul.f32 %v2280_v4, %v2280_v4  ;;  %1984 = vmaxabs.f32.vacc0 %v2268_v49, %v2280_v4 }
  0xa1   :  { %v372_v63 = vadd.f32 %v371_v41, %v344_v53  ;;  %v393_v16 = vadd.f32 %v392_v61, %v345_v20  ;;  %v2302_v27 = vmul.f32 %v183_v56, %v130_v34  ;;  %v2308_v28 = vmul.f32 %v183_v56, %v131_v25 }
  0xa2   :  { %v2312_v37 = vmul.f32 %v228_v13, %v148_v36  ;;  %v349_v34 = vmul.f32 %v2292_v15, %v2292_v15  ;;  %v2318_v53 = vmul.f32 %v228_v13, %v149_v30  ;;  %1993 = vmaxabs.f32.vacc1 %v2282_v18, %v2292_v15 }
  0xa3   :  { %v373_v10 = vadd.f32 %v372_v63, %v346_v14  ;;  %4684 = vst [vmem:[#allocation20_spill] sm:$0xff] %v2302_v27  ;;  %4685 = vst [vmem:[#allocation21_spill] sm:$0xff] %v2308_v28  ;;  %v394_v11 = vadd.f32 %v393_v16, %v347_v26  ;;  %v350_v36 = vmul.f32 %v2302_v27, %v2302_v27 }
  0xa4   :  { %v188_v17 = vpop.permute.xlu0 %187  ;;  %v193_v22 = vpop.permute.xlu1 %192  ;;  %4686 = vst [vmem:[#allocation22_spill] sm:$0xff] %v2312_v37  ;;  %4688 = vst [vmem:[#allocation24_spill] sm:$0xff] %v2318_v53  ;;  %v351_v30 = vmul.f32 %v2308_v28, %v2308_v28  ;;  %v4558_v1 = vrot.slane %v2312_v37, 7 }
  0xa5   :  { %v2314_v41 = vmul.f32 %v188_v17, %v132_v40  ;;  %v374_v54 = vadd.f32 %v373_v10, %v348_v24  ;;  %v2320_v61 = vmul.f32 %v193_v22, %v134_v32  ;;  %v2324_v25 = vmul.f32 %v193_v22, %v135_v38 }
  0xa6   :  { %v2326_v56 = vmul.f32 %v188_v17, %v133_v46  ;;  %v395_v40 = vadd.f32 %v394_v11, %v349_v34 }
  0xa7   :  { %4687 = vst [vmem:[#allocation23_spill] sm:$0xff] %v2314_v41  ;;  %4689 = vst [vmem:[#allocation25_spill] sm:$0xff] %v2320_v61  ;;  %v352_v32 = vmul.f32 %v2314_v41, %v2314_v41  ;;  %v375_v13 = vadd.f32 %v374_v54, %v350_v36  ;;  %v354_v26 = vmul.f32 %v2320_v61, %v2320_v61 }
  0xa8   :  { %v198_v29 = vpop.permute.xlu0 %197  ;;  %4690 = vst [vmem:[#allocation26_spill] sm:$0xff] %v2324_v25  ;;  %4691 = vst [vmem:[#allocation27_spill] sm:$0xff] %v2326_v56  ;;  %v203_v63 = vpop.permute.xlu1 %202  ;;  %v353_v16 = vmul.f32 %v2326_v56, %v2326_v56  ;;  %v396_v22 = vadd.f32 %v395_v40, %v351_v30  ;;  %v355_v24 = vmul.f32 %v2324_v25, %v2324_v25  ;;  %v4557_v40 = vrot.slane %v2318_v53, 7 }
  0xa9   :  { %v2336_v20 = vmul.f32 %v203_v63, %v138_v35  ;;  %v2338_v38 = vmul.f32 %v198_v29, %v136_v48  ;;  %v2340_v17 = vmul.f32 %v198_v29, %v137_v42  ;;  %v2342_v14 = vmul.f32 %v203_v63, %v139_v39 }
  0xaa   :  { %v376_v35 = vadd.f32 %v375_v13, %v352_v32  ;;  %1985 = vmaxabs.f32.vacc0 %v2302_v27, %v2314_v41  ;;  %1994 = vmaxabs.f32.vacc1 %v2308_v28, %v2326_v56  ;;  %v397_v11 = vadd.f32 %v396_v22, %v353_v16 }
  0xab   :  { %4692 = vst [vmem:[#allocation28_spill] sm:$0xff] %v2336_v20  ;;  %4693 = vst [vmem:[#allocation29_spill] sm:$0xff] %v2338_v38  ;;  %v356_v39 = vmul.f32 %v2338_v38, %v2338_v38  ;;  %v357_v29 = vmul.f32 %v2340_v17, %v2340_v17  ;;  %v358_v63 = vmul.f32 %v2336_v20, %v2336_v20  ;;  %v414_v32 = vrot.slane %v2192_v59, 7 }
  0xac   :  { %v208_v46 = vpop.permute.xlu0 %207  ;;  %4694 = vst [vmem:[#allocation30_spill] sm:$0xff] %v2340_v17  ;;  %v213_v10 = vpop.permute.xlu1 %212  ;;  %1986 = vmaxabs.f32.vacc0 %v2320_v61, %v2338_v38  ;;  %v359_v62 = vmul.f32 %v2342_v14, %v2342_v14  ;;  %1995 = vmaxabs.f32.vacc1 %v2324_v25, %v2340_v17  ;;  %v478_v16 = vsel %vm446_vm0, %v4557_v40, %v413_v5 }
  0xad   :  { %v2357_v48 = vmul.f32 %v208_v46, %v140_v50  ;;  %v2364_v34 = vmul.f32 %v213_v10, %v142_v47  ;;  %v2369_v54 = vmul.f32 %v208_v46, %v141_v52  ;;  %v377_v50 = vadd.f32 %v376_v35, %v354_v26 }
  0xae   :  { %v2376_v36 = vmul.f32 %v213_v10, %v143_v44  ;;  %v398_v44 = vadd.f32 %v397_v11, %v355_v24  ;;  %v477_v46 = vsel %vm446_vm0, %v4558_v1, %v412_v21  ;;  %v475_v51 = vsel %vm446_vm0, %v412_v21, %v414_v32 }
  0xaf   :  { %4695 = vst [vmem:[#allocation31_spill] sm:$0xff] %v2357_v48  ;;  %4696 = vst [vmem:[#allocation32_spill] sm:$0xff] %v2364_v34  ;;  %v378_v30 = vadd.f32 %v377_v50, %v356_v39  ;;  %v360_v3 = vmul.f32 %v2357_v48, %v2357_v48  ;;  %v362_v45 = vmul.f32 %v2364_v34, %v2364_v34  ;;  %v416_v10 = vrot.slane %v2226_v23, 7 }
  0xb0   :  { %v218_v42 = vpop.permute.xlu0 %217  ;;  %4697 = vst [vmem:[#allocation33_spill] sm:$0xff] %v2376_v36  ;;  %v223_v47 = vpop.permute.xlu1 %222  ;;  %1987 = vmaxabs.f32.vacc0 %v2336_v20, %v2357_v48  ;;  %1996 = vmaxabs.f32.vacc1 %v2342_v14, %v2369_v54  ;;  %v479_v22 = vmul.f32 %v477_v46, %v2196_v2  ;;  %v480_v26 = vmul.f32 %v478_v16, %v2206_v8 }
  0xb1   :  { %v2385_v60 = vmul.f32 %v218_v42, %v144_v58  ;;  %v2387_v52 = vmul.f32 %v218_v42, %v145_v19  ;;  %v2397_v13 = vmul.f32 %v223_v47, %v146_v55  ;;  %v415_v58 = vrot.slane %v2198_v6, 7 }
  0xb2   :  { %v361_v19 = vmul.f32 %v2369_v54, %v2369_v54  ;;  %v2413_v7 = vmul.f32 %v223_v47, %v147_v57  ;;  %v399_v55 = vadd.f32 %v398_v44, %v357_v29  ;;  %v379_v9 = vadd.f32 %v378_v30, %v358_v63 }
  0xb3   :  { %4698 = vst [vmem:[#allocation34_spill] sm:$0xff] %v2385_v60  ;;  %4699 = vst [vmem:[#allocation35_spill] sm:$0xff] %v2387_v52  ;;  %v476_v57 = vsel %vm446_vm0, %v413_v5, %v415_v58  ;;  %1988 = vmaxabs.f32.vacc0 %v2364_v34, %v2385_v60  ;;  %v417_v35 = vrot.slane %v2248_v33, 7  ;;  %v481_v39 = vmul.f32 %v475_v51, %v2192_v59 }
  0xb4   :  { %4700 = vst [vmem:[#allocation36_spill] sm:$0xff] %v2397_v13  ;;  %4701 = vst [vmem:[#allocation37_spill] sm:$0xff] %v2413_v7  ;;  %v400_v24 = vadd.f32 %v399_v55, %v359_v62  ;;  %v380_v21 = vadd.f32 %v379_v9, %v360_v3  ;;  %v418_v42 = vrot.slane %v2240_v31, 7  ;;  %v473_v5 = vsel %vm446_vm0, %v414_v32, %v416_v10 }
  0xb5   :  { %v482_v29 = vmul.f32 %v476_v57, %v2198_v6  ;;  %1997 = vmaxabs.f32.vacc1 %v2387_v52, %v2376_v36  ;;  %v419_v11 = vrot.slane %v2260_v43, 7  ;;  %v474_v63 = vsel %vm446_vm0, %v415_v58, %v417_v35 }
  0xb6   :  { %v511_v50 = vadd.f32 %v481_v39, %v479_v22  ;;  %v364_v62 = vmul.f32 %v2385_v60, %v2385_v60  ;;  %1989 = vmaxabs.f32.vacc0 %v2312_v37, %v2397_v13  ;;  %v401_v44 = vadd.f32 %v400_v24, %v361_v19 }
  0xb7   :  { %v532_v47 = vadd.f32 %v482_v29, %v480_v26  ;;  %1998 = vmaxabs.f32.vacc1 %v2318_v53, %v2413_v7  ;;  %v483_v30 = vmul.f32 %v473_v5, %v2226_v23  ;;  %v381_v32 = vadd.f32 %v380_v21, %v362_v45 }
  0xb8   :  { %v420_v3 = vrot.slane %v2268_v49, 7  ;;  %v471_v58 = vsel %vm446_vm0, %v416_v10, %v418_v42  ;;  %v484_v46 = vmul.f32 %v474_v63, %v2248_v33  ;;  %v363_v55 = vmul.f32 %v2376_v36, %v2376_v36 }
  0xb9   :  { %v421_v16 = vrot.slane %v2282_v18, 7  ;;  %v472_v9 = vsel %vm446_vm0, %v417_v35, %v419_v11  ;;  %v512_v51 = vadd.f32 %v511_v50, %v483_v30  ;;  %v1990_v19 = vmovacc.low.even.vacc0 }
  0xba   :  { %v1999_v57 = vmovacc.low.even.vacc1  ;;  %v533_v22 = vadd.f32 %v532_v47, %v484_v46  ;;  %v365_v45 = vmul.f32 %v2387_v52, %v2387_v52  ;;  %v402_v26 = vadd.f32 %v401_v44, %v363_v55 }
  0xbb   :  { %v485_v10 = vmul.f32 %v471_v58, %v2240_v31  ;;  %v382_v24 = vadd.f32 %v381_v32, %v364_v62  ;;  %v422_v39 = vrot.slane %v2280_v4, 7  ;;  %v469_v21 = vsel %vm446_vm0, %v418_v42, %v420_v3 }
  0xbc   :  { %v486_v5 = vmul.f32 %v472_v9, %v2260_v43  ;;  %v423_v35 = vrot.slane %v2292_v15, 7  ;;  %v470_v29 = vsel %vm446_vm0, %v419_v11, %v421_v16  ;;  %v309_v50 = vrot.slane %v1990_v19, 4 }
  0xbd   :  { %v513_v63 = vadd.f32 %v512_v51, %v485_v10  ;;  %v330_v47 = vrot.slane %v1999_v57, 4  ;;  %v366_v44 = vmul.f32 %v2397_v13, %v2397_v13  ;;  %v403_v62 = vadd.f32 %v402_v26, %v365_v45 }
  0xbe   :  { %v534_v30 = vadd.f32 %v533_v22, %v486_v5  ;;  %v487_v32 = vmul.f32 %v469_v21, %v2268_v49  ;;  %v424_v42 = vrot.slane %v2302_v27, 7  ;;  %v467_v46 = vsel %vm446_vm0, %v420_v3, %v422_v39 }
  0xbf   :  { %v383_v58 = vadd.f32 %v382_v24, %v366_v44  ;;  %v488_v55 = vmul.f32 %v470_v29, %v2282_v18  ;;  %v367_v11 = vmul.f32 %v2413_v7, %v2413_v7  ;;  %v425_v9 = vrot.slane %v2308_v28, 7 }
  0xc0   :  { %v468_v51 = vsel %vm446_vm0, %v421_v16, %v423_v35  ;;  %v514_v22 = vadd.f32 %v513_v63, %v487_v32  ;;  %v310_v45 = vmax.f32 %v1990_v19, %v309_v50  ;;  %v331_v26 = vmax.f32 %v1999_v57, %v330_v47 }
  0xc1   :  { %v368_v10 = vmul.f32 %v2312_v37, %v2312_v37  ;;  %v535_v24 = vadd.f32 %v534_v30, %v488_v55  ;;  %v404_v21 = vadd.f32 %v403_v62, %v367_v11  ;;  %v489_v3 = vmul.f32 %v467_v46, %v2280_v4 }
  0xc2   :  { %v426_v29 = vrot.slane %v2314_v41, 7  ;;  %v465_v44 = vsel %vm446_vm0, %v422_v39, %v424_v42  ;;  %v490_v0 = vmul.f32 %v468_v51, %v2292_v15  ;;  %v369_v16 = vmul.f32 %v2318_v53, %v2318_v53 }
  0xc3   :  { %v384_v5 = vadd.f32 %v383_v58, %v368_v10  ;;  %v427_v19 = vrot.slane %v2326_v56, 7  ;;  %v466_v57 = vsel %vm446_vm0, %v423_v35, %v425_v9  ;;  %v515_v63 = vadd.f32 %v514_v22, %v489_v3 }
  0xc4   :  { %v311_v50 = vrot.slane %v310_v45, 2  ;;  %v332_v47 = vrot.slane %v331_v26, 2  ;;  %v536_v30 = vadd.f32 %v535_v24, %v490_v0  ;;  %v405_v62 = vadd.f32 %v404_v21, %v369_v16 }
  0xc5   :  { %v491_v32 = vmul.f32 %v465_v44, %v2302_v27  ;;  %v385_v58 = vrot.slane %v384_v5, 4  ;;  %v428_v39 = vrot.slane %v2320_v61, 7  ;;  %v463_v46 = vsel %vm446_vm0, %v424_v42, %v426_v29 }
  0xc6   :  { %v492_v55 = vmul.f32 %v466_v57, %v2308_v28  ;;  %v429_v11 = vrot.slane %v2324_v25, 7  ;;  %v464_v35 = vsel %vm446_vm0, %v425_v9, %v427_v19  ;;  %v312_v22 = vmax.f32 %v310_v45, %v311_v50 }
  0xc7   :  { %v516_v51 = vadd.f32 %v515_v63, %v491_v32  ;;  %v333_v10 = vmax.f32 %v331_v26, %v332_v47  ;;  %v406_v24 = vrot.slane %v405_v62, 4  ;;  %v430_v21 = vrot.slane %v2338_v38, 7 }
  0xc8   :  { %v537_v0 = vadd.f32 %v536_v30, %v492_v55  ;;  %v431_v3 = vrot.slane %v2340_v17, 7  ;;  %v493_v44 = vmul.f32 %v463_v46, %v2314_v41  ;;  %v386_v16 = vadd.f32 %v385_v58, %v384_v5 }
  0xc9   :  { %v432_v42 = vrot.slane %v2336_v20, 7  ;;  %v461_v57 = vsel %vm446_vm0, %v426_v29, %v428_v39  ;;  %v494_v40 = vmul.f32 %v464_v35, %v2326_v56  ;;  %v433_v9 = vrot.slane %v2342_v14, 7 }
  0xca   :  { %v434_v45 = vrot.slane %v2357_v48, 7  ;;  %v462_v26 = vsel %vm446_vm0, %v427_v19, %v429_v11  ;;  %v517_v63 = vadd.f32 %v516_v51, %v493_v44  ;;  %v313_v50 = vrot.slane %v312_v22, 1 }
  0xcb   :  { %v334_v47 = vrot.slane %v333_v10, 1  ;;  %v435_v30 = vrot.slane %v2369_v54, 7  ;;  %v538_v5 = vadd.f32 %v537_v0, %v494_v40  ;;  %v407_v32 = vadd.f32 %v406_v24, %v405_v62 }
  0xcc   :  { %v438_v58 = vrot.slane %v2385_v60, 7  ;;  %v440_v29 = vrot.slane %v2397_v13, 7  ;;  %v495_v46 = vmul.f32 %v461_v57, %v2320_v61  ;;  %v387_v55 = vrot.slane %v386_v16, 2 }
  0xcd   :  { %v441_v35 = vrot.slane %v2413_v7, 7  ;;  %v459_v1 = vsel %vm446_vm0, %v428_v39, %v430_v21  ;;  %v496_v19 = vmul.f32 %v462_v26, %v2324_v25  ;;  %v436_v51 = vrot.slane %v2364_v34, 7 }
  0xce   :  { %v439_v40 = vrot.slane %v2387_v52, 7  ;;  %v460_v62 = vsel %vm446_vm0, %v429_v11, %v431_v3  ;;  %v518_v0 = vadd.f32 %v517_v63, %v495_v46  ;;  %v2533_v24 = vmax.f32 %v312_v22, %v313_v50 }
  0xcf   :  { %v2535_v44 = vmax.f32 %v333_v10, %v334_v47  ;;  %v437_v57 = vrot.slane %v2376_v36, 7  ;;  %v539_v61 = vadd.f32 %v538_v5, %v496_v19  ;;  %v408_v39 = vrot.slane %v407_v32, 2 }
  0xd0   :  { %4702 = vst [vmem:[#allocation38_spill] sm:$0xff] %v2533_v24  ;;  %v4704_v26 = vrot.slane %v2312_v37, 7  ;;  %v449_v56 = vsel %vm446_vm0, %v438_v58, %v440_v29  ;;  %v497_v41 = vmul.f32 %v459_v1, %v2338_v38  ;;  %v388_v11 = vadd.f32 %v387_v55, %v386_v16  ;;  %v4710_v24 = vld [vmem:[#allocation25_spill] sm:$0xff] }
  0xd1   :  { %4703 = vst [vmem:[#allocation39_spill] sm:$0xff] %v2535_v44  ;;  %v4705_v22 = vrot.slane %v2318_v53, 7  ;;  %v457_v63 = vsel %vm446_vm0, %v430_v21, %v432_v42  ;;  %v498_v50 = vmul.f32 %v460_v62, %v2340_v17  ;;  %v450_v47 = vsel %vm446_vm0, %v439_v40, %v441_v35 }
  0xd2   :  { %v447_v25 = vsel %vm446_vm0, %v440_v29, %v4704_v26  ;;  %v458_v5 = vsel %vm446_vm0, %v431_v3, %v433_v9  ;;  %v519_v29 = vadd.f32 %v518_v0, %v497_v41  ;;  %v4568_v1 = vrot.slane %v2312_v37, 6 }
  0xd3   :  { %v448_v10 = vsel %vm446_vm0, %v441_v35, %v4705_v22  ;;  %v455_v16 = vsel %vm446_vm0, %v432_v42, %v434_v45  ;;  %v456_v46 = vsel %vm446_vm0, %v433_v9, %v435_v30  ;;  %v540_v55 = vadd.f32 %v539_v61, %v498_v50 }
  0xd4   :  { %v4567_v21 = vrot.slane %v2318_v53, 6  ;;  %v409_v19 = vadd.f32 %v408_v39, %v407_v32  ;;  %v499_v62 = vmul.f32 %v457_v63, %v2336_v20  ;;  %v553_v35 = vrot.slane %v2196_v2, 6 }
  0xd5   :  { %v555_v26 = vrot.slane %v2192_v59, 6  ;;  %v389_v3 = vrot.slane %v388_v11, 1  ;;  %v500_v41 = vmul.f32 %v458_v5, %v2342_v14  ;;  %v554_v0 = vrot.slane %v2206_v8, 6 }
  0xd6   :  { %v556_v42 = vrot.slane %v2198_v6, 6  ;;  %v451_v9 = vsel %vm446_vm0, %v436_v51, %v438_v58  ;;  %v453_v61 = vsel %vm446_vm0, %v434_v45, %v436_v51  ;;  %v520_v32 = vadd.f32 %v519_v29, %v499_v62 }
  0xd7   :  { %v616_v39 = vsel %vm585_vm1, %v4568_v1, %v553_v35  ;;  %v452_v22 = vsel %vm446_vm0, %v437_v57, %v439_v40  ;;  %v454_v63 = vsel %vm446_vm0, %v435_v30, %v437_v57  ;;  %v541_v50 = vadd.f32 %v540_v55, %v500_v41 }
  0xd8   :  { %v617_v58 = vsel %vm585_vm1, %v4567_v21, %v554_v0  ;;  %v410_v5 = vrot.slane %v409_v19, 1  ;;  %v501_v45 = vmul.f32 %v455_v16, %v2357_v48  ;;  %v502_v51 = vmul.f32 %v456_v46, %v2369_v54 }
  0xd9   :  { %v614_v29 = vsel %vm585_vm1, %v553_v35, %v555_v26  ;;  %v2588_v62 = vadd.f32 %v389_v3, %v388_v11  ;;  %v503_v40 = vmul.f32 %v453_v61, %v2364_v34  ;;  %v615_v30 = vsel %vm585_vm1, %v554_v0, %v556_v42 }
  0xda   :  { %v618_v57 = vmul.f32 %v616_v39, %v2196_v2  ;;  %v504_v55 = vmul.f32 %v454_v63, %v2376_v36  ;;  %v521_v41 = vadd.f32 %v520_v32, %v501_v45  ;;  %v557_v21 = vrot.slane %v2226_v23, 6 }
  0xdb   :  { %4706 = vst [vmem:[#allocation40_spill] sm:$0xff] %v2588_v62  ;;  %v619_v16 = vmul.f32 %v617_v58, %v2206_v8  ;;  %v505_v46 = vmul.f32 %v451_v9, %v2385_v60  ;;  %v542_v1 = vadd.f32 %v541_v50, %v502_v51  ;;  %v558_v11 = vrot.slane %v2248_v33, 6  ;;  %v4711_v62 = vld [vmem:[#allocation26_spill] sm:$0xff] }
  0xdc   :  { %v620_v35 = vmul.f32 %v614_v29, %v2192_v59  ;;  %v2600_v3 = vadd.f32 %v410_v5, %v409_v19  ;;  %v559_v0 = vrot.slane %v2240_v31, 6  ;;  %v612_v61 = vsel %vm585_vm1, %v555_v26, %v557_v21 }
  0xdd   :  { %v621_v32 = vmul.f32 %v615_v30, %v2198_v6  ;;  %v506_v39 = vmul.f32 %v452_v22, %v2387_v52  ;;  %v560_v63 = vrot.slane %v2260_v43, 6  ;;  %v613_v9 = vsel %vm585_vm1, %v556_v42, %v558_v11 }
  0xde   :  { %4707 = vst [vmem:[#allocation41_spill] sm:$0xff] %v2600_v3  ;;  %v650_v50 = vadd.f32 %v620_v35, %v618_v57  ;;  %v507_v58 = vmul.f32 %v449_v56, %v2397_v13  ;;  %v508_v19 = vmul.f32 %v450_v47, %v2413_v7  ;;  %v522_v5 = vadd.f32 %v521_v41, %v503_v40  ;;  %v4708_v35 = vld [vmem:[#allocation23_spill] sm:$0xff] }
  0xdf   :  { %v671_v45 = vadd.f32 %v621_v32, %v619_v16  ;;  %v509_v51 = vmul.f32 %v447_v25, %v2312_v37  ;;  %v510_v26 = vmul.f32 %v448_v10, %v2318_v53  ;;  %v543_v29 = vadd.f32 %v542_v1, %v504_v55 }
  0xe0   :  { %v622_v30 = vmul.f32 %v612_v61, %v2226_v23  ;;  %v561_v22 = vrot.slane %v2268_v49, 6  ;;  %v562_v44 = vrot.slane %v2282_v18, 6  ;;  %v610_v42 = vsel %vm585_vm1, %v557_v21, %v559_v0  ;;  %v4709_v21 = vld [vmem:[#allocation27_spill] sm:$0xff] }
  0xe1   :  { %v623_v56 = vmul.f32 %v613_v9, %v2248_v33  ;;  %v563_v47 = vrot.slane %v2280_v4, 6  ;;  %v564_v40 = vrot.slane %v2292_v15, 6  ;;  %v611_v25 = vsel %vm585_vm1, %v558_v11, %v560_v63 }
  0xe2   :  { %v651_v10 = vadd.f32 %v650_v50, %v622_v30  ;;  %v523_v1 = vadd.f32 %v522_v5, %v505_v46  ;;  %v565_v57 = vrot.slane %v2302_v27, 6  ;;  %v566_v55 = vrot.slane %v2308_v28, 6 }
  0xe3   :  { %v672_v41 = vadd.f32 %v671_v45, %v623_v56  ;;  %v544_v16 = vadd.f32 %v543_v29, %v506_v39  ;;  %v567_v61 = vrot.slane %v4708_v35, 6  ;;  %v568_v32 = vrot.slane %v4709_v21, 6 }
  0xe4   :  { %v624_v9 = vmul.f32 %v610_v42, %v2240_v31  ;;  %v569_v3 = vrot.slane %v4710_v24, 6  ;;  %v570_v33 = vrot.slane %v4711_v62, 6  ;;  %v608_v11 = vsel %vm585_vm1, %v559_v0, %v561_v22 }
  0xe5   :  { %v625_v46 = vmul.f32 %v611_v25, %v2260_v43  ;;  %v571_v50 = vrot.slane %v2338_v38, 6  ;;  %v572_v5 = vrot.slane %v2340_v17, 6  ;;  %v609_v39 = vsel %vm585_vm1, %v560_v63, %v562_v44 }
  0xe6   :  { %v652_v45 = vadd.f32 %v651_v10, %v624_v9  ;;  %v524_v29 = vadd.f32 %v523_v1, %v507_v58  ;;  %v573_v30 = vrot.slane %v2336_v20, 6  ;;  %v574_v42 = vrot.slane %v2342_v14, 6 }
  0xe7   :  { %v673_v56 = vadd.f32 %v672_v41, %v625_v46  ;;  %v545_v31 = vadd.f32 %v544_v16, %v508_v19  ;;  %v579_v23 = vrot.slane %v2385_v60, 6  ;;  %v580_v0 = vrot.slane %v2387_v52, 6 }
  0xe8   :  { %v626_v25 = vmul.f32 %v608_v11, %v2268_v49  ;;  %v581_v43 = vrot.slane %v2397_v13, 6  ;;  %v582_v6 = vrot.slane %v2413_v7, 6  ;;  %v606_v63 = vsel %vm585_vm1, %v561_v22, %v563_v47 }
  0xe9   :  { %v627_v58 = vmul.f32 %v609_v39, %v2282_v18  ;;  %v577_v10 = vrot.slane %v2364_v34, 6  ;;  %v578_v1 = vrot.slane %v2376_v36, 6  ;;  %v607_v19 = vsel %vm585_vm1, %v562_v44, %v564_v40 }
  0xea   :  { %v653_v41 = vadd.f32 %v652_v45, %v626_v25  ;;  %v525_v16 = vadd.f32 %v524_v29, %v509_v51  ;;  %v575_v9 = vrot.slane %v2357_v48, 6  ;;  %v576_v11 = vrot.slane %v2369_v54, 6 }
  0xeb   :  { %v674_v46 = vadd.f32 %v673_v56, %v627_v58  ;;  %v546_v49 = vadd.f32 %v545_v31, %v510_v26  ;;  %v590_v22 = vsel %vm585_vm1, %v577_v10, %v579_v23  ;;  %v591_v39 = vsel %vm585_vm1, %v578_v1, %v580_v0 }
  0xec   :  { %v628_v18 = vmul.f32 %v606_v63, %v2280_v4  ;;  %v588_v59 = vsel %vm585_vm1, %v579_v23, %v581_v43  ;;  %v589_v44 = vsel %vm585_vm1, %v580_v0, %v582_v6  ;;  %v604_v51 = vsel %vm585_vm1, %v563_v47, %v565_v57 }
  0xed   :  { %v629_v45 = vmul.f32 %v607_v19, %v2292_v15  ;;  %v4712_v31 = vrot.slane %v2312_v37, 6  ;;  %v4713_v29 = vrot.slane %v2318_v53, 6  ;;  %v605_v23 = vsel %vm585_vm1, %v564_v40, %v566_v55 }
  0xee   :  { %v654_v25 = vadd.f32 %v653_v41, %v628_v18  ;;  %v526_v0 = vrot.slane %v525_v16, 4  ;;  %v592_v47 = vsel %vm585_vm1, %v575_v9, %v577_v10  ;;  %v593_v63 = vsel %vm585_vm1, %v576_v11, %v578_v1 }
  0xef   :  { %v586_v26 = vsel %vm585_vm1, %v581_v43, %v4712_v31  ;;  %v587_v56 = vsel %vm585_vm1, %v582_v6, %v4713_v29  ;;  %v675_v58 = vadd.f32 %v674_v46, %v629_v45  ;;  %v547_v19 = vrot.slane %v546_v49, 4 }
  0xf0   :  { %v594_v43 = vsel %vm585_vm1, %v573_v30, %v575_v9  ;;  %v596_v31 = vsel %vm585_vm1, %v571_v50, %v573_v30  ;;  %v630_v6 = vmul.f32 %v604_v51, %v2302_v27  ;;  %v600_v18 = vsel %vm585_vm1, %v567_v61, %v569_v3 }
  0xf1   :  { %v602_v40 = vsel %vm585_vm1, %v565_v57, %v567_v61  ;;  %v603_v10 = vsel %vm585_vm1, %v566_v55, %v568_v32  ;;  %v631_v1 = vmul.f32 %v605_v23, %v2308_v28  ;;  %v598_v41 = vsel %vm585_vm1, %v569_v3, %v571_v50 }
  0xf2   :  { %v599_v9 = vsel %vm585_vm1, %v570_v33, %v572_v5  ;;  %v601_v30 = vsel %vm585_vm1, %v568_v32, %v570_v33  ;;  %v655_v46 = vadd.f32 %v654_v25, %v630_v6  ;;  %v527_v51 = vadd.f32 %v526_v0, %v525_v16 }
  0xf3   :  { %v595_v45 = vsel %vm585_vm1, %v574_v42, %v576_v11  ;;  %v597_v57 = vsel %vm585_vm1, %v572_v5, %v574_v42  ;;  %v676_v55 = vadd.f32 %v675_v58, %v631_v1  ;;  %v548_v61 = vadd.f32 %v547_v19, %v546_v49  ;;  %v4718_v1 = vld [vmem:[#allocation8_spill] sm:$0xff] }
  0xf4   :  { %v632_v29 = vmul.f32 %v602_v40, %v4708_v35  ;;  %v633_v3 = vmul.f32 %v603_v10, %v4709_v21  ;;  %v634_v50 = vmul.f32 %v600_v18, %v4710_v24  ;;  %v635_v23 = vmul.f32 %v601_v30, %v4711_v62 }
  0xf5   :  { %v636_v33 = vmul.f32 %v598_v41, %v2338_v38  ;;  %v637_v32 = vmul.f32 %v599_v9, %v2340_v17  ;;  %v638_v16 = vmul.f32 %v596_v31, %v2336_v20  ;;  %v639_v11 = vmul.f32 %v597_v57, %v2342_v14  ;;  %v4722_v57 = vld [vmem:[#allocation14_spill] sm:$0xff] }
  0xf6   :  { %v2711_v5 = vmul.f32 %v594_v43, %v2357_v48  ;;  %v2714_v49 = vmul.f32 %v595_v45, %v2369_v54  ;;  %v656_v42 = vadd.f32 %v655_v46, %v632_v29  ;;  %v528_v25 = vrot.slane %v527_v51, 2 }
  0xf7   :  { %v2717_v0 = vmul.f32 %v592_v47, %v2364_v34  ;;  %v2720_v58 = vmul.f32 %v593_v63, %v2376_v36  ;;  %v677_v19 = vadd.f32 %v676_v55, %v633_v3  ;;  %v549_v6 = vrot.slane %v548_v61, 2  ;;  %v4725_v3 = vld [vmem:[#allocation15_spill] sm:$0xff] }
  0xf8   :  { %v2723_v31 = vmul.f32 %v590_v22, %v2385_v60  ;;  %v2726_v18 = vmul.f32 %v591_v39, %v2387_v52  ;;  %v2729_v43 = vmul.f32 %v588_v59, %v2397_v13  ;;  %v2733_v40 = vmul.f32 %v589_v44, %v2413_v7  ;;  %v4719_v59 = vld [vmem:[#allocation10_spill] sm:$0xff]  ;;  %v4721_v44 = vld [vmem:[#allocation12_spill] sm:$0xff] }
  0xf9   :  { %v2736_v47 = vmul.f32 %v586_v26, %v2312_v37  ;;  %v2739_v63 = vmul.f32 %v587_v56, %v2318_v53  ;;  %v692_v22 = vrot.slane %v2196_v2, 5  ;;  %v657_v10 = vadd.f32 %v656_v42, %v634_v50  ;;  %v4724_v56 = vld [vmem:[#allocation13_spill] sm:$0xff]  ;;  %v4726_v50 = vld [vmem:[#allocation16_spill] sm:$0xff] }
  0xfa   :  { %4714 = vst [vmem:[#allocation23_spill] sm:$0xff] %v2729_v43  ;;  %4715 = vst [vmem:[#allocation27_spill] sm:$0xff] %v2733_v40  ;;  %v693_v39 = vrot.slane %v2206_v8, 5  ;;  %v694_v41 = vrot.slane %v4718_v1, 5  ;;  %v695_v9 = vrot.slane %v4719_v59, 5  ;;  %v2745_v30 = vadd.f32 %v528_v25, %v527_v51 }
  0xfb   :  { %4716 = vst [vmem:[#allocation25_spill] sm:$0xff] %v2736_v47  ;;  %4717 = vst [vmem:[#allocation26_spill] sm:$0xff] %v2739_v63  ;;  %v678_v46 = vadd.f32 %v677_v19, %v635_v23  ;;  %v2749_v55 = vadd.f32 %v549_v6, %v548_v61  ;;  %v4727_v47 = vld [vmem:[#allocation18_spill] sm:$0xff]  ;;  %v722_v23 = vrot.slane %v2312_v37, 5  ;;  %v658_v25 = vadd.f32 %v657_v10, %v636_v33 }
  0xfc   :  { %4720 = vst [vmem:[#allocation8_spill] sm:$0xff] %v2745_v30  ;;  %v723_v6 = vrot.slane %v2318_v53, 5  ;;  %v706_v63 = vrot.slane %v4708_v35, 5  ;;  %v708_v40 = vrot.slane %v4710_v24, 5  ;;  %v709_v43 = vrot.slane %v4711_v62, 5 }
  0xfd   :  { %4723 = vst [vmem:[#allocation10_spill] sm:$0xff] %v2749_v55  ;;  %v679_v29 = vadd.f32 %v678_v46, %v637_v32  ;;  %v710_v51 = vrot.slane %v2338_v38, 5  ;;  %v711_v26 = vrot.slane %v2340_v17, 5  ;;  %v712_v33 = vrot.slane %v2336_v20, 5 }
  0xfe   :  { %v718_v10 = vrot.slane %v2385_v60, 5  ;;  %v719_v61 = vrot.slane %v2387_v52, 5  ;;  %v720_v32 = vrot.slane %v2397_v13, 5  ;;  %v755_v46 = vsel %vm724_vm2, %v722_v23, %v692_v22 }
  0xff   :  { %v659_v19 = vadd.f32 %v658_v25, %v638_v16  ;;  %v713_v42 = vrot.slane %v2342_v14, 5  ;;  %v721_v45 = vrot.slane %v2413_v7, 5  ;;  %v756_v55 = vsel %vm724_vm2, %v723_v6, %v693_v39 }
 0x100   :  { %v680_v30 = vadd.f32 %v679_v29, %v639_v11  ;;  %v716_v20 = vrot.slane %v2364_v34, 5  ;;  %v717_v60 = vrot.slane %v2376_v36, 5  ;;  %v753_v52 = vsel %vm724_vm2, %v692_v22, %v694_v41 }
 0x101   :  { %v714_v13 = vrot.slane %v2357_v48, 5  ;;  %v715_v17 = vrot.slane %v2369_v54, 5  ;;  %v754_v16 = vsel %vm724_vm2, %v693_v39, %v695_v9  ;;  %v757_v25 = vmul.f32 %v755_v46, %v2196_v2 }
 0x102   :  { %v2788_v7 = vsel %vm724_vm2, %v718_v10, %v720_v32  ;;  %v2792_v11 = vsel %vm724_vm2, %v716_v20, %v718_v10  ;;  %v2796_v22 = vsel %vm724_vm2, %v717_v60, %v719_v61  ;;  %v758_v29 = vmul.f32 %v756_v55, %v2206_v8 }
 0x103   :  { %4728 = vst [vmem:[#allocation42_spill] sm:$0xff] %v2788_v7  ;;  %4729 = vst [vmem:[#allocation43_spill] sm:$0xff] %v2792_v11  ;;  %v660_v36 = vadd.f32 %v659_v19, %v2711_v5  ;;  %v2802_v39 = vsel %vm724_vm2, %v720_v32, %v722_v23  ;;  %v2806_v46 = vsel %vm724_vm2, %v719_v61, %v721_v45  ;;  %v4734_v55 = vrot.slane %v4721_v44, 5 }
 0x104   :  { %4730 = vst [vmem:[#allocation44_spill] sm:$0xff] %v2796_v22  ;;  %4731 = vst [vmem:[#allocation45_spill] sm:$0xff] %v2802_v39  ;;  %v759_v7 = vmul.f32 %v753_v52, %v4718_v1  ;;  %v681_v10 = vadd.f32 %v680_v30, %v2714_v49  ;;  %v2812_v11 = vsel %vm724_vm2, %v721_v45, %v723_v6  ;;  %v4736_v49 = vrot.slane %v4722_v57, 5 }
 0x105   :  { %4732 = vst [vmem:[#allocation46_spill] sm:$0xff] %v2806_v46  ;;  %4733 = vst [vmem:[#allocation47_spill] sm:$0xff] %v2812_v11  ;;  %v751_v5 = vsel %vm724_vm2, %v694_v41, %v4734_v55  ;;  %v760_v23 = vmul.f32 %v754_v16, %v4719_v59  ;;  %v2821_v19 = vsel %vm724_vm2, %v714_v13, %v716_v20  ;;  %v4739_v16 = vrot.slane %v4709_v21, 5 }
 0x106   :  { %v2825_v52 = vsel %vm724_vm2, %v715_v17, %v717_v60  ;;  %v752_v30 = vsel %vm724_vm2, %v695_v9, %v4736_v49  ;;  %v789_v45 = vadd.f32 %v759_v7, %v757_v25  ;;  %v2833_v61 = vsel %vm724_vm2, %v712_v33, %v714_v13 }
 0x107   :  { %4735 = vst [vmem:[#allocation48_spill] sm:$0xff] %v2825_v52  ;;  %v2837_v41 = vsel %vm724_vm2, %v713_v42, %v715_v17  ;;  %v2841_v20 = vsel %vm724_vm2, %v710_v51, %v712_v33  ;;  %v810_v60 = vadd.f32 %v760_v23, %v758_v29  ;;  %v661_v6 = vadd.f32 %v660_v36, %v2717_v0 }
 0x108   :  { %v2846_v32 = vsel %vm724_vm2, %v711_v26, %v713_v42  ;;  %v2850_v7 = vsel %vm724_vm2, %v708_v40, %v710_v51  ;;  %v761_v13 = vmul.f32 %v751_v5, %v4721_v44  ;;  %v682_v17 = vadd.f32 %v681_v10, %v2720_v58 }
 0x109   :  { %v2856_v9 = vsel %vm724_vm2, %v709_v43, %v711_v26  ;;  %v4737_v33 = vrot.slane %v4724_v56, 5  ;;  %v4738_v36 = vmov %v4734_v55  ;;  %v762_v42 = vmul.f32 %v752_v30, %v4722_v57 }
 0x10a   :  { %v739_v51 = vsel %vm724_vm2, %v706_v63, %v708_v40  ;;  %v740_v58 = vsel %vm724_vm2, %v4739_v16, %v709_v43  ;;  %v4740_v26 = vrot.slane %v4725_v3, 5  ;;  %v4741_v25 = vmov %v4736_v49 }
 0x10b   :  { %v749_v0 = vsel %vm724_vm2, %v4738_v36, %v4737_v33  ;;  %v790_v10 = vadd.f32 %v789_v45, %v761_v13  ;;  %v4742_v55 = vrot.slane %v2302_v27, 5  ;;  %v4743_v40 = vrot.slane %v4726_v50, 5 }
 0x10c   :  { %v750_v29 = vsel %vm724_vm2, %v4741_v25, %v4740_v26  ;;  %v4744_v23 = vmov %v4737_v33  ;;  %v811_v49 = vadd.f32 %v810_v60, %v762_v42  ;;  %v4605_v30 = vrot.slane %v2312_v37, 4  ;;  %v4760_v37 = vld [vmem:[#allocation25_spill] sm:$0xff] }
 0x10d   :  { %v741_v5 = vsel %vm724_vm2, %v4742_v55, %v706_v63  ;;  %v747_v43 = vsel %vm724_vm2, %v4744_v23, %v4743_v40  ;;  %v662_v33 = vadd.f32 %v661_v6, %v2723_v31  ;;  %v4745_v36 = vrot.slane %v4727_v47, 5 }
 0x10e   :  { %v4746_v45 = vmov %v4740_v26  ;;  %v763_v63 = vmul.f32 %v749_v0, %v4724_v56  ;;  %v683_v26 = vadd.f32 %v682_v17, %v2726_v18  ;;  %v764_v25 = vmul.f32 %v750_v29, %v4725_v3 }
 0x10f   :  { %v748_v13 = vsel %vm724_vm2, %v4746_v45, %v4745_v36  ;;  %v831_v60 = vrot.slane %v2196_v2, 4  ;;  %v833_v42 = vrot.slane %v4718_v1, 4  ;;  %v832_v6 = vrot.slane %v2206_v8, 4  ;;  %v4751_v45 = vld [vmem:[#allocation23_spill] sm:$0xff] }
 0x110   :  { %v791_v31 = vadd.f32 %v790_v10, %v763_v63  ;;  %v834_v55 = vrot.slane %v4719_v59, 4  ;;  %v4747_v40 = vmov %v4739_v16  ;;  %v4748_v0 = vrot.slane %v2308_v28, 5 }
 0x111   :  { %v4749_v17 = vrot.slane %v2302_v27, 5  ;;  %v4750_v29 = vrot.slane %v2280_v4, 5  ;;  %v812_v23 = vadd.f32 %v811_v49, %v764_v25  ;;  %v894_v36 = vsel %vm863_vm3, %v4605_v30, %v831_v60  ;;  %v4755_v25 = vld [vmem:[#allocation27_spill] sm:$0xff] }
 0x112   :  { %v742_v18 = vsel %vm724_vm2, %v4748_v0, %v4747_v40  ;;  %v663_v63 = vadd.f32 %v662_v33, %v4751_v45  ;;  %v4753_v11 = vrot.slane %v4726_v50, 5  ;;  %v765_v0 = vmul.f32 %v747_v43, %v4726_v50 }
 0x113   :  { %v743_v10 = vsel %vm724_vm2, %v4750_v29, %v4749_v17  ;;  %v4752_v16 = vmov %v4750_v29  ;;  %v4754_v39 = vrot.slane %v2318_v53, 4  ;;  %v684_v17 = vadd.f32 %v683_v26, %v4755_v25 }
 0x114   :  { %v745_v40 = vsel %vm724_vm2, %v4753_v11, %v4752_v16  ;;  %v4756_v29 = vrot.slane %v2292_v15, 5  ;;  %v4757_v33 = vrot.slane %v4727_v47, 5  ;;  %v766_v30 = vmul.f32 %v748_v13, %v4727_v47 }
 0x115   :  { %v895_v49 = vsel %vm863_vm3, %v4754_v39, %v832_v6  ;;  %v892_v11 = vsel %vm863_vm3, %v831_v60, %v833_v42  ;;  %v4758_v43 = vrot.slane %v2308_v28, 5  ;;  %v792_v26 = vadd.f32 %v791_v31, %v765_v0  ;;  %v4761_v0 = vld [vmem:[#allocation26_spill] sm:$0xff] }
 0x116   :  { %v746_v45 = vsel %vm724_vm2, %v4757_v33, %v4756_v29  ;;  %v4759_v16 = vmov %v4756_v29  ;;  %v893_v25 = vsel %vm863_vm3, %v832_v6, %v834_v55  ;;  %v896_v53 = vmul.f32 %v894_v36, %v2196_v2 }
 0x117   :  { %v744_v39 = vsel %vm724_vm2, %v4759_v16, %v4758_v43  ;;  %v767_v29 = vmul.f32 %v745_v40, %v2280_v4  ;;  %v813_v33 = vadd.f32 %v812_v23, %v766_v30  ;;  %v835_v13 = vrot.slane %v4721_v44, 4 }
 0x118   :  { %v897_v60 = vmul.f32 %v895_v49, %v2206_v8  ;;  %v664_v46 = vadd.f32 %v663_v63, %v4760_v37  ;;  %v768_v22 = vmul.f32 %v746_v45, %v2292_v15  ;;  %v836_v52 = vrot.slane %v4722_v57, 4 }
 0x119   :  { %v898_v31 = vmul.f32 %v892_v11, %v4718_v1  ;;  %v685_v43 = vadd.f32 %v684_v17, %v4761_v0  ;;  %v837_v6 = vrot.slane %v4724_v56, 4  ;;  %v890_v36 = vsel %vm863_vm3, %v833_v42, %v835_v13 }
 0x11a   :  { %v899_v30 = vmul.f32 %v893_v25, %v4719_v59  ;;  %v793_v23 = vadd.f32 %v792_v26, %v767_v29  ;;  %v838_v40 = vrot.slane %v4725_v3, 4  ;;  %v891_v37 = vsel %vm863_vm3, %v834_v55, %v836_v52 }
 0x11b   :  { %v928_v63 = vadd.f32 %v898_v31, %v896_v53  ;;  %v769_v49 = vmul.f32 %v743_v10, %v2302_v27  ;;  %v770_v45 = vmul.f32 %v744_v39, %v2308_v28  ;;  %v814_v11 = vadd.f32 %v813_v33, %v768_v22  ;;  %v4762_v31 = vld [vmem:[#allocation30_spill] sm:$0xff] }
 0x11c   :  { %v949_v17 = vadd.f32 %v899_v30, %v897_v60  ;;  %v771_v16 = vmul.f32 %v741_v5, %v4708_v35  ;;  %v772_v0 = vmul.f32 %v742_v18, %v4709_v21  ;;  %v773_v42 = vmul.f32 %v739_v51, %v4710_v24 }
 0x11d   :  { %v900_v26 = vmul.f32 %v890_v36, %v4721_v44  ;;  %v774_v25 = vmul.f32 %v740_v58, %v4711_v62  ;;  %v839_v29 = vrot.slane %v4726_v50, 4  ;;  %v888_v53 = vsel %vm863_vm3, %v835_v13, %v837_v6  ;;  %v4763_v13 = vld [vmem:[#allocation28_spill] sm:$0xff] }
 0x11e   :  { %v901_v55 = vmul.f32 %v891_v37, %v4722_v57  ;;  %v794_v10 = vadd.f32 %v793_v23, %v769_v49  ;;  %v840_v22 = vrot.slane %v4727_v47, 4  ;;  %v889_v5 = vsel %vm863_vm3, %v836_v52, %v838_v40 }
 0x11f   :  { %v929_v18 = vadd.f32 %v928_v63, %v900_v26  ;;  %v665_v39 = vrot.slane %v664_v46, 4  ;;  %v686_v51 = vrot.slane %v685_v43, 4  ;;  %v815_v33 = vadd.f32 %v814_v11, %v770_v45 }
 0x120   :  { %v950_v60 = vadd.f32 %v949_v17, %v901_v55  ;;  %v775_v58 = vmul.f32 %v2850_v7, %v2338_v38  ;;  %v776_v36 = vmul.f32 %v2856_v9, %v4762_v31  ;;  %v777_v30 = vmul.f32 %v2841_v20, %v4763_v13 }
 0x121   :  { %v902_v23 = vmul.f32 %v888_v53, %v4724_v56  ;;  %v778_v37 = vmul.f32 %v2846_v32, %v2342_v14  ;;  %v841_v52 = vrot.slane %v2280_v4, 4  ;;  %v886_v63 = vsel %vm863_vm3, %v837_v6, %v839_v29 }
 0x122   :  { %v903_v49 = vmul.f32 %v889_v5, %v4725_v3  ;;  %v795_v45 = vadd.f32 %v794_v10, %v771_v16  ;;  %v842_v7 = vrot.slane %v2292_v15, 4  ;;  %v887_v9 = vsel %vm863_vm3, %v838_v40, %v840_v22  ;;  %v4765_v40 = vld [vmem:[#allocation33_spill] sm:$0xff]  ;;  %v4766_v10 = vld [vmem:[#allocation48_spill] sm:$0xff] }
 0x123   :  { %v930_v11 = vadd.f32 %v929_v18, %v902_v23  ;;  %v779_v20 = vmul.f32 %v2833_v61, %v2357_v48  ;;  %v3000_v32 = vmul.f32 %v2837_v41, %v2369_v54  ;;  %v816_v17 = vadd.f32 %v815_v33, %v772_v0  ;;  %v4770_v23 = vld [vmem:[#allocation44_spill] sm:$0xff] }
 0x124   :  { %v951_v26 = vadd.f32 %v950_v60, %v903_v49  ;;  %v666_v53 = vadd.f32 %v665_v39, %v664_v46  ;;  %v3002_v6 = vadd.f32 %v686_v51, %v685_v43  ;;  %v3006_v16 = vmul.f32 %v2821_v19, %v2364_v34  ;;  %v4767_v39 = vld [vmem:[#allocation34_spill] sm:$0xff]  ;;  %v4768_v51 = vld [vmem:[#allocation43_spill] sm:$0xff] }
 0x125   :  { %v904_v55 = vmul.f32 %v886_v63, %v4726_v50  ;;  %v3011_v5 = vmul.f32 %v4766_v10, %v4765_v40  ;;  %v843_v61 = vrot.slane %v2302_v27, 4  ;;  %v884_v41 = vsel %vm863_vm3, %v839_v29, %v841_v52  ;;  %v4769_v60 = vld [vmem:[#allocation35_spill] sm:$0xff]  ;;  %v4771_v50 = vld [vmem:[#allocation36_spill] sm:$0xff] }
 0x126   :  { %4764 = vst [vmem:[#allocation23_spill] sm:$0xff] %v3002_v6  ;;  %v905_v0 = vmul.f32 %v887_v9, %v4727_v47  ;;  %v796_v46 = vadd.f32 %v795_v45, %v773_v42  ;;  %v844_v43 = vrot.slane %v2308_v28, 4  ;;  %v885_v19 = vsel %vm863_vm3, %v840_v22, %v842_v7  ;;  %v4772_v9 = vld [vmem:[#allocation42_spill] sm:$0xff]  ;;  %v4774_v45 = vld [vmem:[#allocation37_spill] sm:$0xff] }
 0x127   :  { %v931_v18 = vadd.f32 %v930_v11, %v904_v55  ;;  %v3022_v33 = vmul.f32 %v4768_v51, %v4767_v39  ;;  %v3026_v63 = vmul.f32 %v4770_v23, %v4769_v60  ;;  %v817_v49 = vadd.f32 %v816_v17, %v774_v25  ;;  %v4775_v47 = vld [vmem:[#allocation46_spill] sm:$0xff]  ;;  %v4780_v11 = vld [vmem:[#allocation47_spill] sm:$0xff] }
 0x128   :  { %v952_v10 = vadd.f32 %v951_v26, %v905_v0  ;;  %v667_v29 = vrot.slane %v666_v53, 2  ;;  %v3030_v42 = vmul.f32 %v4772_v9, %v4771_v50  ;;  %v3034_v3 = vmul.f32 %v4775_v47, %v4774_v45  ;;  %v4777_v47 = vld [vmem:[#allocation22_spill] sm:$0xff]  ;;  %v4778_v9 = vld [vmem:[#allocation45_spill] sm:$0xff] }
 0x129   :  { %v906_v22 = vmul.f32 %v884_v41, %v2280_v4  ;;  %v845_v55 = vrot.slane %v4708_v35, 4  ;;  %v882_v51 = vsel %vm863_vm3, %v841_v52, %v843_v61  ;;  %v907_v25 = vmul.f32 %v885_v19, %v2292_v15  ;;  %v4779_v41 = vld [vmem:[#allocation24_spill] sm:$0xff] }
 0x12a   :  { %4773 = vst [vmem:[#allocation27_spill] sm:$0xff] %v3030_v42  ;;  %4776 = vst [vmem:[#allocation25_spill] sm:$0xff] %v3034_v3  ;;  %v797_v17 = vadd.f32 %v796_v46, %v775_v58  ;;  %v846_v26 = vrot.slane %v4709_v21, 4  ;;  %v883_v0 = vsel %vm863_vm3, %v842_v7, %v844_v43  ;;  %v3047_v3 = vmul.f32 %v4778_v9, %v4777_v47 }
 0x12b   :  { %v932_v23 = vadd.f32 %v931_v18, %v906_v22  ;;  %v3051_v6 = vmul.f32 %v4780_v11, %v4779_v41  ;;  %v818_v4 = vadd.f32 %v817_v49, %v776_v36  ;;  %v953_v42 = vadd.f32 %v952_v10, %v907_v25 }
 0x12c   :  { %v3053_v52 = vadd.f32 %v667_v29, %v666_v53  ;;  %v847_v58 = vrot.slane %v4710_v24, 4  ;;  %v848_v46 = vrot.slane %v4711_v62, 4  ;;  %v908_v19 = vmul.f32 %v882_v51, %v2302_v27 }
 0x12d   :  { %v849_v7 = vrot.slane %v2338_v38, 4  ;;  %v850_v18 = vrot.slane %v4762_v31, 4  ;;  %v880_v22 = vsel %vm863_vm3, %v843_v61, %v845_v55  ;;  %v909_v11 = vmul.f32 %v883_v0, %v2308_v28 }
 0x12e   :  { %4781 = vst [vmem:[#allocation26_spill] sm:$0xff] %v3053_v52  ;;  %v798_v9 = vadd.f32 %v797_v17, %v777_v30  ;;  %v851_v36 = vrot.slane %v4763_v13, 4  ;;  %v881_v53 = vsel %vm863_vm3, %v844_v43, %v846_v26  ;;  %v933_v49 = vadd.f32 %v932_v23, %v908_v19 }
 0x12f   :  { %v819_v10 = vadd.f32 %v818_v4, %v778_v37  ;;  %v852_v29 = vrot.slane %v2342_v14, 4  ;;  %v853_v51 = vrot.slane %v2357_v48, 4  ;;  %v954_v25 = vadd.f32 %v953_v42, %v909_v11 }
 0x130   :  { %v854_v52 = vrot.slane %v2369_v54, 4  ;;  %v855_v27 = vrot.slane %v2364_v34, 4  ;;  %v910_v30 = vmul.f32 %v880_v22, %v4708_v35  ;;  %v878_v4 = vsel %vm863_vm3, %v845_v55, %v847_v58 }
 0x131   :  { %v911_v37 = vmul.f32 %v881_v53, %v4709_v21  ;;  %v799_v43 = vadd.f32 %v798_v9, %v779_v20  ;;  %v879_v42 = vsel %vm863_vm3, %v846_v26, %v848_v46  ;;  %v4621_v19 = vrot.slane %v4777_v47, 3 }
 0x132   :  { %v934_v23 = vadd.f32 %v933_v49, %v910_v30  ;;  %v820_v11 = vadd.f32 %v819_v10, %v3000_v32  ;;  %v859_v22 = vrot.slane %v4771_v50, 4  ;;  %v4620_v17 = vrot.slane %v4779_v41, 3 }
 0x133   :  { %v955_v61 = vadd.f32 %v954_v25, %v911_v37  ;;  %v912_v0 = vmul.f32 %v878_v4, %v4710_v24  ;;  %v970_v55 = vrot.slane %v2196_v2, 3  ;;  %v971_v53 = vrot.slane %v2206_v8, 3 }
 0x134   :  { %v972_v20 = vrot.slane %v4718_v1, 3  ;;  %v876_v26 = vsel %vm863_vm3, %v847_v58, %v849_v7  ;;  %v913_v9 = vmul.f32 %v879_v42, %v4711_v62  ;;  %v973_v32 = vrot.slane %v4719_v59, 3 }
 0x135   :  { %v800_v49 = vadd.f32 %v799_v43, %v3006_v16  ;;  %v877_v10 = vsel %vm863_vm3, %v848_v46, %v850_v18  ;;  %v935_v25 = vadd.f32 %v934_v23, %v912_v0  ;;  %v1033_v30 = vsel %vm1002_vm4, %v4621_v19, %v970_v55 }
 0x136   :  { %v821_v4 = vadd.f32 %v820_v11, %v3011_v5  ;;  %v956_v37 = vadd.f32 %v955_v61, %v913_v9  ;;  %v1034_v42 = vsel %vm1002_vm4, %v4620_v17, %v971_v53  ;;  %v872_v16 = vsel %vm863_vm3, %v851_v36, %v853_v51 }
 0x137   :  { %v874_v46 = vsel %vm863_vm3, %v849_v7, %v851_v36  ;;  %v914_v0 = vmul.f32 %v876_v26, %v2338_v38  ;;  %v1031_v5 = vsel %vm1002_vm4, %v970_v55, %v972_v20  ;;  %v875_v61 = vsel %vm863_vm3, %v850_v18, %v852_v29 }
 0x138   :  { %v915_v43 = vmul.f32 %v877_v10, %v4762_v31  ;;  %v1032_v23 = vsel %vm1002_vm4, %v971_v53, %v973_v32  ;;  %v1035_v11 = vmul.f32 %v1033_v30, %v2196_v2  ;;  %v801_v9 = vadd.f32 %v800_v49, %v3022_v33 }
 0x139   :  { %v936_v17 = vadd.f32 %v935_v25, %v914_v0  ;;  %v974_v7 = vrot.slane %v4721_v44, 3  ;;  %v1036_v36 = vmul.f32 %v1034_v42, %v2206_v8  ;;  %v822_v26 = vadd.f32 %v821_v4, %v3026_v63  ;;  %v4782_v25 = vld [vmem:[#allocation15_spill] sm:$0xff] }
 0x13a   :  { %v957_v55 = vadd.f32 %v956_v37, %v915_v43  ;;  %v975_v19 = vrot.slane %v4722_v57, 3  ;;  %v1037_v18 = vmul.f32 %v1031_v5, %v4718_v1  ;;  %v916_v10 = vmul.f32 %v874_v46, %v4763_v13  ;;  %v4783_v37 = vld [vmem:[#allocation27_spill] sm:$0xff] }
 0x13b   :  { %v976_v53 = vrot.slane %v4724_v56, 3  ;;  %v1029_v30 = vsel %vm1002_vm4, %v972_v20, %v974_v7  ;;  %v1038_v33 = vmul.f32 %v1032_v23, %v4719_v59  ;;  %v917_v49 = vmul.f32 %v875_v61, %v2342_v14  ;;  %v4784_v20 = vld [vmem:[#allocation25_spill] sm:$0xff] }
 0x13c   :  { %v977_v42 = vrot.slane %v4782_v25, 3  ;;  %v1030_v63 = vsel %vm1002_vm4, %v973_v32, %v975_v19  ;;  %v1067_v4 = vadd.f32 %v1037_v18, %v1035_v11  ;;  %v802_v0 = vadd.f32 %v801_v9, %v4783_v37  ;;  %v4785_v9 = vld [vmem:[#allocation16_spill] sm:$0xff] }
 0x13d   :  { %v873_v46 = vsel %vm863_vm3, %v852_v29, %v854_v52  ;;  %v937_v5 = vadd.f32 %v936_v17, %v916_v10  ;;  %v1088_v43 = vadd.f32 %v1038_v33, %v1036_v36  ;;  %v823_v58 = vadd.f32 %v822_v26, %v4784_v20  ;;  %v4786_v26 = vld [vmem:[#allocation18_spill] sm:$0xff] }
 0x13e   :  { %v870_v61 = vsel %vm863_vm3, %v853_v51, %v855_v27  ;;  %v958_v32 = vadd.f32 %v957_v55, %v917_v49  ;;  %v1039_v23 = vmul.f32 %v1029_v30, %v4721_v44  ;;  %v918_v11 = vmul.f32 %v872_v16, %v2357_v48 }
 0x13f   :  { %v978_v18 = vrot.slane %v4785_v9, 3  ;;  %v1027_v29 = vsel %vm1002_vm4, %v974_v7, %v976_v53  ;;  %v1040_v17 = vmul.f32 %v1030_v63, %v4722_v57  ;;  %v919_v36 = vmul.f32 %v873_v46, %v2369_v54  ;;  %v4789_v46 = vld [vmem:[#allocation17_spill] sm:$0xff] }
 0x140   :  { %v979_v10 = vrot.slane %v4786_v26, 3  ;;  %v1028_v33 = vsel %vm1002_vm4, %v975_v19, %v977_v42  ;;  %v1068_v51 = vadd.f32 %v1067_v4, %v1039_v23  ;;  %v803_v55 = vadd.f32 %v802_v0, %v3047_v3 }
 0x141   :  { %v4787_v30 = vrot.slane %v4765_v40, 4  ;;  %v938_v7 = vadd.f32 %v937_v5, %v918_v11  ;;  %v1089_v49 = vadd.f32 %v1088_v43, %v1040_v17  ;;  %v824_v63 = vadd.f32 %v823_v58, %v3051_v6 }
 0x142   :  { %v4788_v37 = vrot.slane %v4767_v39, 4  ;;  %v959_v4 = vadd.f32 %v958_v32, %v919_v36  ;;  %v1041_v3 = vmul.f32 %v1027_v29, %v4724_v56  ;;  %v920_v0 = vmul.f32 %v870_v61, %v2364_v34 }
 0x143   :  { %v871_v16 = vsel %vm863_vm3, %v854_v52, %v4787_v30  ;;  %v980_v20 = vrot.slane %v4789_v46, 3  ;;  %v1025_v52 = vsel %vm1002_vm4, %v976_v53, %v978_v18  ;;  %v1042_v5 = vmul.f32 %v1028_v33, %v4782_v25 }
 0x144   :  { %v868_v19 = vsel %vm863_vm3, %v855_v27, %v4788_v37  ;;  %v921_v6 = vmul.f32 %v871_v16, %v4765_v40  ;;  %v981_v58 = vrot.slane %v2292_v15, 3  ;;  %v1026_v43 = vsel %vm1002_vm4, %v977_v42, %v979_v10  ;;  %v4793_v16 = vld [vmem:[#allocation20_spill] sm:$0xff] }
 0x145   :  { %v1069_v27 = vadd.f32 %v1068_v51, %v1041_v3  ;;  %v804_v32 = vrot.slane %v803_v55, 4  ;;  %v4790_v23 = vrot.slane %v4769_v60, 4  ;;  %v4791_v61 = vmov %v4787_v30 }
 0x146   :  { %v939_v29 = vadd.f32 %v938_v7, %v920_v0  ;;  %v1090_v53 = vadd.f32 %v1089_v49, %v1042_v5  ;;  %v825_v17 = vrot.slane %v824_v63, 4  ;;  %v4792_v36 = vmov %v4788_v37 }
 0x147   :  { %v869_v11 = vsel %vm863_vm3, %v4791_v61, %v4790_v23  ;;  %v866_v33 = vsel %vm863_vm3, %v4792_v36, %v859_v22  ;;  %v960_v42 = vadd.f32 %v959_v4, %v921_v6  ;;  %v1043_v51 = vmul.f32 %v1025_v52, %v4785_v9 }
 0x148   :  { %v922_v30 = vmul.f32 %v868_v19, %v4767_v39  ;;  %v982_v37 = vrot.slane %v4793_v16, 3  ;;  %v1023_v3 = vsel %vm1002_vm4, %v978_v18, %v980_v20  ;;  %v1044_v7 = vmul.f32 %v1026_v43, %v4786_v26 }
 0x149   :  { %v923_v49 = vmul.f32 %v869_v11, %v4769_v60  ;;  %v983_v0 = vrot.slane %v2308_v28, 3  ;;  %v1024_v5 = vsel %vm1002_vm4, %v979_v10, %v981_v58  ;;  %v1070_v23 = vadd.f32 %v1069_v27, %v1043_v51 }
 0x14a   :  { %v805_v4 = vadd.f32 %v804_v32, %v803_v55  ;;  %v4794_v52 = vrot.slane %v4774_v45, 4  ;;  %v4795_v19 = vrot.slane %v4769_v60, 4  ;;  %v940_v61 = vadd.f32 %v939_v29, %v922_v30 }
 0x14b   :  { %v1091_v18 = vadd.f32 %v1090_v53, %v1044_v7  ;;  %v826_v36 = vadd.f32 %v825_v17, %v824_v63  ;;  %v4796_v43 = vrot.slane %v4777_v47, 4  ;;  %v961_v10 = vadd.f32 %v960_v42, %v923_v49  ;;  %v4799_v49 = vld [vmem:[#allocation23_spill] sm:$0xff] }
 0x14c   :  { %v867_v6 = vsel %vm863_vm3, %v4795_v19, %v4794_v52  ;;  %v1045_v55 = vmul.f32 %v1023_v3, %v4789_v46  ;;  %v924_v27 = vmul.f32 %v866_v33, %v4771_v50  ;;  %v984_v32 = vrot.slane %v4708_v35, 3 }
 0x14d   :  { %v864_v11 = vsel %vm863_vm3, %v859_v22, %v4796_v43  ;;  %v1021_v51 = vsel %vm1002_vm4, %v980_v20, %v982_v37  ;;  %v1046_v29 = vmul.f32 %v1024_v5, %v2292_v15  ;;  %v925_v63 = vmul.f32 %v867_v6, %v4774_v45 }
 0x14e   :  { %v985_v53 = vrot.slane %v4709_v21, 3  ;;  %v1022_v17 = vsel %vm1002_vm4, %v981_v58, %v983_v0  ;;  %v1071_v22 = vadd.f32 %v1070_v23, %v1045_v55  ;;  %v806_v42 = vrot.slane %v805_v4, 2 }
 0x14f   :  { %v4797_v30 = vrot.slane %v4779_v41, 4  ;;  %v4798_v33 = vmov %v4794_v52  ;;  %v941_v7 = vadd.f32 %v940_v61, %v924_v27  ;;  %v1092_v20 = vadd.f32 %v1091_v18, %v1046_v29 }
 0x150   :  { %v4800_v5 = vrot.slane %v4799_v49, 2  ;;  %v827_v19 = vrot.slane %v826_v36, 2  ;;  %v962_v6 = vadd.f32 %v961_v10, %v925_v63  ;;  %v1047_v43 = vmul.f32 %v1021_v51, %v4793_v16  ;;  %v4801_v10 = vld [vmem:[#allocation8_spill] sm:$0xff] }
 0x151   :  { %v865_v3 = vsel %vm863_vm3, %v4798_v33, %v4797_v30  ;;  %v926_v58 = vmul.f32 %v864_v11, %v4777_v47  ;;  %v986_v23 = vrot.slane %v4710_v24, 3  ;;  %v1019_v55 = vsel %vm1002_vm4, %v982_v37, %v984_v32  ;;  %v4802_v33 = vld [vmem:[#allocation10_spill] sm:$0xff] }
 0x152   :  { %v689_v52 = vadd.f32 %v4800_v5, %v4799_v49  ;;  %v1048_v15 = vmul.f32 %v1022_v17, %v2308_v28  ;;  %v927_v61 = vmul.f32 %v865_v3, %v4779_v41  ;;  %v987_v18 = vrot.slane %v4711_v62, 3  ;;  %v4803_v5 = vld [vmem:[#allocation26_spill] sm:$0xff] }
 0x153   :  { %v1020_v27 = vsel %vm1002_vm4, %v983_v0, %v985_v53  ;;  %v1072_v29 = vadd.f32 %v1071_v22, %v1047_v43  ;;  %v530_v63 = vrot.slane %v4801_v10, 1  ;;  %v807_v51 = vadd.f32 %v806_v42, %v805_v4 }
 0x154   :  { %v942_v30 = vadd.f32 %v941_v7, %v926_v58  ;;  %v1093_v11 = vadd.f32 %v1092_v20, %v1048_v15  ;;  %v551_v49 = vrot.slane %v4802_v33, 1  ;;  %v669_v16 = vrot.slane %v4803_v5, 1 }
 0x155   :  { %v963_v37 = vadd.f32 %v962_v6, %v927_v61  ;;  %v1049_v17 = vmul.f32 %v1019_v55, %v4708_v35  ;;  %v690_v28 = vrot.slane %v689_v52, 1  ;;  %v988_v3 = vrot.slane %v2338_v38, 3 }
 0x156   :  { %v1017_v46 = vsel %vm1002_vm4, %v984_v32, %v986_v23  ;;  %v1050_v0 = vmul.f32 %v1020_v27, %v4709_v21  ;;  %v828_v22 = vadd.f32 %v827_v19, %v826_v36  ;;  %v989_v4 = vrot.slane %v4762_v31, 3 }
 0x157   :  { %v1018_v15 = vsel %vm1002_vm4, %v985_v53, %v987_v18  ;;  %v1073_v42 = vadd.f32 %v1072_v29, %v1049_v17  ;;  %v3256_v7 = vadd.f32 %v530_v63, %v4801_v10  ;;  %v808_v20 = vrot.slane %v807_v51, 1 }
 0x158   :  { %v943_v6 = vrot.slane %v942_v30, 4  ;;  %v1094_v43 = vadd.f32 %v1093_v11, %v1050_v0  ;;  %v3259_v58 = vadd.f32 %v551_v49, %v4802_v33  ;;  %v3262_v32 = vadd.f32 %v669_v16, %v4803_v5 }
 0x159   :  { %v964_v55 = vrot.slane %v963_v37, 4  ;;  %v1051_v36 = vmul.f32 %v1017_v46, %v4710_v24  ;;  %v3265_v19 = vadd.f32 %v690_v28, %v689_v52  ;;  %v990_v53 = vrot.slane %v4763_v13, 3 }
 0x15a   :  { %4804 = vst [vmem:[#allocation30_spill] sm:$0xff] %v3259_v58  ;;  %4805 = vst [vmem:[#allocation28_spill] sm:$0xff] %v3262_v32  ;;  %v1015_v61 = vsel %vm1002_vm4, %v986_v23, %v988_v3  ;;  %v1052_v27 = vmul.f32 %v1018_v15, %v4711_v62  ;;  %v829_v29 = vrot.slane %v828_v22, 1  ;;  %v991_v10 = vrot.slane %v2342_v14, 3  ;;  %v4816_v58 = vld [vmem:[#allocation21_spill] sm:$0xff] }
 0x15b   :  { %4806 = vst [vmem:[#allocation48_spill] sm:$0xff] %v3265_v19  ;;  %v1016_v63 = vsel %vm1002_vm4, %v987_v18, %v989_v4  ;;  %v1074_v16 = vadd.f32 %v1073_v42, %v1051_v36  ;;  %v3274_v11 = vadd.f32 %v808_v20, %v807_v51  ;;  %v944_v33 = vadd.f32 %v943_v6, %v942_v30 }
 0x15c   :  { %v992_v28 = vrot.slane %v2357_v48, 3  ;;  %v1095_v46 = vadd.f32 %v1094_v43, %v1052_v27  ;;  %v965_v52 = vadd.f32 %v964_v55, %v963_v37  ;;  %v996_v49 = vrot.slane %v4767_v39, 3 }
 0x15d   :  { %4807 = vst [vmem:[#allocation43_spill] sm:$0xff] %v3274_v11  ;;  %v998_v23 = vrot.slane %v4771_v50, 3  ;;  %v1053_v5 = vmul.f32 %v1015_v61, %v2338_v38  ;;  %v993_v17 = vrot.slane %v2369_v54, 3  ;;  %v994_v0 = vrot.slane %v2364_v34, 3  ;;  %v4813_v11 = vld [vmem:[#allocation19_spill] sm:$0xff] }
 0x15e   :  { %v1013_v18 = vsel %vm1002_vm4, %v988_v3, %v990_v53  ;;  %v1054_v51 = vmul.f32 %v1016_v63, %v4762_v31  ;;  %v995_v30 = vrot.slane %v4765_v40, 3  ;;  %v997_v15 = vrot.slane %v4769_v60, 3 }
 0x15f   :  { %v1014_v37 = vsel %vm1002_vm4, %v989_v4, %v991_v10  ;;  %v1075_v42 = vadd.f32 %v1074_v16, %v1053_v5  ;;  %v3289_v20 = vadd.f32 %v829_v29, %v828_v22  ;;  %v945_v6 = vrot.slane %v944_v33, 2 }
 0x160   :  { %v999_v43 = vrot.slane %v4774_v45, 3  ;;  %v1096_v55 = vadd.f32 %v1095_v46, %v1054_v51  ;;  %v966_v36 = vrot.slane %v965_v52, 2  ;;  %v4809_v61 = vrot.slane %v4777_v47, 3 }
 0x161   :  { %4808 = vst [vmem:[#allocation44_spill] sm:$0xff] %v3289_v20  ;;  %v1005_v27 = vsel %vm1002_vm4, %v996_v49, %v998_v23  ;;  %v1055_v63 = vmul.f32 %v1013_v18, %v4763_v13  ;;  %v1009_v4 = vsel %vm1002_vm4, %v992_v28, %v994_v0  ;;  %v1011_v22 = vsel %vm1002_vm4, %v990_v53, %v992_v28 }
 0x162   :  { %v1003_v3 = vsel %vm1002_vm4, %v998_v23, %v4809_v61  ;;  %v1012_v29 = vsel %vm1002_vm4, %v991_v10, %v993_v17  ;;  %v1056_v16 = vmul.f32 %v1014_v37, %v2342_v14  ;;  %v1007_v46 = vsel %vm1002_vm4, %v994_v0, %v996_v49 }
 0x163   :  { %v1008_v5 = vsel %vm1002_vm4, %v995_v30, %v997_v15  ;;  %v1010_v23 = vsel %vm1002_vm4, %v993_v17, %v995_v30  ;;  %v1076_v18 = vadd.f32 %v1075_v42, %v1055_v63  ;;  %v946_v51 = vadd.f32 %v945_v6, %v944_v33 }
 0x164   :  { %v4810_v61 = vrot.slane %v4779_v41, 3  ;;  %v1006_v10 = vsel %vm1002_vm4, %v997_v15, %v999_v43  ;;  %v1097_v28 = vadd.f32 %v1096_v55, %v1056_v16  ;;  %v967_v37 = vadd.f32 %v966_v36, %v965_v52 }
 0x165   :  { %v1057_v49 = vmul.f32 %v1011_v22, %v2357_v48  ;;  %v1058_v0 = vmul.f32 %v1012_v29, %v2369_v54  ;;  %v1059_v20 = vmul.f32 %v1009_v4, %v2364_v34  ;;  %v1060_v17 = vmul.f32 %v1010_v23, %v4765_v40 }
 0x166   :  { %v1004_v53 = vsel %vm1002_vm4, %v999_v43, %v4810_v61  ;;  %v1061_v33 = vmul.f32 %v1007_v46, %v4767_v39  ;;  %v1062_v30 = vmul.f32 %v1008_v5, %v4769_v60  ;;  %v1063_v42 = vmul.f32 %v1005_v27, %v4771_v50  ;;  %v4815_v46 = vld [vmem:[#allocation20_spill] sm:$0xff] }
 0x167   :  { %v1064_v6 = vmul.f32 %v1006_v10, %v4774_v45  ;;  %v3327_v15 = vmul.f32 %v1003_v3, %v4777_v47  ;;  %v3330_v52 = vmul.f32 %v1004_v53, %v4779_v41  ;;  %v1077_v43 = vadd.f32 %v1076_v18, %v1057_v49  ;;  %v4811_v10 = vld [vmem:[#allocation17_spill] sm:$0xff] }
 0x168   :  { %v947_v55 = vrot.slane %v946_v51, 1  ;;  %v1098_v36 = vadd.f32 %v1097_v28, %v1058_v0  ;;  %v1109_v63 = vrot.slane %v2196_v2, 2  ;;  %v1110_v4 = vrot.slane %v2206_v8, 2 }
 0x169   :  { %v968_v22 = vrot.slane %v967_v37, 1  ;;  %v1111_v29 = vrot.slane %v4718_v1, 2  ;;  %v1112_v27 = vrot.slane %v4719_v59, 2  ;;  %v1113_v16 = vrot.slane %v4721_v44, 2 }
 0x16a   :  { %v1139_v23 = vrot.slane %v4777_v47, 2  ;;  %v1078_v18 = vadd.f32 %v1077_v43, %v1059_v20  ;;  %v3344_v49 = vadd.f32 %v947_v55, %v946_v51  ;;  %v1099_v0 = vadd.f32 %v1098_v36, %v1060_v17 }
 0x16b   :  { %v1140_v3 = vrot.slane %v4779_v41, 2  ;;  %v3348_v32 = vadd.f32 %v968_v22, %v967_v37  ;;  %v1127_v37 = vrot.slane %v2338_v38, 2  ;;  %v1129_v47 = vrot.slane %v4763_v13, 2 }
 0x16c   :  { %4812 = vst [vmem:[#allocation42_spill] sm:$0xff] %v3344_v49  ;;  %v1172_v17 = vsel %vm1141_vm5, %v1139_v23, %v1109_v63  ;;  %v1079_v55 = vadd.f32 %v1078_v18, %v1061_v33  ;;  %v1100_v5 = vadd.f32 %v1099_v0, %v1062_v30  ;;  %v1170_v53 = vsel %vm1141_vm5, %v1109_v63, %v1111_v29 }
 0x16d   :  { %4814 = vst [vmem:[#allocation46_spill] sm:$0xff] %v3348_v32  ;;  %v1173_v43 = vsel %vm1141_vm5, %v1140_v3, %v1110_v4  ;;  %v1130_v19 = vrot.slane %v2342_v14, 2  ;;  %v1135_v28 = vrot.slane %v4767_v39, 2  ;;  %v1137_v33 = vrot.slane %v4771_v50, 2 }
 0x16e   :  { %v1174_v18 = vmul.f32 %v1172_v17, %v2196_v2  ;;  %v1131_v36 = vrot.slane %v2357_v48, 2  ;;  %v1136_v30 = vrot.slane %v4769_v60, 2  ;;  %v1138_v0 = vrot.slane %v4774_v45, 2 }
 0x16f   :  { %v1171_v63 = vsel %vm1141_vm5, %v1110_v4, %v1112_v27  ;;  %v1080_v20 = vadd.f32 %v1079_v55, %v1063_v42  ;;  %v1132_v61 = vrot.slane %v2369_v54, 2  ;;  %v1175_v51 = vmul.f32 %v1173_v43, %v2206_v8 }
 0x170   :  { %v1176_v22 = vmul.f32 %v1170_v53, %v4718_v1  ;;  %v1101_v32 = vadd.f32 %v1100_v5, %v1064_v6  ;;  %v1133_v49 = vrot.slane %v2364_v34, 2  ;;  %v1134_v17 = vrot.slane %v4765_v40, 2 }
 0x171   :  { %v1168_v41 = vsel %vm1141_vm5, %v1111_v29, %v1113_v16  ;;  %v3384_v45 = vsel %vm1141_vm5, %v1135_v28, %v1137_v33  ;;  %v1177_v42 = vmul.f32 %v1171_v63, %v4719_v59  ;;  %v3390_v53 = vsel %vm1141_vm5, %v1137_v33, %v1139_v23 }
 0x172   :  { %v1206_v4 = vadd.f32 %v1176_v22, %v1174_v18  ;;  %v3394_v6 = vsel %vm1141_vm5, %v1138_v0, %v1140_v3  ;;  %v3398_v29 = vsel %vm1141_vm5, %v1136_v30, %v1138_v0  ;;  %v4817_v5 = vrot.slane %v4722_v57, 2 }
 0x173   :  { %v1081_v22 = vadd.f32 %v1080_v20, %v3327_v15  ;;  %v3407_v18 = vsel %vm1141_vm5, %v1133_v49, %v1135_v28  ;;  %v1178_v23 = vmul.f32 %v1168_v41, %v4721_v44  ;;  %v1227_v33 = vadd.f32 %v1177_v42, %v1175_v51 }
 0x174   :  { %v1169_v43 = vsel %vm1141_vm5, %v1112_v27, %v4817_v5  ;;  %v1102_v3 = vadd.f32 %v1101_v32, %v3330_v52  ;;  %v3413_v0 = vsel %vm1141_vm5, %v1134_v17, %v1136_v30  ;;  %v3417_v63 = vsel %vm1141_vm5, %v1131_v36, %v1133_v49 }
 0x175   :  { %v4818_v27 = vrot.slane %v4724_v56, 2  ;;  %v3425_v28 = vsel %vm1141_vm5, %v1132_v61, %v1134_v17  ;;  %v1150_v41 = vsel %vm1141_vm5, %v1129_v47, %v1131_v36  ;;  %v1179_v32 = vmul.f32 %v1169_v43, %v4722_v57 }
 0x176   :  { %v1207_v52 = vadd.f32 %v1206_v4, %v1178_v23  ;;  %v1151_v20 = vsel %vm1141_vm5, %v1130_v19, %v1132_v61  ;;  %v1152_v49 = vsel %vm1141_vm5, %v1127_v37, %v1129_v47  ;;  %v4819_v51 = vrot.slane %v4762_v31, 2 }
 0x177   :  { %v1166_v15 = vsel %vm1141_vm5, %v1113_v16, %v4818_v27  ;;  %v4820_v30 = vrot.slane %v4782_v25, 2  ;;  %v4821_v17 = vmov %v4817_v5  ;;  %v1082_v42 = vrot.slane %v1081_v22, 4 }
 0x178   :  { %v1153_v16 = vsel %vm1141_vm5, %v4819_v51, %v1130_v19  ;;  %v4822_v4 = vrot.slane %v4710_v24, 2  ;;  %v1180_v47 = vmul.f32 %v1166_v15, %v4724_v56  ;;  %v1228_v5 = vadd.f32 %v1227_v33, %v1179_v32  ;;  %v4825_v51 = vld [vmem:[#allocation40_spill] sm:$0xff] }
 0x179   :  { %v1167_v36 = vsel %vm1141_vm5, %v4821_v17, %v4820_v30  ;;  %v1103_v43 = vrot.slane %v1102_v3, 4  ;;  %v4823_v23 = vrot.slane %v4785_v9, 2  ;;  %v4824_v19 = vmov %v4818_v27  ;;  %v4826_v30 = vld [vmem:[#allocation41_spill] sm:$0xff] }
 0x17a   :  { %v1154_v61 = vsel %vm1141_vm5, %v4822_v4, %v1127_v37  ;;  %vm1465_vm6 = vcmp.gt.f32.partialorder %v4825_v51, 0.0  ;;  %vm1466_vm7 = vcmp.gt.f32.partialorder %v4826_v30, 0.0  ;;  %v1181_v17 = vmul.f32 %v1167_v36, %v4782_v25 }
 0x17b   :  { %v1164_v27 = vsel %vm1141_vm5, %v4824_v19, %v4823_v23  ;;  %v1208_v55 = vadd.f32 %v1207_v52, %v1180_v47  ;;  %v1467_v37 = vsel %vm1465_vm6, %v4825_v51, 1.0  ;;  %v1468_v15 = vsel %vm1466_vm7, %v4826_v30, 1.0 }
 0x17c   :  { %v4827_v33 = vmov %v4822_v4  ;;  %v4828_v32 = vrot.slane %v4708_v35, 2  ;;  %v4829_v23 = vrot.slane %v4811_v10, 2  ;;  %v4830_v19 = vrot.slane %v4785_v9, 2 }
 0x17d   :  { %v4831_v52 = vrot.slane %v4813_v11, 2  ;;  %v4832_v36 = vrot.slane %v4786_v26, 2  ;;  %v4834_v51 = vrot.slane %v4782_v25, 2  ;;  %v1182_v56 = vmul.f32 %v1164_v27, %v4785_v9 }
 0x17e   :  { %v1156_v4 = vsel %vm1141_vm5, %v4828_v32, %v4827_v33  ;;  %v1162_v2 = vsel %vm1141_vm5, %v4830_v19, %v4829_v23  ;;  %v1083_v32 = vadd.f32 %v1082_v42, %v1081_v22  ;;  %v1229_v57 = vadd.f32 %v1228_v5, %v1181_v17 }
 0x17f   :  { %v1163_v47 = vsel %vm1141_vm5, %v4832_v36, %v4831_v52  ;;  %v4833_v30 = vmov %v4832_v36  ;;  %1902 = vrcp.f32 %v1467_v37  ;;  %v1104_v23 = vadd.f32 %v1103_v43, %v1102_v3 }
 0x180   :  { %v1165_v33 = vsel %vm1141_vm5, %v4834_v51, %v4833_v30  ;;  %v4835_v19 = vrot.slane %v4815_v46, 2  ;;  %v4836_v44 = vrot.slane %v4811_v10, 2  ;;  %v4837_v36 = vrot.slane %v4816_v58, 2 }
 0x181   :  { %v4838_v25 = vrot.slane %v4813_v11, 2  ;;  %1904 = vrcp.f32 %v1468_v15  ;;  %v4839_v22 = vrot.slane %v4708_v35, 2  ;;  %v4841_v5 = vrot.slane %v4709_v21, 2 }
 0x182   :  { %v1160_v52 = vsel %vm1141_vm5, %v4836_v44, %v4835_v19  ;;  %v4840_v42 = vmov %v4835_v19  ;;  %v4842_v43 = vmov %v4837_v36  ;;  %v1183_v27 = vmul.f32 %v1165_v33, %v4786_v26 }
 0x183   :  { %v1161_v51 = vsel %vm1141_vm5, %v4838_v25, %v4837_v36  ;;  %v1158_v3 = vsel %vm1141_vm5, %v4840_v42, %v4839_v22  ;;  %v1159_v44 = vsel %vm1141_vm5, %v4842_v43, %v4841_v5  ;;  %v1209_v30 = vadd.f32 %v1208_v55, %v1182_v56 }
 0x184   :  { %v4843_v25 = vrot.slane %v4762_v31, 2  ;;  %v4844_v17 = vrot.slane %v4711_v62, 2  ;;  %v4846_v19 = vmov %v4841_v5  ;;  %v1184_v22 = vmul.f32 %v1162_v2, %v4811_v10 }
 0x185   :  { %v1185_v42 = vmul.f32 %v1163_v47, %v4813_v11  ;;  %v1084_v33 = vrot.slane %v1083_v32, 2  ;;  %v1186_v56 = vmul.f32 %v1160_v52, %v4815_v46  ;;  %v1187_v55 = vmul.f32 %v1161_v51, %v4816_v58  ;;  %v4847_v52 = vld [vmem:[#allocation38_spill] sm:$0xff] }
 0x186   :  { %v1155_v37 = vsel %vm1141_vm5, %v4844_v17, %v4843_v25  ;;  %v4845_v15 = vmov %v4844_v17  ;;  %v1230_v5 = vadd.f32 %v1229_v57, %v1183_v27  ;;  %v1105_v43 = vrot.slane %v1104_v23, 2 }
 0x187   :  { %v1157_v36 = vsel %vm1141_vm5, %v4846_v19, %v4845_v15  ;;  %v1188_v25 = vmul.f32 %v1158_v3, %v4708_v35  ;;  %v1189_v17 = vmul.f32 %v1159_v44, %v4709_v21  ;;  %v1190_v26 = vmul.f32 %v1156_v4, %v4710_v24  ;;  %v4848_v44 = vld [vmem:[#allocation39_spill] sm:$0xff] }
 0x188   :  { %v1191_v12 = vmul.f32 %v1157_v36, %v4711_v62  ;;  %v3531_v15 = vmul.f32 %v1154_v61, %v2338_v38  ;;  %v3534_v2 = vmul.f32 %v1155_v37, %v4762_v31  ;;  %v1210_v47 = vadd.f32 %v1209_v30, %v1184_v22  ;;  %v4850_v37 = vld [vmem:[#allocation30_spill] sm:$0xff]  ;;  %v4856_v22 = vld [vmem:[#allocation37_spill] sm:$0xff] }
 0x189   :  { %vm336_vm8 = vcmp.le.f32.partialorder %v4847_v52, 0.0001  ;;  %v3538_v57 = vmul.f32 %v1152_v49, %v4763_v13  ;;  %v3541_v51 = vmul.f32 %v1153_v16, %v2342_v14  ;;  %v3544_v3 = vmul.f32 %v1150_v41, %v2357_v48 }
 0x18a   :  { %v1469_v4 = vsub.f32 0.0, %v3256_v7  ;;  %vm337_vm9 = vcmp.le.f32.partialorder %v4848_v44, 0.0001  ;;  %v1085_v61 = vadd.f32 %v1084_v33, %v1083_v32  ;;  %v3549_v27 = vmul.f32 %v1151_v20, %v2369_v54  ;;  %v1903_v32 = vpop.eup %1902  ;;  %v4858_v33 = vld [vmem:[#allocation22_spill] sm:$0xff] }
 0x18b   :  { %v1231_v30 = vadd.f32 %v1230_v5, %v1185_v42  ;;  %v1470_v19 = vsub.f32 0.0, %v4850_v37  ;;  %v1106_v36 = vadd.f32 %v1105_v43, %v1104_v23  ;;  %v3554_v49 = vmul.f32 %v3417_v63, %v2364_v34 }
 0x18c   :  { %4849 = vst [vmem:[#allocation45_spill] sm:$0xff] %v3549_v27  ;;  %v3558_v41 = vmul.f32 %v3425_v28, %v4765_v40  ;;  %v3562_v16 = vmul.f32 %v3407_v18, %v4767_v39  ;;  %v3566_v20 = vmul.f32 %v3413_v0, %v4769_v60  ;;  %v3570_v23 = vmul.f32 %v3384_v45, %v4771_v50  ;;  %v1905_v28 = vpop.eup %1904  ;;  %v4860_v18 = vld [vmem:[#allocation24_spill] sm:$0xff] }
 0x18d   :  { %4851 = vst [vmem:[#allocation47_spill] sm:$0xff] %v3554_v49  ;;  %v3574_v63 = vmul.f32 %v3398_v29, %v4856_v22  ;;  %v1211_v42 = vadd.f32 %v1210_v47, %v1186_v56  ;;  %v3578_v5 = vmul.f32 %v3390_v53, %v4858_v33  ;;  %v3582_v43 = vmul.f32 %v3394_v6, %v4860_v18  ;;  %v4868_v49 = vld [vmem:[#allocation41_spill] sm:$0xff] }
 0x18e   :  { %4852 = vst [vmem:[#allocation27_spill] sm:$0xff] %v3558_v41  ;;  %4853 = vst [vmem:[#allocation25_spill] sm:$0xff] %v3562_v16  ;;  %v1086_v45 = vrot.slane %v1085_v61, 1  ;;  %v3588_v29 = vmul.f32 %v1905_v28, %v1470_v19  ;;  %v1107_v56 = vrot.slane %v1106_v36, 1  ;;  %v4866_v28 = vld [vmem:[#allocation40_spill] sm:$0xff]  ;;  %vm1462_vm11 = vcmp.le.f32.partialorder %v4868_v49, 0.0 }
 0x18f   :  { %4854 = vst [vmem:[#allocation23_spill] sm:$0xff] %v3566_v20  ;;  %4855 = vst [vmem:[#allocation8_spill] sm:$0xff] %v3570_v23  ;;  %v3585_v20 = vmul.f32 %v1903_v32, %v1469_v4  ;;  %v1232_v23 = vadd.f32 %v1231_v30, %v1187_v55  ;;  %v1212_v6 = vadd.f32 %v1211_v42, %v1188_v25  ;;  %v4865_v30 = vld [vmem:[#allocation15_spill] sm:$0xff]  ;;  %vm1461_vm10 = vcmp.le.f32.partialorder %v4866_v28, 0.0  ;;  %v4870_v41 = vld [vmem:[#allocation18_spill] sm:$0xff] }
 0x190   :  { %4857 = vst [vmem:[#allocation10_spill] sm:$0xff] %v3574_v63  ;;  %4859 = vst [vmem:[#allocation26_spill] sm:$0xff] %v3578_v5  ;;  %v4862_v63 = vld [vmem:[#allocation12_spill] sm:$0xff]  ;;  %v1476_v55 = vmul.f32 %v3588_v29, %v3588_v29  ;;  %v3601_v16 = vadd.f32 %v1086_v45, %v1085_v61  ;;  %v3604_v42 = vadd.f32 %v1107_v56, %v1106_v36  ;;  %v4649_v44 = vrot.slane %v4860_v18, 1  ;;  %v4876_v61 = vld [vmem:[#allocation9_spill] sm:$0xff] }
 0x191   :  { %4861 = vst [vmem:[#allocation38_spill] sm:$0xff] %v3582_v43  ;;  %v1475_v5 = vmul.f32 %v3585_v20, %v3585_v20  ;;  %v4863_v43 = vld [vmem:[#allocation14_spill] sm:$0xff]  ;;  %v1233_v53 = vadd.f32 %v1232_v23, %v1189_v17  ;;  %v1213_v32 = vadd.f32 %v1212_v6, %v1190_v26  ;;  %vm1463_vm12 = vmor %vm336_vm8, %vm1461_vm10  ;;  %v1278_v23 = vrot.slane %v4858_v33, 1 }
 0x192   :  { %4867 = vst [vmem:[#allocation39_spill] sm:$0xff] %v3601_v16  ;;  %v1478_v25 = vsub.f32 1.0, %v1476_v55  ;;  %4869 = vst [vmem:[#allocation30_spill] sm:$0xff] %v3604_v42  ;;  %v4879_v55 = vrot.slane %v4718_v1, 1  ;;  %v4881_v19 = vrot.slane %v4719_v59, 1  ;;  %v1276_v0 = vrot.slane %v4771_v50, 1 }
 0x193   :  { %v1477_v47 = vsub.f32 1.0, %v1475_v5  ;;  %vm1464_vm13 = vmor %vm337_vm9, %vm1462_vm11  ;;  %v1234_v26 = vadd.f32 %v1233_v53, %v1191_v12  ;;  %v4877_v5 = vrot.slane %v4876_v61, 1  ;;  %v1274_v53 = vrot.slane %v4767_v39, 1 }
 0x194   :  { %v3616_v17 = vmul.f32 %v1478_v25, %v4868_v49  ;;  %v1485_v25 = vmul.f32 %v3585_v20, %v3256_v7  ;;  %v4889_v16 = vrot.slane %v4719_v59, 1 }
 0x195   :  { %v3609_v27 = vmul.f32 %v1477_v47, %v4866_v28  ;;  %v1214_v47 = vadd.f32 %v1213_v32, %v3531_v15  ;;  %v4875_v28 = vld [vmem:[#allocation11_spill] sm:$0xff]  ;;  %v1235_v49 = vadd.f32 %v1234_v26, %v3534_v2  ;;  %v1486_v32 = vmul.f32 %v3588_v29, %v4850_v37 }
 0x196   :  { %vm1482_vm0 = vcmp.le.f32.partialorder %v3616_v17, 0.0  ;;  %vm1490_vm2 = vcmp.gt.f32.partialorder %v3616_v17, 0.0  ;;  %vm1280_vm4 = vcmp.lt.s32.totalorder %v4875_v28, 7  ;;  %v4920_v45 = vld [vmem:[#allocation8_spill] sm:$0xff] }
 0x197   :  { %vm1481_vm14 = vcmp.le.f32.partialorder %v3609_v27, 0.0  ;;  %vm1489_vm15 = vcmp.gt.f32.partialorder %v3609_v27, 0.0  ;;  %vm3633_vm3 = vmor %vm1464_vm13, %vm1482_vm0  ;;  %v1492_v56 = vsel %vm1490_vm2, %v3616_v17, 1.0  ;;  %v1311_v15 = vsel %vm1280_vm4, %v1278_v23, %v4877_v5 }
 0x198   :  { %vm3626_vm1 = vmor %vm1463_vm12, %vm1481_vm14  ;;  %v1491_v12 = vsel %vm1489_vm15, %v3609_v27, 1.0  ;;  %v1215_v26 = vadd.f32 %v1214_v47, %v3538_v57  ;;  %v1313_v47 = vmul.f32 %v1311_v15, %v4876_v61 }
 0x199   :  { %1906 = vrcp.f32 %v1491_v12  ;;  %v4880_v12 = vmov %v4877_v5  ;;  %v1236_v5 = vadd.f32 %v1235_v49, %v3541_v51  ;;  %v4886_v51 = vrot.slane %v4718_v1, 1 }
 0x19a   :  { %1908 = vrcp.f32 %v1492_v56  ;;  %v4878_v56 = vrot.slane %v2206_v8, 1  ;;  %v1309_v6 = vsel %vm1280_vm4, %v4880_v12, %v4879_v55  ;;  %v4884_v55 = vld [vmem:[#allocation48_spill] sm:$0xff] }
 0x19b   :  { %v1488_v12 = vadd.f32 %v1486_v32, %v4884_v55  ;;  %v3699_v32 = vmul.f32 %v4858_v33, %v4876_v61  ;;  %v3714_v33 = vsel %vm1280_vm4, %v1276_v0, %v1278_v23 }
 0x19c   :  { %v1312_v2 = vsel %vm1280_vm4, %v4649_v44, %v4878_v56  ;;  %v4882_v4 = vmov %v4878_v56  ;;  %v4883_v56 = vld [vmem:[#allocation28_spill] sm:$0xff]  ;;  %4891 = vst [vmem:[#allocation14_spill] sm:$0xff] %v3714_v33 }
 0x19d   :  { %v1310_v57 = vsel %vm1280_vm4, %v4882_v4, %v4881_v19  ;;  %v1487_v44 = vadd.f32 %v1485_v25, %v4883_v56  ;;  %v1314_v36 = vmul.f32 %v1312_v2, %v2206_v8  ;;  %v1315_v4 = vmul.f32 %v1309_v6, %v4718_v1  ;;  %4887 = vst [vmem:[#allocation12_spill] sm:$0xff] %v3699_v32 }
 0x19e   :  { %v1216_v19 = vadd.f32 %v1215_v26, %v3544_v3  ;;  %v4885_v25 = vrot.slane %v4862_v63, 1  ;;  %v1316_v15 = vmul.f32 %v1310_v57, %v4719_v59  ;;  %v4888_v2 = vrot.slane %v4863_v43, 1 }
 0x19f   :  { %v1345_v6 = vadd.f32 %v1315_v4, %v1313_v47  ;;  %v3709_v26 = vmul.f32 %v4860_v18, %v2206_v8  ;;  %v1493_v42 = vsub.f32 0.0, %v1487_v44  ;;  %v1494_v22 = vsub.f32 0.0, %v1488_v12  ;;  %v4895_v4 = vld [vmem:[#allocation47_spill] sm:$0xff] }
 0x1a0   :  { %v1307_v49 = vsel %vm1280_vm4, %v4886_v51, %v4885_v25  ;;  %v1308_v3 = vsel %vm1280_vm4, %v4889_v16, %v4888_v2  ;;  %v4890_v51 = vld [vmem:[#allocation45_spill] sm:$0xff]  ;;  %v1366_v50 = vadd.f32 %v1316_v15, %v1314_v36  ;;  %v3718_v32 = vsel %vm1280_vm4, %v1274_v53, %v1276_v0 }
 0x1a1   :  { %v1237_v57 = vadd.f32 %v1236_v5, %v4890_v51  ;;  %4892 = vst [vmem:[#allocation15_spill] sm:$0xff] %v3718_v32  ;;  %v4893_v16 = vrot.slane %v2364_v34, 1  ;;  %v1317_v44 = vmul.f32 %v1307_v49, %v4862_v63  ;;  %v1217_v23 = vadd.f32 %v1216_v19, %v4895_v4  ;;  %v4896_v2 = vld [vmem:[#allocation13_spill] sm:$0xff]  ;;  %v4901_v4 = vld [vmem:[#allocation27_spill] sm:$0xff] }
 0x1a2   :  { %v4897_v36 = vrot.slane %v4896_v2, 1  ;;  %v4898_v12 = vrot.slane %v4862_v63, 1  ;;  %v1318_v15 = vmul.f32 %v1308_v3, %v4863_v43  ;;  %v4902_v3 = vrot.slane %v4811_v10, 1 }
 0x1a3   :  { %v1907_v25 = vpop.eup %1906  ;;  %v3724_v47 = vsel %vm1280_vm4, %v4893_v16, %v1274_v53  ;;  %v4899_v53 = vrot.slane %v4865_v30, 1  ;;  %v4900_v16 = vrot.slane %v4863_v43, 1  ;;  %v1346_v49 = vadd.f32 %v1345_v6, %v1317_v44 }
 0x1a4   :  { %v1909_v39 = vpop.eup %1908  ;;  %4894 = vst [vmem:[#allocation40_spill] sm:$0xff] %v3724_v47  ;;  %v3727_v5 = vmul.f32 %v1907_v25, %v1493_v42  ;;  %v1305_v0 = vsel %vm1280_vm4, %v4898_v12, %v4897_v36  ;;  %v1238_v36 = vadd.f32 %v1237_v57, %v4901_v4  ;;  %v1367_v12 = vadd.f32 %v1366_v50, %v1318_v15 }
 0x1a5   :  { %v3737_v51 = vmul.f32 %v1909_v39, %v1494_v22  ;;  %v1306_v42 = vsel %vm1280_vm4, %v4900_v16, %v4899_v53  ;;  %v4903_v53 = vrot.slane %v4785_v9, 1  ;;  %v1319_v44 = vmul.f32 %v1305_v0, %v4896_v2 }
 0x1a6   :  { %v1499_v19 = vmul.f32 %v3727_v5, %v3585_v20  ;;  %v1503_v25 = vmul.f32 %v3727_v5, %v3727_v5  ;;  %v4905_v15 = vrot.slane %v4896_v2, 1  ;;  %v1320_v33 = vmul.f32 %v1306_v42, %v4865_v30 }
 0x1a7   :  { %v1500_v39 = vmul.f32 %v3737_v51, %v3588_v29  ;;  %v1504_v22 = vmul.f32 %v3737_v51, %v3737_v51  ;;  %v1301_v6 = vsel %vm1280_vm4, %v4903_v53, %v4902_v3  ;;  %v4904_v50 = vmov %v4903_v53  ;;  %v4906_v3 = vld [vmem:[#allocation25_spill] sm:$0xff] }
 0x1a8   :  { %v3762_v16 = vadd.f32 %v1499_v19, %v3585_v20  ;;  %v1505_v57 = vsub.f32 1.0, %v1503_v25  ;;  %v1303_v4 = vsel %vm1280_vm4, %v4905_v15, %v4904_v50  ;;  %v1218_v53 = vadd.f32 %v1217_v23, %v4906_v3  ;;  %v4909_v50 = vld [vmem:[#allocation23_spill] sm:$0xff] }
 0x1a9   :  { %v3772_v32 = vadd.f32 %v1500_v39, %v3588_v29  ;;  %v1506_v18 = vsub.f32 1.0, %v1504_v22  ;;  %v4907_v0 = vrot.slane %v4870_v41, 1  ;;  %v4908_v20 = vrot.slane %v4865_v30, 1 }
 0x1aa   :  { %v1347_v25 = vadd.f32 %v1346_v49, %v1319_v44  ;;  %v3782_v47 = vmul.f32 %v1505_v57, %v3609_v27  ;;  %v1239_v15 = vadd.f32 %v1238_v36, %v4909_v50  ;;  %v1368_v42 = vadd.f32 %v1367_v12, %v1320_v33  ;;  %v4921_v50 = vld [vmem:[#allocation10_spill] sm:$0xff] }
 0x1ab   :  { %v1304_v19 = vsel %vm1280_vm4, %v4908_v20, %v4907_v0  ;;  %v3786_v29 = vmul.f32 %v1506_v18, %v3616_v17  ;;  %v1513_v23 = vmul.f32 %v3762_v16, %v4883_v56  ;;  %v1321_v39 = vmul.f32 %v1303_v4, %v4785_v9  ;;  %v4919_v20 = vld [vmem:[#allocation43_spill] sm:$0xff] }
 0x1ac   :  { %vm1509_vm5 = vcmp.le.f32.partialorder %v3782_v47, 0.0  ;;  %v1514_v22 = vmul.f32 %v3772_v32, %v4884_v55  ;;  %vm1521_vm6 = vcmp.gt.f32.partialorder %v3782_v47, 0.0  ;;  %v1322_v27 = vmul.f32 %v1304_v19, %v4870_v41 }
 0x1ad   :  { %vm1510_vm7 = vcmp.le.f32.partialorder %v3786_v29, 0.0  ;;  %vm3799_vm8 = vmor %vm3626_vm1, %vm1509_vm5  ;;  %vm1522_vm9 = vcmp.gt.f32.partialorder %v3786_v29, 0.0  ;;  %v1523_v18 = vsel %vm1521_vm6, %v3782_v47, 1.0  ;;  %v4912_v17 = vrot.slane %v4813_v11, 1 }
 0x1ae   :  { %v4913_v49 = vmov %v4907_v0  ;;  %v1348_v12 = vadd.f32 %v1347_v25, %v1321_v39  ;;  %vm3813_vm10 = vmor %vm3633_vm3, %vm1510_vm7  ;;  %v1524_v44 = vsel %vm1522_vm9, %v3786_v29, 1.0  ;;  %1910 = vrcp.f32 %v1523_v18 }
 0x1af   :  { %v1302_v36 = vsel %vm1280_vm4, %v4913_v49, %v4912_v17  ;;  %v4916_v57 = vrot.slane %v4769_v60, 1  ;;  %v4917_v4 = vrot.slane %v4765_v40, 1  ;;  %v1369_v0 = vadd.f32 %v1368_v42, %v1322_v27  ;;  %v4922_v49 = vld [vmem:[#allocation44_spill] sm:$0xff] }
 0x1b0   :  { %v1515_v19 = vadd.f32 %v1513_v23, %v4919_v20  ;;  %1912 = vrcp.f32 %v1524_v44  ;;  %v1219_v25 = vadd.f32 %v1218_v53, %v4920_v45  ;;  %v1240_v39 = vadd.f32 %v1239_v15, %v4921_v50 }
 0x1b1   :  { %v3824_v3 = vsel %vm1280_vm4, %v4917_v4, %v4916_v57  ;;  %v1323_v17 = vmul.f32 %v1301_v6, %v4811_v10  ;;  %v1516_v18 = vadd.f32 %v1514_v22, %v4922_v49  ;;  %v4923_v60 = vrot.slane %v2364_v34, 1 }
 0x1b2   :  { %4918 = vst [vmem:[#allocation41_spill] sm:$0xff] %v3824_v3  ;;  %v4924_v41 = vrot.slane %v2357_v48, 1  ;;  %v4926_v42 = vrot.slane %v4815_v46, 1  ;;  %v4927_v23 = vrot.slane %v4811_v10, 1  ;;  %v1324_v15 = vmul.f32 %v1302_v36, %v4813_v11  ;;  %v4938_v10 = vld [vmem:[#allocation38_spill] sm:$0xff] }
 0x1b3   :  { %v1517_v6 = vmul.f32 %v3727_v5, %v3256_v7  ;;  %v4928_v22 = vmov %v4917_v4  ;;  %v4929_v27 = vrot.slane %v2369_v54, 1  ;;  %v4932_v44 = vrot.slane %v4813_v11, 1 }
 0x1b4   :  { %v3837_v57 = vsel %vm1280_vm4, %v4924_v41, %v4923_v60  ;;  %v1299_v53 = vsel %vm1280_vm4, %v4927_v23, %v4926_v42  ;;  %v4931_v41 = vrot.slane %v4816_v58, 1  ;;  %v1349_v45 = vadd.f32 %v1348_v12, %v1323_v17  ;;  %v4937_v17 = vld [vmem:[#allocation26_spill] sm:$0xff] }
 0x1b5   :  { %4925 = vst [vmem:[#allocation9_spill] sm:$0xff] %v3837_v57  ;;  %v3854_v60 = vsel %vm1280_vm4, %v4929_v27, %v4928_v22  ;;  %v1518_v36 = vmul.f32 %v3737_v51, %v4850_v37  ;;  %v4933_v50 = vrot.slane %v2357_v48, 1  ;;  %v4934_v42 = vrot.slane %v4763_v13, 1 }
 0x1b6   :  { %4930 = vst [vmem:[#allocation28_spill] sm:$0xff] %v3854_v60  ;;  %v1300_v4 = vsel %vm1280_vm4, %v4932_v44, %v4931_v41  ;;  %v4935_v22 = vrot.slane %v4708_v35, 1  ;;  %v4936_v27 = vrot.slane %v4815_v46, 1  ;;  %v1370_v41 = vadd.f32 %v1369_v0, %v1324_v15 }
 0x1b7   :  { %v3870_v23 = vsel %vm1280_vm4, %v4934_v42, %v4933_v50  ;;  %v1519_v12 = vadd.f32 %v1517_v6, %v1515_v19  ;;  %v3879_v44 = vadd.f32 %v1219_v25, %v4937_v17  ;;  %v3882_v3 = vadd.f32 %v1240_v39, %v4938_v10 }
 0x1b8   :  { %v1297_v11 = vsel %vm1280_vm4, %v4936_v27, %v4935_v22  ;;  %v1325_v60 = vmul.f32 %v1299_v53, %v4815_v46  ;;  %v1520_v40 = vadd.f32 %v1518_v36, %v1516_v18  ;;  %v4939_v50 = vmov %v4934_v42 }
 0x1b9   :  { %v4940_v42 = vrot.slane %v2338_v38, 1  ;;  %v4941_v0 = vrot.slane %v2342_v14, 1  ;;  %v4942_v19 = vrot.slane %v4762_v31, 1  ;;  %v4943_v10 = vrot.slane %v4709_v21, 1 }
 0x1ba   :  { %v4944_v39 = vrot.slane %v4816_v58, 1  ;;  %v1326_v53 = vmul.f32 %v1300_v4, %v4816_v58  ;;  %v4946_v6 = vrot.slane %v4710_v24, 1  ;;  %v4948_v27 = vrot.slane %v4708_v35, 1 }
 0x1bb   :  { %v3891_v57 = vsel %vm1280_vm4, %v4940_v42, %v4939_v50  ;;  %v3899_v25 = vsel %vm1280_vm4, %v4942_v19, %v4941_v0  ;;  %v4945_v15 = vmov %v4940_v42  ;;  %v4949_v50 = vrot.slane %v4711_v62, 1 }
 0x1bc   :  { %v1298_v18 = vsel %vm1280_vm4, %v4944_v39, %v4943_v10  ;;  %v1293_v36 = vsel %vm1280_vm4, %v4946_v6, %v4945_v15  ;;  %v4947_v22 = vmov %v4946_v6  ;;  %v4950_v42 = vmov %v4943_v10 }
 0x1bd   :  { %v1295_v17 = vsel %vm1280_vm4, %v4948_v27, %v4947_v22  ;;  %v1296_v4 = vsel %vm1280_vm4, %v4950_v42, %v4949_v50  ;;  %v1350_v0 = vadd.f32 %v1349_v45, %v1325_v60  ;;  %v4951_v10 = vmov %v4949_v50  ;;  %v1911_v22 = vpop.eup %1910 }
 0x1be   :  { %v1294_v39 = vsel %vm1280_vm4, %v4951_v10, %v4942_v19  ;;  %v1327_v15 = vmul.f32 %v1297_v11, %v4708_v35  ;;  %v1371_v6 = vadd.f32 %v1370_v41, %v1326_v53  ;;  %v1525_v58 = vsub.f32 0.0, %v1519_v12  ;;  %v1913_v60 = vpop.eup %1912 }
 0x1bf   :  { %v1221_v27 = vrot.slane %v3879_v44, 4  ;;  %v1242_v46 = vrot.slane %v3882_v3, 4  ;;  %v1328_v34 = vmul.f32 %v1298_v18, %v4709_v21  ;;  %v1526_v50 = vsub.f32 0.0, %v1520_v40 }
 0x1c0   :  { %v1329_v45 = vmul.f32 %v1295_v17, %v4710_v24  ;;  %v1330_v42 = vmul.f32 %v1296_v4, %v4711_v62  ;;  %v1331_v9 = vmul.f32 %v1293_v36, %v2338_v38  ;;  %v3939_v19 = vmul.f32 %v1911_v22, %v1525_v58  ;;  %v4952_v36 = vld [vmem:[#allocation12_spill] sm:$0xff] }
 0x1c1   :  { %v1351_v11 = vadd.f32 %v1350_v0, %v1327_v15  ;;  %v1389_v41 = vmul.f32 %v4718_v1, %v4876_v61  ;;  %v1390_v12 = vmul.f32 %v4719_v59, %v2206_v8  ;;  %v3945_v53 = vmul.f32 %v1913_v60, %v1526_v50 }
 0x1c2   :  { %v1372_v18 = vadd.f32 %v1371_v6, %v1328_v34  ;;  %v1531_v40 = vmul.f32 %v3939_v19, %v3727_v5  ;;  %v1535_v17 = vmul.f32 %v3939_v19, %v3762_v16  ;;  %v1539_v58 = vmul.f32 %v3939_v19, %v3939_v19 }
 0x1c3   :  { %v1419_v4 = vadd.f32 %v1389_v41, %v4952_v36  ;;  %v1532_v61 = vmul.f32 %v3945_v53, %v3737_v51  ;;  %v1536_v8 = vmul.f32 %v3945_v53, %v3772_v32  ;;  %v1540_v34 = vmul.f32 %v3945_v53, %v3945_v53 }
 0x1c4   :  { %v1391_v0 = vmul.f32 %v4862_v63, %v4718_v1  ;;  %v3963_v10 = vadd.f32 %v1531_v40, %v3762_v16  ;;  %v3966_v15 = vadd.f32 %v1535_v17, %v3727_v5  ;;  %v1541_v6 = vsub.f32 1.0, %v1539_v58 }
 0x1c5   :  { %v1392_v22 = vmul.f32 %v4863_v43, %v4719_v59  ;;  %v1440_v50 = vadd.f32 %v1390_v12, %v3709_v26  ;;  %v3972_v60 = vadd.f32 %v1532_v61, %v3772_v32  ;;  %v1542_v41 = vsub.f32 1.0, %v1540_v34  ;;  %v4953_v26 = vld [vmem:[#allocation42_spill] sm:$0xff] }
 0x1c6   :  { %v1352_v36 = vadd.f32 %v1351_v11, %v1329_v45  ;;  %v3975_v38 = vadd.f32 %v1536_v8, %v3737_v51  ;;  %v3978_v1 = vmul.f32 %v1541_v6, %v3782_v47  ;;  %v1549_v5 = vmul.f32 %v3963_v10, %v4919_v20 }
 0x1c7   :  { %v1373_v16 = vadd.f32 %v1372_v18, %v1330_v42  ;;  %v1420_v40 = vadd.f32 %v1419_v4, %v1391_v0  ;;  %v3983_v59 = vmul.f32 %v1542_v41, %v3786_v29  ;;  %v1550_v32 = vmul.f32 %v3972_v60, %v4922_v49  ;;  %v4956_v29 = vld [vmem:[#allocation46_spill] sm:$0xff] }
 0x1c8   :  { %vm1545_vm11 = vcmp.le.f32.partialorder %v3978_v1, 0.0  ;;  %v1551_v45 = vadd.f32 %v1549_v5, %v4953_v26  ;;  %v1553_v51 = vmul.f32 %v3966_v15, %v4883_v56  ;;  %vm1561_vm12 = vcmp.gt.f32.partialorder %v3978_v1, 0.0 }
 0x1c9   :  { %vm1546_vm13 = vcmp.le.f32.partialorder %v3983_v59, 0.0  ;;  %vm3995_vm14 = vmor %vm3799_vm8, %vm1545_vm11  ;;  %v1552_v42 = vadd.f32 %v1550_v32, %v4956_v29  ;;  %vm1562_vm15 = vcmp.gt.f32.partialorder %v3983_v59, 0.0  ;;  %v1563_v11 = vsel %vm1561_vm12, %v3978_v1, 1.0 }
 0x1ca   :  { %v1441_v12 = vadd.f32 %v1440_v50, %v1392_v22  ;;  %vm4004_vm0 = vmor %vm3813_vm10, %vm1546_vm13  ;;  %v1554_v33 = vmul.f32 %v3975_v38, %v4884_v55  ;;  %v1564_v17 = vsel %vm1562_vm15, %v3983_v59, 1.0  ;;  %1914 = vrcp.f32 %v1563_v11  ;;  %v4963_v11 = vld [vmem:[#allocation32_spill] sm:$0xff] }
 0x1cb   :  { %v1222_v58 = vadd.f32 %v1221_v27, %v3879_v44  ;;  %v1243_v4 = vadd.f32 %v1242_v46, %v3882_v3  ;;  %v1555_v61 = vadd.f32 %v1553_v51, %v1551_v45  ;;  %1916 = vrcp.f32 %v1564_v17  ;;  %v4965_v17 = vld [vmem:[#allocation33_spill] sm:$0xff] }
 0x1cc   :  { %v1332_v8 = vmul.f32 %v1294_v39, %v4762_v31  ;;  %v1393_v52 = vmul.f32 %v4896_v2, %v4862_v63  ;;  %v1394_v34 = vmul.f32 %v4865_v30, %v4863_v43  ;;  %v1556_v0 = vadd.f32 %v1554_v33, %v1552_v42 }
 0x1cd   :  { %v4959_v6 = vrot.slane %v2369_v54, 1  ;;  %v4960_v22 = vrot.slane %v2342_v14, 1  ;;  %v1333_v46 = vmul.f32 %v3891_v57, %v4763_v13  ;;  %v1353_v3 = vadd.f32 %v1352_v36, %v1331_v9  ;;  %v4961_v9 = vld [vmem:[#allocation16_spill] sm:$0xff]  ;;  %v4962_v36 = vld [vmem:[#allocation18_spill] sm:$0xff] }
 0x1ce   :  { %v1557_v39 = vmul.f32 %v3939_v19, %v3256_v7  ;;  %v1374_v27 = vadd.f32 %v1373_v16, %v1332_v8  ;;  %v1421_v63 = vadd.f32 %v1420_v40, %v1393_v52  ;;  %v1442_v50 = vadd.f32 %v1441_v12, %v1394_v34  ;;  %v4964_v12 = vld [vmem:[#allocation9_spill] sm:$0xff]  ;;  %v4966_v8 = vld [vmem:[#allocation28_spill] sm:$0xff] }
 0x1cf   :  { %v1290_v44 = vsel %vm1280_vm4, %v4960_v22, %v4959_v6  ;;  %v1558_v43 = vmul.f32 %v3945_v53, %v4850_v37  ;;  %v1223_v41 = vrot.slane %v1222_v58, 2  ;;  %v1244_v5 = vrot.slane %v1243_v4, 2  ;;  %v4968_v34 = vld [vmem:[#allocation40_spill] sm:$0xff] }
 0x1d0   :  { %v1334_v32 = vmul.f32 %v3899_v25, %v2342_v14  ;;  %v1559_v45 = vadd.f32 %v1557_v39, %v1555_v61  ;;  %v1335_v51 = vmul.f32 %v3870_v23, %v2357_v48  ;;  %v1395_v57 = vmul.f32 %v4961_v9, %v4896_v2  ;;  %v4967_v61 = vld [vmem:[#allocation34_spill] sm:$0xff] }
 0x1d1   :  { %v1396_v16 = vmul.f32 %v4962_v36, %v4865_v30  ;;  %v1560_v40 = vadd.f32 %v1558_v43, %v1556_v0  ;;  %v1336_v42 = vmul.f32 %v1290_v44, %v2369_v54  ;;  %v1337_v33 = vmul.f32 %v4964_v12, %v4963_v11  ;;  %v4969_v30 = vld [vmem:[#allocation35_spill] sm:$0xff]  ;;  %v4970_v0 = vld [vmem:[#allocation41_spill] sm:$0xff] }
 0x1d2   :  { %v1338_v52 = vmul.f32 %v4966_v8, %v4965_v17  ;;  %v1354_v25 = vadd.f32 %v1353_v3, %v1333_v46  ;;  %v1339_v6 = vmul.f32 %v4968_v34, %v4967_v61  ;;  %v1375_v23 = vadd.f32 %v1374_v27, %v1334_v32  ;;  %v4971_v11 = vld [vmem:[#allocation17_spill] sm:$0xff]  ;;  %v4972_v46 = vld [vmem:[#allocation19_spill] sm:$0xff]  ;;  %v4973_v27 = vld [vmem:[#allocation20_spill] sm:$0xff] }
 0x1d3   :  { %v1422_v22 = vadd.f32 %v1421_v63, %v1395_v57  ;;  %v1443_v39 = vadd.f32 %v1442_v50, %v1396_v16  ;;  %v4045_v2 = vadd.f32 %v1223_v41, %v1222_v58  ;;  %v4047_v48 = vadd.f32 %v1244_v5, %v1243_v4  ;;  %v4974_v4 = vld [vmem:[#allocation21_spill] sm:$0xff] }
 0x1d4   :  { %v4051_v44 = vmul.f32 %v4970_v0, %v4969_v30  ;;  %v1565_v43 = vsub.f32 0.0, %v1559_v45  ;;  %v1915_v12 = vpop.eup %1914  ;;  %v1397_v8 = vmul.f32 %v4971_v11, %v4961_v9  ;;  %v1398_v3 = vmul.f32 %v4972_v46, %v4962_v36 }
 0x1d5   :  { %v1399_v63 = vmul.f32 %v4973_v27, %v4971_v11  ;;  %v1566_v50 = vsub.f32 0.0, %v1560_v40  ;;  %v1917_v58 = vpop.eup %1916  ;;  %v1355_v41 = vadd.f32 %v1354_v25, %v1335_v51  ;;  %v1400_v5 = vmul.f32 %v4974_v4, %v4972_v46 }
 0x1d6   :  { %v1401_v32 = vmul.f32 %v4708_v35, %v4973_v27  ;;  %v4063_v45 = vmul.f32 %v1915_v12, %v1565_v43  ;;  %v1376_v57 = vadd.f32 %v1375_v23, %v1336_v42  ;;  %v1423_v16 = vadd.f32 %v1422_v22, %v1397_v8 }
 0x1d7   :  { %v1444_v9 = vadd.f32 %v1443_v39, %v1398_v3  ;;  %v4065_v34 = vmul.f32 %v1917_v58, %v1566_v50  ;;  %v1356_v39 = vadd.f32 %v1355_v41, %v1337_v33  ;;  %v1402_v18 = vmul.f32 %v4709_v21, %v4974_v4 }
 0x1d8   :  { %v1571_v36 = vmul.f32 %v4063_v45, %v3939_v19  ;;  %v1575_v40 = vmul.f32 %v4063_v45, %v3966_v15  ;;  %v1579_v51 = vmul.f32 %v4063_v45, %v3963_v10  ;;  %v1583_v11 = vmul.f32 %v4063_v45, %v4063_v45 }
 0x1d9   :  { %v1572_v25 = vmul.f32 %v4065_v34, %v3945_v53  ;;  %v1576_v42 = vmul.f32 %v4065_v34, %v3975_v38  ;;  %v1580_v23 = vmul.f32 %v4065_v34, %v3972_v60  ;;  %v1584_v22 = vmul.f32 %v4065_v34, %v4065_v34 }
 0x1da   :  { %v4084_v0 = vadd.f32 %v1571_v36, %v3963_v10  ;;  %v4087_v43 = vadd.f32 %v1575_v40, %v3966_v15  ;;  %v1585_v12 = vsub.f32 1.0, %v1583_v11  ;;  %v1377_v8 = vadd.f32 %v1376_v57, %v1338_v52 }
 0x1db   :  { %v4090_v46 = vadd.f32 %v1572_v25, %v3972_v60  ;;  %v4093_v3 = vadd.f32 %v1576_v42, %v3975_v38  ;;  %v1586_v27 = vsub.f32 1.0, %v1584_v22  ;;  %v1424_v50 = vadd.f32 %v1423_v16, %v1399_v63 }
 0x1dc   :  { %v4096_v58 = vadd.f32 %v1579_v51, %v3939_v19  ;;  %v4099_v33 = vmul.f32 %v1585_v12, %v3978_v1  ;;  %v1593_v10 = vmul.f32 %v4084_v0, %v4953_v26  ;;  %v1445_v15 = vadd.f32 %v1444_v9, %v1400_v5  ;;  %v4975_v19 = vld [vmem:[#allocation39_spill] sm:$0xff]  ;;  %v4983_v12 = vld [vmem:[#allocation37_spill] sm:$0xff] }
 0x1dd   :  { %v4104_v52 = vadd.f32 %v1580_v23, %v3945_v53  ;;  %v4107_v60 = vmul.f32 %v1586_v27, %v3983_v59  ;;  %v1594_v38 = vmul.f32 %v4090_v46, %v4956_v29  ;;  %v1597_v1 = vmul.f32 %v4087_v43, %v4919_v20  ;;  %v4978_v59 = vld [vmem:[#allocation30_spill] sm:$0xff]  ;;  %v4981_v23 = vld [vmem:[#allocation24_spill] sm:$0xff] }
 0x1de   :  { %vm1589_vm1 = vcmp.le.f32.partialorder %v4099_v33, 0.0  ;;  %v1595_v63 = vadd.f32 %v1593_v10, %v4975_v19  ;;  %v1598_v41 = vmul.f32 %v4093_v3, %v4922_v49  ;;  %vm1609_vm5 = vcmp.gt.f32.partialorder %v4099_v33, 0.0 }
 0x1df   :  { %vm1590_vm2 = vcmp.le.f32.partialorder %v4107_v60, 0.0  ;;  %vm4120_vm3 = vmor %vm3995_vm14, %vm1589_vm1  ;;  %v1596_v5 = vadd.f32 %v1594_v38, %v4978_v59  ;;  %vm1610_vm6 = vcmp.gt.f32.partialorder %v4107_v60, 0.0  ;;  %v1601_v47 = vmul.f32 %v4096_v58, %v4883_v56 }
 0x1e0   :  { %vm4129_vm7 = vmor %vm4004_vm0, %vm1590_vm2  ;;  %v1599_v16 = vadd.f32 %v1597_v1, %v1595_v63  ;;  %v1611_v9 = vsel %vm1609_vm5, %v4099_v33, 1.0  ;;  %v1612_v36 = vsel %vm1610_vm6, %v4107_v60, 1.0  ;;  %v1357_v40 = vadd.f32 %v1356_v39, %v1339_v6  ;;  %v4987_v63 = vld [vmem:[#allocation36_spill] sm:$0xff]  ;;  %v4988_v1 = vld [vmem:[#allocation15_spill] sm:$0xff] }
 0x1e1   :  { %v1600_v51 = vadd.f32 %v1598_v41, %v1596_v5  ;;  %v1602_v11 = vmul.f32 %v4104_v52, %v4884_v55  ;;  %1918 = vrcp.f32 %v1611_v9  ;;  %v1425_v25 = vadd.f32 %v1424_v50, %v1401_v32 }
 0x1e2   :  { %v1603_v42 = vadd.f32 %v1601_v47, %v1599_v16  ;;  %1920 = vrcp.f32 %v1612_v36  ;;  %v4982_v22 = vrot.slane %v4981_v23, 1  ;;  %v4984_v27 = vrot.slane %v4983_v12, 1 }
 0x1e3   :  { %v4986_v39 = vrot.slane %v4969_v30, 1  ;;  %v1341_v4 = vmul.f32 %v4988_v1, %v4987_v63  ;;  %v1604_v32 = vadd.f32 %v1602_v11, %v1600_v51  ;;  %v1378_v50 = vadd.f32 %v1377_v8, %v4051_v44 }
 0x1e4   :  { %v1282_v10 = vsel %vm1280_vm4, %v4984_v27, %v4982_v22  ;;  %v4985_v6 = vmov %v4984_v27  ;;  %v1403_v41 = vmul.f32 %v4710_v24, %v4708_v35  ;;  %v1446_v5 = vadd.f32 %v1445_v15, %v1402_v18  ;;  %v4989_v35 = vld [vmem:[#allocation22_spill] sm:$0xff] }
 0x1e5   :  { %v1284_v38 = vsel %vm1280_vm4, %v4986_v39, %v4985_v6  ;;  %v1605_v16 = vmul.f32 %v4063_v45, %v3256_v7  ;;  %v1225_v47 = vrot.slane %v4045_v2, 1  ;;  %v1246_v9 = vrot.slane %v4047_v48, 1  ;;  %v4990_v15 = vld [vmem:[#allocation14_spill] sm:$0xff]  ;;  %v4991_v39 = vld [vmem:[#allocation29_spill] sm:$0xff] }
 0x1e6   :  { %v1358_v36 = vadd.f32 %v1357_v40, %v1341_v4  ;;  %v1606_v22 = vmul.f32 %v4065_v34, %v4850_v37  ;;  %v1342_v27 = vmul.f32 %v1284_v38, %v4983_v12  ;;  %v1404_v44 = vmul.f32 %v4711_v62, %v4709_v21 }
 0x1e7   :  { %v1426_v8 = vadd.f32 %v1425_v25, %v1403_v41  ;;  %v1607_v51 = vadd.f32 %v1605_v16, %v1603_v42  ;;  %v1343_v11 = vmul.f32 %v4990_v15, %v4989_v35  ;;  %v1405_v1 = vmul.f32 %v4991_v39, %v4710_v24 }
 0x1e8   :  { %v1608_v18 = vadd.f32 %v1606_v22, %v1604_v32  ;;  %v1379_v6 = vadd.f32 %v1378_v50, %v1342_v27  ;;  %v1447_v28 = vadd.f32 %v1446_v5, %v1404_v44  ;;  %v4172_v40 = vadd.f32 %v1225_v47, %v4045_v2  ;;  %v4992_v2 = vld [vmem:[#allocation31_spill] sm:$0xff] }
 0x1e9   :  { %v4175_v4 = vadd.f32 %v1246_v9, %v4047_v48  ;;  %v1344_v38 = vmul.f32 %v1282_v10, %v4981_v23  ;;  %v1359_v21 = vadd.f32 %v1358_v36, %v1343_v11  ;;  %v1406_v25 = vmul.f32 %v4762_v31, %v4711_v62  ;;  %v4993_v62 = vld [vmem:[#allocation32_spill] sm:$0xff] }
 0x1ea   :  { %v1407_v42 = vmul.f32 %v4763_v13, %v4991_v39  ;;  %v1427_v32 = vadd.f32 %v1426_v8, %v1405_v1  ;;  %v1613_v50 = vsub.f32 0.0, %v1607_v51  ;;  %v1408_v24 = vmul.f32 %v2342_v14, %v4762_v31 }
 0x1eb   :  { %v1919_v41 = vpop.eup %1918  ;;  %v1409_v5 = vmul.f32 %v4992_v2, %v4763_v13  ;;  %v1410_v48 = vmul.f32 %v2369_v54, %v2342_v14  ;;  %v1614_v10 = vsub.f32 0.0, %v1608_v18  ;;  %v1380_v47 = vadd.f32 %v1379_v6, %v1344_v38 }
 0x1ec   :  { %v1921_v16 = vpop.eup %1920  ;;  %v1411_v9 = vmul.f32 %v4993_v62, %v4992_v2  ;;  %v1448_v36 = vadd.f32 %v1447_v28, %v1406_v25  ;;  %v4190_v22 = vmul.f32 %v1919_v41, %v1613_v50  ;;  %v1360_v27 = vrot.slane %v1359_v21, 4 }
 0x1ed   :  { %v1412_v44 = vmul.f32 %v4965_v17, %v2369_v54  ;;  %v1413_v31 = vmul.f32 %v4967_v61, %v4993_v62  ;;  %v4196_v13 = vmul.f32 %v1921_v16, %v1614_v10  ;;  %v1428_v8 = vadd.f32 %v1427_v32, %v1407_v42 }
 0x1ee   :  { %v1619_v14 = vmul.f32 %v4190_v22, %v4063_v45  ;;  %v1623_v51 = vmul.f32 %v4190_v22, %v4096_v58  ;;  %v1627_v28 = vmul.f32 %v4190_v22, %v4087_v43  ;;  %v1631_v18 = vmul.f32 %v4190_v22, %v4084_v0 }
 0x1ef   :  { %v1620_v15 = vmul.f32 %v4196_v13, %v4065_v34  ;;  %v1624_v54 = vmul.f32 %v4196_v13, %v4104_v52  ;;  %v1628_v11 = vmul.f32 %v4196_v13, %v4093_v3  ;;  %v1381_v6 = vrot.slane %v1380_v47, 4 }
 0x1f0   :  { %v1449_v39 = vadd.f32 %v1448_v36, %v1408_v24  ;;  %v4213_v1 = vadd.f32 %v1619_v14, %v4084_v0  ;;  %v4216_v38 = vadd.f32 %v1623_v51, %v4087_v43  ;;  %v1361_v25 = vadd.f32 %v1360_v27, %v1359_v21 }
 0x1f1   :  { %v4219_v42 = vadd.f32 %v1620_v15, %v4090_v46  ;;  %v4222_v32 = vadd.f32 %v1624_v54, %v4093_v3  ;;  %v1632_v50 = vmul.f32 %v4196_v13, %v4090_v46  ;;  %v4227_v41 = vadd.f32 %v1627_v28, %v4096_v58 }
 0x1f2   :  { %v1635_v0 = vmul.f32 %v4190_v22, %v4190_v22  ;;  %v1636_v43 = vmul.f32 %v4196_v13, %v4196_v13  ;;  %v1645_v21 = vmul.f32 %v4213_v1, %v4975_v19  ;;  %v1429_v24 = vadd.f32 %v1428_v8, %v1409_v5 }
 0x1f3   :  { %v4236_v2 = vadd.f32 %v1628_v11, %v4104_v52  ;;  %v4239_v3 = vadd.f32 %v1631_v18, %v4063_v45  ;;  %v1646_v46 = vmul.f32 %v4219_v42, %v4978_v59  ;;  %v1649_v62 = vmul.f32 %v4216_v38, %v4953_v26 }
 0x1f4   :  { %v1637_v58 = vsub.f32 1.0, %v1635_v0  ;;  %v1638_v10 = vsub.f32 1.0, %v1636_v43  ;;  %v1647_v16 = vadd.f32 %v1645_v21, %v4172_v40  ;;  %v1450_v36 = vadd.f32 %v1449_v39, %v1410_v48 }
 0x1f5   :  { %v4247_v27 = vadd.f32 %v1632_v50, %v4065_v34  ;;  %v1648_v52 = vadd.f32 %v1646_v46, %v4175_v4  ;;  %v1650_v45 = vmul.f32 %v4222_v32, %v4956_v29  ;;  %v1653_v51 = vmul.f32 %v4227_v41, %v4919_v20 }
 0x1f6   :  { %v4253_v5 = vmul.f32 %v1637_v58, %v4099_v33  ;;  %v4256_v8 = vmul.f32 %v1638_v10, %v4107_v60  ;;  %v1651_v14 = vadd.f32 %v1649_v62, %v1647_v16  ;;  %v1362_v28 = vrot.slane %v1361_v25, 2 }
 0x1f7   :  { %v1382_v48 = vadd.f32 %v1381_v6, %v1380_v47  ;;  %v1652_v15 = vadd.f32 %v1650_v45, %v1648_v52  ;;  %v1654_v34 = vmul.f32 %v4236_v2, %v4922_v49  ;;  %v1430_v54 = vadd.f32 %v1429_v24, %v1411_v9 }
 0x1f8   :  { %v1655_v11 = vadd.f32 %v1653_v51, %v1651_v14  ;;  %v1657_v18 = vmul.f32 %v4239_v3, %v4883_v56  ;;  %vm1665_vm4 = vcmp.gt.f32.partialorder %v4253_v5, 0.0  ;;  %v1658_v60 = vmul.f32 %v4247_v27, %v4884_v55 }
 0x1f9   :  { %v1656_v33 = vadd.f32 %v1654_v34, %v1652_v15  ;;  %vm1666_vm8 = vcmp.gt.f32.partialorder %v4256_v8, 0.0  ;;  %v1667_v39 = vsel %vm1665_vm4, %v4253_v5, 1.0  ;;  %v1451_v47 = vadd.f32 %v1450_v36, %v1412_v44 }
 0x1fa   :  { %v1659_v6 = vadd.f32 %v1657_v18, %v1655_v11  ;;  %v1668_v50 = vsel %vm1666_vm8, %v4256_v8, 1.0  ;;  %1922 = vrcp.f32 %v1667_v39  ;;  %v1383_v9 = vrot.slane %v1382_v48, 2 }
 0x1fb   :  { %v1660_v0 = vadd.f32 %v1658_v60, %v1656_v33  ;;  %v1661_v43 = vmul.f32 %v4190_v22, %v3256_v7  ;;  %1924 = vrcp.f32 %v1668_v50  ;;  %v1414_v21 = vmul.f32 %v4969_v30, %v4965_v17 }
 0x1fc   :  { %v1662_v24 = vmul.f32 %v4196_v13, %v4850_v37  ;;  %v1431_v46 = vadd.f32 %v1430_v54, %v1413_v31  ;;  %v1363_v16 = vadd.f32 %v1362_v28, %v1361_v25  ;;  %v1384_v62 = vadd.f32 %v1383_v9, %v1382_v48 }
 0x1fd   :  { %v1663_v58 = vadd.f32 %v1661_v43, %v1659_v6  ;;  %v1452_v10 = vadd.f32 %v1451_v47, %v1414_v21  ;;  %v1415_v36 = vmul.f32 %v4987_v63, %v4967_v61  ;;  %v1416_v52 = vmul.f32 %v4983_v12, %v4969_v30 }
 0x1fe   :  { %v1664_v44 = vadd.f32 %v1662_v24, %v1660_v0  ;;  %v1364_v17 = vrot.slane %v1363_v16, 1  ;;  %v1385_v34 = vrot.slane %v1384_v62, 1  ;;  %v1417_v31 = vmul.f32 %v4989_v35, %v4987_v63 }
 0x1ff   :  { %v1432_v45 = vadd.f32 %v1431_v46, %v1415_v36  ;;  %v1669_v14 = vsub.f32 0.0, %v1663_v58  ;;  %v1453_v51 = vadd.f32 %v1452_v10, %v1416_v52  ;;  %v1418_v25 = vmul.f32 %v4981_v23, %v4983_v12 }
 0x200   :  { %v1670_v15 = vsub.f32 0.0, %v1664_v44  ;;  %v4288_v30 = vadd.f32 %v1364_v17, %v1363_v16  ;;  %v4290_v33 = vadd.f32 %v1385_v34, %v1384_v62  ;;  %vm1641_vm13 = vcmp.le.f32.partialorder %v4253_v5, 0.0 }
 0x201   :  { %v1433_v48 = vadd.f32 %v1432_v45, %v1417_v31  ;;  %v1454_v61 = vadd.f32 %v1453_v51, %v1418_v25  ;;  %vm1642_vm14 = vcmp.le.f32.partialorder %v4256_v8, 0.0  ;;  %vm1643_vm0 = vmor %vm4120_vm3, %vm1641_vm13  ;;  %vm1845_vm3 = vcmask 1042432  }
 0x202   :  { %vm1644_vm2 = vmor %vm4129_vm7, %vm1642_vm14  ;;  %vm1848_vm13 = vcmask 1043456   ;;  %vm1851_vm14 = vcmask 1044480  }
 0x203   :  { %v1434_v47 = vrot.slane %v1433_v48, 4  ;;  %v1455_v0 = vrot.slane %v1454_v61, 4 }
 0x204   :  { %v1923_v54 = vpop.eup %1922 }
 0x205   :  { %v1925_v28 = vpop.eup %1924  ;;  %v4284_v11 = vmul.f32 %v1923_v54, %v1669_v14  ;;  %v1435_v25 = vadd.f32 %v1434_v47, %v1433_v48 }
 0x206   :  { %v4286_v18 = vmul.f32 %v1925_v28, %v1670_v15 }
 0x207   :  { %v1675_v60 = vmul.f32 %v4284_v11, %v4190_v22  ;;  %v1679_v63 = vmul.f32 %v4284_v11, %v4239_v3  ;;  %v1683_v35 = vmul.f32 %v4284_v11, %v4227_v41  ;;  %v1687_v50 = vmul.f32 %v4284_v11, %v4216_v38 }
 0x208   :  { %v1676_v23 = vmul.f32 %v4286_v18, %v4196_v13  ;;  %v1680_v12 = vmul.f32 %v4286_v18, %v4247_v27  ;;  %v1684_v39 = vmul.f32 %v4286_v18, %v4236_v2  ;;  %v1688_v9 = vmul.f32 %v4286_v18, %v4222_v32 }
 0x209   :  { %v4305_v6 = vadd.f32 %v1675_v60, %v4213_v1  ;;  %v4315_v21 = vadd.f32 %v1679_v63, %v4216_v38  ;;  %v1691_v46 = vmul.f32 %v4284_v11, %v4213_v1  ;;  %v1692_v58 = vmul.f32 %v4286_v18, %v4219_v42 }
 0x20a   :  { %v4312_v43 = vadd.f32 %v1676_v23, %v4219_v42  ;;  %v4318_v24 = vadd.f32 %v1680_v12, %v4222_v32  ;;  %v1695_v10 = vmul.f32 %v4284_v11, %v4284_v11  ;;  %v1696_v44 = vmul.f32 %v4286_v18, %v4286_v18 }
 0x20b   :  { %v4329_v16 = vadd.f32 %v1683_v35, %v4227_v41  ;;  %v4332_v38 = vadd.f32 %v1684_v39, %v4236_v2  ;;  %v1705_v32 = vmul.f32 %v4305_v6, %v4172_v40  ;;  %v4339_v42 = vadd.f32 %v1687_v50, %v4239_v3 }
 0x20c   :  { %v1706_v1 = vmul.f32 %v4312_v43, %v4175_v4  ;;  %v4342_v62 = vadd.f32 %v1688_v9, %v4247_v27  ;;  %v1697_v36 = vsub.f32 1.0, %v1695_v10  ;;  %v1698_v52 = vsub.f32 1.0, %v1696_v44 }
 0x20d   :  { %v1707_v41 = vadd.f32 %v1705_v32, %v4288_v30  ;;  %v1709_v2 = vmul.f32 %v4315_v21, %v4975_v19  ;;  %v1710_v14 = vmul.f32 %v4318_v24, %v4978_v59  ;;  %v4351_v51 = vadd.f32 %v1691_v46, %v4190_v22 }
 0x20e   :  { %v1708_v45 = vadd.f32 %v1706_v1, %v4290_v33  ;;  %v4354_v3 = vadd.f32 %v1692_v58, %v4196_v13  ;;  %v4357_v27 = vmul.f32 %v1697_v36, %v4253_v5  ;;  %v4360_v15 = vmul.f32 %v1698_v52, %v4256_v8 }
 0x20f   :  { %v1711_v17 = vadd.f32 %v1709_v2, %v1707_v41  ;;  %v1713_v31 = vmul.f32 %v4329_v16, %v4953_v26  ;;  %v1714_v54 = vmul.f32 %v4332_v38, %v4956_v29  ;;  %v1717_v22 = vmul.f32 %v4339_v42, %v4919_v20 }
 0x210   :  { %v1712_v34 = vadd.f32 %v1710_v14, %v1708_v45  ;;  %v1718_v13 = vmul.f32 %v4342_v62, %v4922_v49  ;;  %vm1729_vm9 = vcmp.gt.f32.partialorder %v4357_v27, 0.0  ;;  %vm1730_vm10 = vcmp.gt.f32.partialorder %v4360_v15, 0.0 }
 0x211   :  { %v1715_v28 = vadd.f32 %v1713_v31, %v1711_v17  ;;  %v1456_v63 = vadd.f32 %v1455_v0, %v1454_v61  ;;  %v1721_v23 = vmul.f32 %v4351_v51, %v4883_v56  ;;  %v1731_v12 = vsel %vm1729_vm9, %v4357_v27, 1.0 }
 0x212   :  { %v1716_v60 = vadd.f32 %v1714_v54, %v1712_v34  ;;  %v1732_v48 = vsel %vm1730_vm10, %v4360_v15, 1.0  ;;  %v1722_v47 = vmul.f32 %v4354_v3, %v4884_v55  ;;  %1926 = vrcp.f32 %v1731_v12 }
 0x213   :  { %v1719_v35 = vadd.f32 %v1717_v22, %v1715_v28  ;;  %1928 = vrcp.f32 %v1732_v48  ;;  %v1725_v46 = vmul.f32 %v4284_v11, %v3256_v7  ;;  %v1726_v61 = vmul.f32 %v4286_v18, %v4850_v37 }
 0x214   :  { %v1720_v39 = vadd.f32 %v1718_v13, %v1716_v60  ;;  %v1436_v0 = vrot.slane %v1435_v25, 2  ;;  %v1457_v58 = vrot.slane %v1456_v63, 2  ;;  %vm1701_vm15 = vcmp.le.f32.partialorder %v4357_v27, 0.0 }
 0x215   :  { %v1723_v50 = vadd.f32 %v1721_v23, %v1719_v35  ;;  %vm1702_vm1 = vcmp.le.f32.partialorder %v4360_v15, 0.0  ;;  %vm1703_vm6 = vmor %vm1643_vm0, %vm1701_vm15  ;;  %vm1854_vm15 = vcmask 1045504   ;;  %vm1857_vm0 = vcmask 1046528  }
 0x216   :  { %v1724_v9 = vadd.f32 %v1722_v47, %v1720_v39  ;;  %v1437_v32 = vadd.f32 %v1436_v0, %v1435_v25  ;;  %v1458_v36 = vadd.f32 %v1457_v58, %v1456_v63  ;;  %vm1704_vm8 = vmor %vm1644_vm2, %vm1702_vm1 }
 0x217   :  { %v1727_v10 = vadd.f32 %v1725_v46, %v1723_v50 }
 0x218   :  { %v1728_v44 = vadd.f32 %v1726_v61, %v1724_v9  ;;  %v1438_v2 = vrot.slane %v1437_v32, 1  ;;  %v1459_v17 = vrot.slane %v1458_v36, 1 }
 0x219   :  { %v1733_v1 = vsub.f32 0.0, %v1727_v10 }
 0x21a   :  { %v1734_v52 = vsub.f32 0.0, %v1728_v44  ;;  %v1439_v13 = vadd.f32 %v1438_v2, %v1437_v32  ;;  %v1460_v23 = vadd.f32 %v1459_v17, %v1458_v36 }
 0x21c   :  { %v1927_v41 = vpop.eup %1926 }
 0x21d   :  { %v1929_v45 = vpop.eup %1928  ;;  %v4382_v14 = vmul.f32 %v1927_v41, %v1733_v1 }
 0x21e   :  { %v4384_v34 = vmul.f32 %v1929_v45, %v1734_v52 }
 0x21f   :  { %v1739_v31 = vmul.f32 %v4382_v14, %v4284_v11  ;;  %v1743_v54 = vmul.f32 %v4382_v14, %v4351_v51  ;;  %v1747_v60 = vmul.f32 %v4382_v14, %v4339_v42  ;;  %v1751_v48 = vmul.f32 %v4382_v14, %v4329_v16 }
 0x220   :  { %v1740_v25 = vmul.f32 %v4384_v34, %v4286_v18  ;;  %v1744_v22 = vmul.f32 %v4384_v34, %v4354_v3  ;;  %v1748_v63 = vmul.f32 %v4384_v34, %v4342_v62  ;;  %v1752_v35 = vmul.f32 %v4384_v34, %v4332_v38 }
 0x221   :  { %v4395_v28 = vadd.f32 %v1739_v31, %v4305_v6  ;;  %v4409_v39 = vadd.f32 %v1743_v54, %v4315_v21  ;;  %v1755_v50 = vmul.f32 %v4382_v14, %v4315_v21  ;;  %v1756_v9 = vmul.f32 %v4384_v34, %v4318_v24 }
 0x222   :  { %v4402_v12 = vadd.f32 %v1740_v25, %v4312_v43  ;;  %v4412_v47 = vadd.f32 %v1744_v22, %v4318_v24  ;;  %v1763_v46 = vmul.f32 %v4382_v14, %v4382_v14  ;;  %v1764_v61 = vmul.f32 %v4384_v34, %v4384_v34 }
 0x223   :  { %v1773_v0 = vmul.f32 %v4395_v28, %v4288_v30  ;;  %v4427_v10 = vadd.f32 %v1747_v60, %v4329_v16  ;;  %v4430_v21 = vadd.f32 %v1748_v63, %v4332_v38  ;;  %v1759_v24 = vmul.f32 %v4382_v14, %v4305_v6 }
 0x224   :  { %v1774_v58 = vmul.f32 %v4402_v12, %v4290_v33  ;;  %v1760_v44 = vmul.f32 %v4384_v34, %v4312_v43  ;;  %v1765_v32 = vsub.f32 1.0, %v1763_v46  ;;  %v1766_v1 = vsub.f32 1.0, %v1764_v61 }
 0x225   :  { %v1775_v36 = vadd.f32 %v1773_v0, %v1439_v13  ;;  %v4437_v30 = vadd.f32 %v1751_v48, %v4339_v42  ;;  %v4440_v33 = vadd.f32 %v1752_v35, %v4342_v62  ;;  %v1777_v16 = vmul.f32 %v4409_v39, %v4172_v40 }
 0x226   :  { %v1776_v52 = vadd.f32 %v1774_v58, %v1460_v23  ;;  %v1778_v38 = vmul.f32 %v4412_v47, %v4175_v4  ;;  %v4447_v6 = vadd.f32 %v1755_v50, %v4351_v51  ;;  %v4450_v43 = vadd.f32 %v1756_v9, %v4354_v3 }
 0x227   :  { %v1767_v41 = vmul.f32 %v1765_v32, %v4357_v27  ;;  %v1768_v42 = vmul.f32 %v1766_v1, %v4360_v15  ;;  %v1779_v45 = vadd.f32 %v1777_v16, %v1775_v36  ;;  %v1781_v62 = vmul.f32 %v4427_v10, %v4975_v19  ;;  %v4994_v15 = vld [vmem:[#allocation11_spill] sm:$0xff] }
 0x228   :  { %v1780_v2 = vadd.f32 %v1778_v38, %v1776_v52  ;;  %v1782_v40 = vmul.f32 %v4430_v21, %v4978_v59  ;;  %v4459_v4 = vadd.f32 %v1759_v24, %v4284_v11  ;;  %v4462_v51 = vadd.f32 %v1760_v44, %v4286_v18 }
 0x229   :  { %v1783_v3 = vadd.f32 %v1781_v62, %v1779_v45  ;;  %v1785_v31 = vmul.f32 %v4437_v30, %v4953_v26  ;;  %v1786_v54 = vmul.f32 %v4440_v33, %v4956_v29  ;;  %v1789_v19 = vmul.f32 %v4447_v6, %v4919_v20 }
 0x22a   :  { %v1784_v17 = vadd.f32 %v1782_v40, %v1780_v2  ;;  %v1790_v59 = vmul.f32 %v4450_v43, %v4922_v49  ;;  %vm1801_vm11 = vcmp.gt.f32.partialorder %v1767_v41, 0.0  ;;  %vm1802_vm12 = vcmp.gt.f32.partialorder %v1768_v42, 0.0 }
 0x22b   :  { %v1787_v11 = vadd.f32 %v1785_v31, %v1783_v3  ;;  %v1803_v18 = vsel %vm1801_vm11, %v1767_v41, 1.0  ;;  %v1804_v22 = vsel %vm1802_vm12, %v1768_v42, 1.0  ;;  %v1793_v26 = vmul.f32 %v4459_v4, %v4883_v56 }
 0x22c   :  { %v1788_v25 = vadd.f32 %v1786_v54, %v1784_v17  ;;  %1930 = vrcp.f32 %v1803_v18  ;;  %v1794_v20 = vmul.f32 %v4462_v51, %v4884_v55  ;;  %v1797_v63 = vmul.f32 %v4382_v14, %v3256_v7 }
 0x22d   :  { %v1791_v13 = vadd.f32 %v1789_v19, %v1787_v11  ;;  %1932 = vrcp.f32 %v1804_v22  ;;  %v1798_v5 = vmul.f32 %v4384_v34, %v4850_v37  ;;  %vm1769_vm5 = vcmp.le.f32.partialorder %v1767_v41, 0.0 }
 0x22e   :  { %v1792_v29 = vadd.f32 %v1790_v59, %v1788_v25  ;;  %vm1770_vm4 = vcmp.le.f32.partialorder %v1768_v42, 0.0  ;;  %vm1771_vm9 = vmor %vm1703_vm6, %vm1769_vm5  ;;  %vm1839_vm11 = vcmask 1040384   ;;  %vm1842_vm12 = vcmask 1041408  }
 0x22f   :  { %v1795_v49 = vadd.f32 %v1793_v26, %v1791_v13  ;;  %vm1772_vm10 = vmor %vm1704_vm8, %vm1770_vm4  ;;  %vm1861_vm7 = vcmp.eq.s32.totalorder %v4994_v15, 0  ;;  %v4995_v23 = vmov 0   ;;  %v2004_v24 = vmov 0.0  }
 0x230   :  { %v1796_v60 = vadd.f32 %v1794_v20, %v1792_v29  ;;  %v1865_v48 = vsel %vm1771_vm9, 1, %v4995_v23  ;;  %v1866_v35 = vsel %vm1772_vm10, 1, %v4995_v23  ;;  %v1863_v44 = vsel %vm1861_vm7, 1.0, %v2004_v24 }
 0x231   :  { %v1799_v56 = vadd.f32 %v1797_v63, %v1795_v49  ;;  %vm1867_vm1 = vcmp.eq.s32.totalorder %v1865_v48, 1  ;;  %vm1868_vm2 = vcmp.eq.s32.totalorder %v1866_v35, 1 }
 0x232   :  { %v1800_v55 = vadd.f32 %v1798_v5, %v1796_v60 }
 0x233   :  { %v1805_v8 = vsub.f32 0.0, %v1799_v56 }
 0x234   :  { %v1806_v7 = vsub.f32 0.0, %v1800_v55 }
 0x236   :  { %v1931_v27 = vpop.eup %1930 }
 0x237   :  { %v1933_v37 = vpop.eup %1932  ;;  %v1809_v53 = vmul.f32 %v1931_v27, %v1805_v8 }
 0x238   :  { %v1810_v57 = vmul.f32 %v1933_v37, %v1806_v7 }
 0x239   :  { %v1811_v50 = vmul.f32 %v1809_v53, %v4382_v14  ;;  %v1815_v9 = vmul.f32 %v1809_v53, %v4459_v4  ;;  %v1819_v46 = vmul.f32 %v1809_v53, %v4447_v6  ;;  %v1823_v61 = vmul.f32 %v1809_v53, %v4437_v30 }
 0x23a   :  { %v1812_v0 = vmul.f32 %v1810_v57, %v4384_v34  ;;  %v1816_v58 = vmul.f32 %v1810_v57, %v4462_v51  ;;  %v1820_v1 = vmul.f32 %v1810_v57, %v4450_v43  ;;  %v1824_v36 = vmul.f32 %v1810_v57, %v4440_v33 }
 0x23b   :  { %v1813_v32 = vadd.f32 %v1811_v50, %v4395_v28  ;;  %v1817_v16 = vadd.f32 %v1815_v9, %v4409_v39  ;;  %v1821_v41 = vadd.f32 %v1819_v46, %v4427_v10  ;;  %v1825_v42 = vadd.f32 %v1823_v61, %v4437_v30 }
 0x23c   :  { %v1814_v52 = vadd.f32 %v1812_v0, %v4402_v12  ;;  %v1818_v38 = vadd.f32 %v1816_v58, %v4412_v47  ;;  %v1827_v45 = vmul.f32 %v1809_v53, %v4427_v10  ;;  %v1828_v2 = vmul.f32 %v1810_v57, %v4430_v21 }
 0x23d   :  { %v1831_v62 = vmul.f32 %v1809_v53, %v4409_v39  ;;  %v1832_v40 = vmul.f32 %v1810_v57, %v4412_v47  ;;  %v1840_v3 = vsel %vm1839_vm11, 1.0, %v1813_v32  ;;  %v1822_v31 = vadd.f32 %v1820_v1, %v4430_v21 }
 0x23e   :  { %v1841_v17 = vsel %vm1839_vm11, 1.0, %v1814_v52  ;;  %v1826_v54 = vadd.f32 %v1824_v36, %v4440_v33  ;;  %v1835_v19 = vmul.f32 %v1809_v53, %v4395_v28  ;;  %v1836_v30 = vmul.f32 %v1810_v57, %v4402_v12 }
 0x23f   :  { %v1829_v10 = vadd.f32 %v1827_v45, %v4447_v6  ;;  %v1830_v59 = vadd.f32 %v1828_v2, %v4450_v43  ;;  %v1843_v39 = vsel %vm1842_vm12, %v1840_v3, %v1817_v16  ;;  %v1844_v47 = vsel %vm1842_vm12, %v1841_v17, %v1818_v38 }
 0x240   :  { %v1846_v11 = vsel %vm1845_vm3, %v1843_v39, %v1821_v41  ;;  %v1847_v25 = vsel %vm1845_vm3, %v1844_v47, %v1822_v31  ;;  %v1871_v21 = vsel %vm1867_vm1, 0.0, %v1809_v53  ;;  %v1872_v33 = vsel %vm1868_vm2, 0.0, %v1810_v57 }
 0x241   :  { %v1833_v28 = vadd.f32 %v1831_v62, %v4459_v4  ;;  %v1834_v12 = vadd.f32 %v1832_v40, %v4462_v51  ;;  %v1849_v6 = vsel %vm1848_vm13, %v1846_v11, %v1825_v42  ;;  %v1850_v43 = vsel %vm1848_vm13, %v1847_v25, %v1826_v54  ;;  %1875 = vst [vmem:[#allocation5 + $0x10] sm:$0x1] %v1871_v21 }
 0x242   :  { %1876 = vst [vmem:[#allocation5 + $0x18] sm:$0x1] %v1872_v33  ;;  %v1837_v18 = vadd.f32 %v1835_v19, %v4382_v14  ;;  %v1838_v22 = vadd.f32 %v1836_v30, %v4384_v34  ;;  %v1852_v26 = vsel %vm1851_vm14, %v1849_v6, %v1829_v10  ;;  %v1853_v13 = vsel %vm1851_vm14, %v1850_v43, %v1830_v59 }
 0x243   :  { %v1855_v4 = vsel %vm1854_vm15, %v1852_v26, %v1833_v28  ;;  %v1856_v51 = vsel %vm1854_vm15, %v1853_v13, %v1834_v12 }
 0x244   :  { %v1858_v29 = vsel %vm1857_vm0, %v1855_v4, %v1837_v18  ;;  %v1859_v20 = vsel %vm1857_vm0, %v1856_v51, %v1838_v22 }
 0x245   :  { %v1869_v49 = vsel %vm1867_vm1, %v1863_v44, %v1858_v29  ;;  %v1870_v60 = vsel %vm1868_vm2, %v1863_v44, %v1859_v20 }
 0x246   :  { %1873 = vst [vmem:[#allocation5] sm:$0xff] %v1869_v49  ;;  %1874 = vst [vmem:[#allocation5 + $0x8] sm:$0xff] %v1870_v60 }
 0x247   :  { %1967 = shalt.err (!%p1964_p12)
}
 0x248   :  { %s1968_s3 = scalar_lea.hbm %s4554_s2, 512 }
 0x249   :  { %p1969_p13 = scmp.ne.s32.totalorder %s4554_s2, %s1968_s3  ;;  %p1972_p0 = scmp.lt.u32.totalorder %s1968_s3, %s4554_s2 }
 0x24b   :  { %p1974_p1 = pnand %p1972_p0, %p1969_p13 }
 0x24d   :  { %1977 = shalt.err (!%p1974_p1)
}
 0x24e   :  { %1888 = dma.vmem_to_hbm [thread:$0]  %s1883_s28, 512, %s4554_s2, [#allocation4], %s2001_s19, %s2001_s19, %s2002_s20  }
 0x24f   :  { %1980 = dma.done.wait [#allocation4], 512  }
 0x250   :  { %1981 = vsyncadd [#allocation4], 4294966784 }
 0x251   :  { %1892 = vsyncpa [#allocation3], 1 }
 0x252   :  { %1893 = vsyncpa [#allocation4], 1 }

</bundles_post_ra>
